<compile_context>
chip_gen: v7x
topology: tpu7x:2x2x1
jax: 0.10.0
libtpu: 0.0.40
codegen_flags: <defaults>
</compile_context>

<pallas_src>
import jax
import jax.numpy as jnp
from jax.experimental import pallas as pl
from jax.experimental.pallas import tpu as pltpu


def _round_up(x, m):
    return ((x + m - 1) // m) * m


def _cdiv(a, b):
    return -(-a // b)


def _device_kind():
    try:
        return jax.devices()[0].device_kind.lower()
    except Exception:
        return ""


def _make_mlp_kernel(bf16_elementwise):
    """Fused 4-layer MLP: Linear->ReLU, Linear->ReLU, Linear(BN1+BN2 folded)->ReLU, Linear."""

    def relu_to_bf16(v_f32):
        # v_f32 = f32 MXU accumulator + f32 bias.  On v6e/v7x do the ReLU in
        # bf16 (native bf16 VALU, half the vregs); on v5e ReLU in f32 then cast.
        if bf16_elementwise:
            return jnp.maximum(v_f32.astype(jnp.bfloat16), 0)
        return jnp.maximum(v_f32, 0.0).astype(jnp.bfloat16)

    def kernel(x_ref, w1_ref, w2_ref, w3_ref, w4_ref, vec_ref, out_ref):
        emb_p = w1_ref.shape[1]   # 1280 (padded to 128-multiple)
        h2_p = w2_ref.shape[1]    # 512
        h3_p = w3_ref.shape[1]    # 128  (64 real + zero pad)
        nc_p = w4_ref.shape[1]    # 128  (n_classes padded)

        o1 = emb_p
        o2 = o1 + h2_p
        o3 = o2 + h3_p
        o4 = o3 + nc_p

        b1 = vec_ref[:, 0:o1]     # [1, emb_p]
        b2 = vec_ref[:, o1:o2]    # [1, 512]
        b3 = vec_ref[:, o2:o3]    # [1, 128]  bias with BN1+BN2 folded in
        b4 = vec_ref[:, o3:o4]    # [1, 128]  final bias (zero-padded)

        x = x_ref[...]            # [TILE_B, stc_p] bf16

        # emb_layer: Linear(stc, emb) -> ReLU
        h = relu_to_bf16(
            jnp.dot(x, w1_ref[...], preferred_element_type=jnp.float32) + b1)

        # cls_head: Linear(emb, 512) -> ReLU   (BN1 affine folded forward into w3/b3)
        h = relu_to_bf16(
            jnp.dot(h, w2_ref[...], preferred_element_type=jnp.float32) + b2)

        # cls_head: Linear(512, 64) with BN1 (pre) and BN2 (post) folded -> ReLU
        # (columns padded to 128 with zeros; padded lanes stay exactly 0 after ReLU)
        h = relu_to_bf16(
            jnp.dot(h, w3_ref[...], preferred_element_type=jnp.float32) + b3)

        # cls_head: final Linear(64, n_classes), output lane-padded to 128 columns,
        # stored bf16 (lane dim kept at 128 -> unmasked vst).
        out_ref[...] = (jnp.dot(h, w4_ref[...], preferred_element_type=jnp.float32)
                        + b4).astype(out_ref.dtype)

    return kernel


def _fold_bn(gamma, beta, running_mean, running_var, eps=1e-5):
    """Eval-mode BatchNorm1d -> per-feature affine (scale, shift)."""
    inv_std = 1.0 / jnp.sqrt(running_var + eps)
    scale = gamma * inv_std
    shift = beta - running_mean * scale
    return scale, shift


def prepare_params(params, eps=1e-5):
    """One-time weight preprocessing.  Call ONCE and cache the result.

    * folds eval-mode BatchNorm1d(512) and BatchNorm1d(64) into Linear(512, 64),
    * zero-pads every matmul dimension to a multiple of 128 (lane-dense tiles),
    * casts all matmul operands to bf16 (f32 accumulation happens in-kernel),
    * packs every per-feature bias vector into one [1, F] f32 buffer (single DMA,
      each segment 128-aligned).
    """
    w1, b1 = params['w1'], params['b1']
    w2, b2 = params['w2'], params['b2']
    w3, b3 = params['w3'], params['b3']
    w4, b4 = params['w4'], params['b4']
    stc, emb = w1.shape
    h2d = w2.shape[1]
    h3d = w3.shape[1]
    n_classes = w4.shape[1]

    s1, t1 = _fold_bn(params['bn1_gamma'], params['bn1_beta'],
                      params['bn1_mean'], params['bn1_var'], eps)
    s2, t2 = _fold_bn(params['bn2_gamma'], params['bn2_beta'],
                      params['bn2_mean'], params['bn2_var'], eps)

    # Fold BN1 (applied after ReLU, before Linear(512,64)) forward, and BN2
    # (applied right after Linear(512,64)) backward, into a single Linear:
    #   ((relu(h)*s1 + t1) @ w3 + b3) * s2 + t2
    #     == relu(h) @ (s1[:,None] * w3 * s2[None,:]) + ((t1 @ w3 + b3) * s2 + t2)
    w3f = (s1[:, None] * w3) * s2[None, :]
    b3f = (t1 @ w3 + b3) * s2 + t2

    # Zero-pad every matmul dim to a 128 multiple (lane-dense, vreg-aligned).
    stc_p = _round_up(stc, 128)          # 676 -> 768
    emb_p = _round_up(emb, 128)          # 1280 -> 1280
    h2_p = _round_up(h2d, 128)           # 512 -> 512
    h3_p = _round_up(h3d, 128)           # 64  -> 128
    nc_p = _round_up(n_classes, 128)     # 1   -> 128

    w1p = jnp.pad(w1, ((0, stc_p - stc), (0, emb_p - emb)))
    w2p = jnp.pad(w2, ((0, emb_p - emb), (0, h2_p - h2d)))
    w3p = jnp.pad(w3f, ((0, h2_p - h2d), (0, h3_p - h3d)))
    w4p = jnp.pad(w4, ((0, h3_p - h3d), (0, nc_p - n_classes)))
    b1p = jnp.pad(b1, (0, emb_p - emb))
    b2p = jnp.pad(b2, (0, h2_p - h2d))
    b3p = jnp.pad(b3f, (0, h3_p - h3d))
    b4p = jnp.pad(b4, (0, nc_p - n_classes))

    vec = jnp.concatenate([b1p, b2p, b3p, b4p]).astype(jnp.float32).reshape(1, -1)

    return dict(
        # bf16 MXU operands (accumulation stays f32 inside the kernel)
        w1=w1p.astype(jnp.bfloat16),
        w2=w2p.astype(jnp.bfloat16),
        w3=w3p.astype(jnp.bfloat16),
        w4=w4p.astype(jnp.bfloat16),
        vec=vec,
        dims=dict(stc=stc, stc_p=stc_p, emb_p=emb_p, h2_p=h2_p, h3_p=h3_p,
                  n_classes=n_classes, nc_p=nc_p),
    )


def base_stc_cls_forward(input_data, prepped, mode='cls'):
    """Inference forward of BaseStcClsModel.

    input_data: dict with 'stc' [B, stc_size] float and 'label' (or 'mic') [B].
    prepped:    result of prepare_params(params)  (call once, reuse per batch).
    Returns dict(model_outputs=[B] (n_classes=1 squeezed), labels=[B]).
    """
    x = input_data['stc']
    d = prepped['dims']
    B = x.shape[0]

    kind = _device_kind()
    is_v7 = 'v7' in kind
    # bf16 VALU exists on v6e/v7x; keep f32 elementwise on older generations.
    bf16_elementwise = not any(g in kind for g in ('v2', 'v3', 'v4', 'v5'))

    # ---- Batch tiling: minimize zero-row padding, 16-row (bf16 sublane) align,
    # ---- and on v7x keep >=2 grid steps so both TensorCores get work.
    tile_b_max = 256 if is_v7 else 512
    b16 = _round_up(max(B, 1), 16)
    min_steps = 2 if (is_v7 and b16 >= 256) else 1
    n_tiles = max(_cdiv(b16, tile_b_max), min_steps)
    tile_b = _round_up(_cdiv(b16, n_tiles), 16)
    b_pad = n_tiles * tile_b

    xp = jnp.pad(x.astype(jnp.bfloat16),
                 ((0, b_pad - B), (0, d['stc_p'] - d['stc'])))

    vec_total = prepped['vec'].shape[1]
    const_map = lambda i: (0, 0)   # weights/biases resident in VMEM across grid steps

    out = pl.pallas_call(
        _make_mlp_kernel(bf16_elementwise),
        out_shape=jax.ShapeDtypeStruct((b_pad, d['nc_p']), jnp.bfloat16),
        grid=(n_tiles,),
        in_specs=[
            pl.BlockSpec((tile_b, d['stc_p']), lambda i: (i, 0)),     # x tile
            pl.BlockSpec((d['stc_p'], d['emb_p']), const_map),        # w1
            pl.BlockSpec((d['emb_p'], d['h2_p']), const_map),         # w2
            pl.BlockSpec((d['h2_p'], d['h3_p']), const_map),          # w3 (BN1+BN2 folded)
            pl.BlockSpec((d['h3_p'], d['nc_p']), const_map),          # w4 (padded)
            pl.BlockSpec((1, vec_total), const_map),                  # packed biases
        ],
        out_specs=pl.BlockSpec((tile_b, d['nc_p']), lambda i: (i, 0)),
        compiler_params=pltpu.CompilerParams(
            dimension_semantics=("parallel",),
            vmem_limit_bytes=32 << 20,
        ),
    )(xp, prepped['w1'], prepped['w2'], prepped['w3'], prepped['w4'], prepped['vec'])

    n_classes = d['n_classes']
    logits = out[:B, :n_classes].astype(jnp.float32)
    pred = logits[:, 0] if n_classes == 1 else logits   # pred_results.squeeze(dim=-1)
    gt = input_data['label'] if mode == 'cls' else input_data['mic']
    return dict(model_outputs=pred, labels=gt)


def init_params(key, stc_size=676, emb_size=1280, n_classes=1):
    """Deterministic synthetic parameters matching the module's __init__ shapes.

    Linear weights are stored as [in, out] (transpose of PyTorch layout)."""
    ks = jax.random.split(key, 8)

    def lin(k, fan_in, fan_out):
        kw, kb = jax.random.split(k)
        bound = 1.0 / jnp.sqrt(fan_in)
        w = jax.random.uniform(kw, (fan_in, fan_out), jnp.float32, -bound, bound)
        b = jax.random.uniform(kb, (fan_out,), jnp.float32, -bound, bound)
        return w, b

    w1, b1 = lin(ks[0], stc_size, emb_size)
    w2, b2 = lin(ks[1], emb_size, 512)
    w3, b3 = lin(ks[2], 512, 64)
    w4, b4 = lin(ks[3], 64, n_classes)

    params = dict(
        w1=w1, b1=b1, w2=w2, b2=b2, w3=w3, b3=b3, w4=w4, b4=b4,
        # BatchNorm1d(512) eval-mode running stats + affine
        bn1_gamma=1.0 + 0.01 * jax.random.normal(ks[4], (512,), jnp.float32),
        bn1_beta=0.01 * jax.random.normal(ks[5], (512,), jnp.float32),
        bn1_mean=0.05 * jax.random.normal(ks[6], (512,), jnp.float32),
        bn1_var=jnp.abs(1.0 + 0.05 * jax.random.normal(ks[7], (512,), jnp.float32)),
        # BatchNorm1d(64)
        bn2_gamma=jnp.ones((64,), jnp.float32),
        bn2_beta=jnp.zeros((64,), jnp.float32),
        bn2_mean=jnp.zeros((64,), jnp.float32),
        bn2_var=jnp.ones((64,), jnp.float32),
    )
    return params


def _reference_forward(input_data, params):
    """Pure-JAX f32 reference (matches the PyTorch module's eval-mode forward)."""
    x = input_data['stc'].astype(jnp.float32)
    h = jnp.maximum(x @ params['w1'] + params['b1'], 0.0)
    h = jnp.maximum(h @ params['w2'] + params['b2'], 0.0)
    s1, t1 = _fold_bn(params['bn1_gamma'], params['bn1_beta'],
                      params['bn1_mean'], params['bn1_var'])
    h = h * s1 + t1
    h = h @ params['w3'] + params['b3']
    s2, t2 = _fold_bn(params['bn2_gamma'], params['bn2_beta'],
                      params['bn2_mean'], params['bn2_var'])
    h = jnp.maximum(h * s2 + t2, 0.0)
    out = h @ params['w4'] + params['b4']
    return out[:, 0]


if __name__ == "__main__":
    key = jax.random.PRNGKey(0)
    k_param, k_x, k_lbl = jax.random.split(key, 3)

    B, STC = 8, 676          # stc_size matches module default
    params = init_params(k_param, stc_size=STC, emb_size=1280, n_classes=1)

    # One-time weight preprocessing (fold BN, pad, bf16, pack) — cached thereafter.
    prepped = prepare_params(params)
    prepped = jax.block_until_ready(prepped)

    input_data = {
        'stc': jax.random.normal(k_x, (B, STC), jnp.float32),
        'label': jax.random.bernoulli(k_lbl, 0.5, (B,)).astype(jnp.float32),
    }

    results = base_stc_cls_forward(input_data, prepped, mode='cls')
    pred = jax.block_until_ready(results['model_outputs'])

    ref = _reference_forward(input_data, params)
    assert pred.shape == (B,)
    # bf16 matmul operands + bf16 output store (f32 accumulation) vs f32 reference.
    max_err = float(jnp.max(jnp.abs(pred - ref)))
    assert max_err < 5e-2, f"mismatch vs reference (max_err={max_err})"

    print("KERNEL_OK")
</pallas_src>

<mosaic_0001>
module attributes {stable_mosaic.version = 11 : i64} {
  func.func @kernel(%arg0: i32, %arg1: memref<16x768xbf16, #tpu.memory_space<vmem>>, %arg2: memref<768x1280xbf16, #tpu.memory_space<vmem>>, %arg3: memref<1280x512xbf16, #tpu.memory_space<vmem>>, %arg4: memref<512x128xbf16, #tpu.memory_space<vmem>>, %arg5: memref<128x128xbf16, #tpu.memory_space<vmem>>, %arg6: memref<1x2048xf32, #tpu.memory_space<vmem>>, %arg7: memref<16x128xbf16, #tpu.memory_space<vmem>>) attributes {dimension_semantics = [#tpu.dimension_semantics<parallel>], iteration_bounds = array<i64: 1>, scalar_prefetch = 0 : i64, scratch_operands = 0 : i64, tpu.core_type = #tpu.core_type<tc>, window_params = [{transform_indices = @transform_0, window_bounds = array<i64: 16, 768>}, {pipeline_mode = #tpu.pipeline_mode<synchronous>, transform_indices = @transform_1, window_bounds = array<i64: 768, 1280>}, {pipeline_mode = #tpu.pipeline_mode<synchronous>, transform_indices = @transform_2, window_bounds = array<i64: 1280, 512>}, {pipeline_mode = #tpu.pipeline_mode<synchronous>, transform_indices = @transform_3, window_bounds = array<i64: 512, 128>}, {pipeline_mode = #tpu.pipeline_mode<synchronous>, transform_indices = @transform_4, window_bounds = array<i64: 128, 128>}, {pipeline_mode = #tpu.pipeline_mode<synchronous>, transform_indices = @transform_5, window_bounds = array<i64: 1, 2048>}, {transform_indices = @transform_6, window_bounds = array<i64: 16, 128>}]} {
    %c0 = arith.constant 0 : index
    %c0_0 = arith.constant 0 : index
    %0 = vector.load %arg6[%c0, %c0_0] : memref<1x2048xf32, #tpu.memory_space<vmem>>, vector<1x1280xf32>
    %c0_1 = arith.constant 0 : index
    %c1280 = arith.constant 1280 : index
    %1 = vector.load %arg6[%c0_1, %c1280] : memref<1x2048xf32, #tpu.memory_space<vmem>>, vector<1x512xf32>
    %c0_2 = arith.constant 0 : index
    %c1792 = arith.constant 1792 : index
    %2 = vector.load %arg6[%c0_2, %c1792] : memref<1x2048xf32, #tpu.memory_space<vmem>>, vector<1x128xf32>
    %c0_3 = arith.constant 0 : index
    %c1920 = arith.constant 1920 : index
    %3 = vector.load %arg6[%c0_3, %c1920] : memref<1x2048xf32, #tpu.memory_space<vmem>>, vector<1x128xf32>
    %c0_4 = arith.constant 0 : index
    %c0_5 = arith.constant 0 : index
    %4 = vector.load %arg1[%c0_4, %c0_5] : memref<16x768xbf16, #tpu.memory_space<vmem>>, vector<16x768xbf16>
    %c0_6 = arith.constant 0 : index
    %c0_7 = arith.constant 0 : index
    %5 = vector.load %arg2[%c0_6, %c0_7] : memref<768x1280xbf16, #tpu.memory_space<vmem>>, vector<768x1280xbf16>
    %cst = arith.constant dense<0.000000e+00> : vector<16x1280xf32>
    %6 = tpu.matmul %4, %5, %cst {dimension_numbers = #tpu.dot_dimension_numbers<[1], [0], [0], [1], [0, 0, 1, 1], [], []>} : vector<16x768xbf16>, vector<768x1280xbf16>, vector<16x1280xf32> -> vector<16x1280xf32>
    %7 = vector.broadcast %0 : vector<1x1280xf32> to vector<16x1280xf32>
    %8 = arith.addf %6, %7 : vector<16x1280xf32>
    %9 = arith.truncf %8 : vector<16x1280xf32> to vector<16x1280xbf16>
    %cst_8 = arith.constant 0.000000e+00 : bf16
    %10 = vector.broadcast %cst_8 : bf16 to vector<16x1280xbf16>
    %11 = arith.maximumf %9, %10 : vector<16x1280xbf16>
    %c0_9 = arith.constant 0 : index
    %c0_10 = arith.constant 0 : index
    %12 = vector.load %arg3[%c0_9, %c0_10] : memref<1280x512xbf16, #tpu.memory_space<vmem>>, vector<1280x512xbf16>
    %cst_11 = arith.constant dense<0.000000e+00> : vector<16x512xf32>
    %13 = tpu.matmul %11, %12, %cst_11 {dimension_numbers = #tpu.dot_dimension_numbers<[1], [0], [0], [1], [0, 0, 1, 1], [], []>} : vector<16x1280xbf16>, vector<1280x512xbf16>, vector<16x512xf32> -> vector<16x512xf32>
    %14 = vector.broadcast %1 : vector<1x512xf32> to vector<16x512xf32>
    %15 = arith.addf %13, %14 : vector<16x512xf32>
    %16 = arith.truncf %15 : vector<16x512xf32> to vector<16x512xbf16>
    %cst_12 = arith.constant 0.000000e+00 : bf16
    %17 = vector.broadcast %cst_12 : bf16 to vector<16x512xbf16>
    %18 = arith.maximumf %16, %17 : vector<16x512xbf16>
    %c0_13 = arith.constant 0 : index
    %c0_14 = arith.constant 0 : index
    %19 = vector.load %arg4[%c0_13, %c0_14] : memref<512x128xbf16, #tpu.memory_space<vmem>>, vector<512x128xbf16>
    %cst_15 = arith.constant dense<0.000000e+00> : vector<16x128xf32>
    %20 = tpu.matmul %18, %19, %cst_15 {dimension_numbers = #tpu.dot_dimension_numbers<[1], [0], [0], [1], [0, 0, 1, 1], [], []>} : vector<16x512xbf16>, vector<512x128xbf16>, vector<16x128xf32> -> vector<16x128xf32>
    %21 = vector.broadcast %2 : vector<1x128xf32> to vector<16x128xf32>
    %22 = arith.addf %20, %21 : vector<16x128xf32>
    %23 = arith.truncf %22 : vector<16x128xf32> to vector<16x128xbf16>
    %cst_16 = arith.constant 0.000000e+00 : bf16
    %24 = vector.broadcast %cst_16 : bf16 to vector<16x128xbf16>
    %25 = arith.maximumf %23, %24 : vector<16x128xbf16>
    %c0_17 = arith.constant 0 : index
    %c0_18 = arith.constant 0 : index
    %26 = vector.load %arg5[%c0_17, %c0_18] : memref<128x128xbf16, #tpu.memory_space<vmem>>, vector<128x128xbf16>
    %cst_19 = arith.constant dense<0.000000e+00> : vector<16x128xf32>
    %27 = tpu.matmul %25, %26, %cst_19 {dimension_numbers = #tpu.dot_dimension_numbers<[1], [0], [0], [1], [0, 0, 1, 1], [], []>} : vector<16x128xbf16>, vector<128x128xbf16>, vector<16x128xf32> -> vector<16x128xf32>
    %28 = vector.broadcast %3 : vector<1x128xf32> to vector<16x128xf32>
    %29 = arith.addf %27, %28 : vector<16x128xf32>
    %30 = arith.truncf %29 : vector<16x128xf32> to vector<16x128xbf16>
    %c0_20 = arith.constant 0 : index
    %c0_21 = arith.constant 0 : index
    %31 = vector.load %arg7[%c0_20, %c0_21] : memref<16x128xbf16, #tpu.memory_space<vmem>>, vector<16x128xbf16>
    tpu.vector_store %arg7[%c0_20, %c0_21], %30 {strides = array<i32>} : memref<16x128xbf16, #tpu.memory_space<vmem>>, vector<16x128xbf16>,
    return
  }
  func.func @transform_0(%arg0: i32) -> (i32, i32) {
    %c0_i32 = arith.constant 0 : i32
    %c0_i32_0 = arith.constant 0 : i32
    return %arg0, %c0_i32 : i32, i32
  }
  func.func @transform_1(%arg0: i32) -> (i32, i32) {
    %c0_i32 = arith.constant 0 : i32
    %c0_i32_0 = arith.constant 0 : i32
    %c0_i32_1 = arith.constant 0 : i32
    return %c0_i32, %c0_i32_0 : i32, i32
  }
  func.func @transform_2(%arg0: i32) -> (i32, i32) {
    %c0_i32 = arith.constant 0 : i32
    %c0_i32_0 = arith.constant 0 : i32
    %c0_i32_1 = arith.constant 0 : i32
    return %c0_i32, %c0_i32_0 : i32, i32
  }
  func.func @transform_3(%arg0: i32) -> (i32, i32) {
    %c0_i32 = arith.constant 0 : i32
    %c0_i32_0 = arith.constant 0 : i32
    %c0_i32_1 = arith.constant 0 : i32
    return %c0_i32, %c0_i32_0 : i32, i32
  }
  func.func @transform_4(%arg0: i32) -> (i32, i32) {
    %c0_i32 = arith.constant 0 : i32
    %c0_i32_0 = arith.constant 0 : i32
    %c0_i32_1 = arith.constant 0 : i32
    return %c0_i32, %c0_i32_0 : i32, i32
  }
  func.func @transform_5(%arg0: i32) -> (i32, i32) {
    %c0_i32 = arith.constant 0 : i32
    %c0_i32_0 = arith.constant 0 : i32
    %c0_i32_1 = arith.constant 0 : i32
    return %c0_i32, %c0_i32_0 : i32, i32
  }
  func.func @transform_6(%arg0: i32) -> (i32, i32) {
    %c0_i32 = arith.constant 0 : i32
    %c0_i32_0 = arith.constant 0 : i32
    return %arg0, %c0_i32 : i32, i32
  }
}

</mosaic_0001>

<bundles_post_ra>
// kernel: tpu_custom_call.1
= control target key start
LH: loop header
LB: loop body
LE: loop exit
PB: predicated region body
PF: predicated region fallthrough
CT: control target
= control target key end

     0   :  { %11 = vsyncpa [#allocation3], 0  ;;  %s9452_s0 = inlined_call_operand.hbm [shape: bf16[16,768], index: 0, kind: input, shape index: {}]   ;;  %s9453_s1 = inlined_call_operand.hbm [shape: bf16[768,1280], index: 1, kind: input, shape index: {}]   ;;  %s9454_s2 = inlined_call_operand.hbm [shape: bf16[1280,512], index: 2, kind: input, shape index: {}]   ;;  %s9455_s3 = inlined_call_operand.hbm [shape: bf16[512,128], index: 3, kind: input, shape index: {}]   ;;  %s9456_s4 = inlined_call_operand.hbm [shape: bf16[128,128], index: 4, kind: input, shape index: {}]   ;;  %s9457_s5 = inlined_call_operand.hbm [shape: f32[1,2048], index: 5, kind: input, shape index: {}]   ;;  %s9458_s6 = inlined_call_operand.hbm [shape: bf16[16,128], index: 6, kind: output, shape index: {}]  }
   0x1   :  { %12 = vsyncpa [#allocation6], 0 }
   0x2   :  { %13 = vsyncpa [#allocation9], 0 }
   0x3   :  { %14 = vsyncpa [#allocation12], 0 }
   0x4   :  { %15 = vsyncpa [#allocation4], 0  ;;  %s9082_s21 = smov [#allocation5]   ;;  %s8918_s25 = scalar_lea.hbm %s9453_s1, 61440 }
   0x5   :  { %s33_s22 = sshll.u32 %s9082_s21, 4  ;;  %p8919_p0 = scmp.ne.s32.totalorder %s9453_s1, %s8918_s25  ;;  %s34_s22 = int_to_ptr.vmem [resolvable:$true] %s33_s22 }
   0x6   :  { %p8922_p1 = scmp.lt.u32.totalorder %s8918_s25, %s9453_s1 }
   0x8   :  { %p8924_p2 = pnand %p8922_p1, %p8919_p0 }
   0xa   :  { %8927 = shalt.err (!%p8924_p2)
}
   0xb   :  { %s8928_s30 = scalar_lea.vmem %s34_s22, 61440  ;;  %p8933_p4 = scmp.lt.s32.totalorder %s34_s22, %s34_s22 }
   0xc   :  { %p8929_p3 = scmp.ne.s32.totalorder %s34_s22, %s8928_s30  ;;  %p8934_p5 = scmp.lt.s32.totalorder %s8928_s30, %s8928_s30 }
   0xe   :  { %p8935_p6 = por %p8934_p5, %p8933_p4 }
  0x10   :  { %p8936_p7 = pnand %p8935_p6, %p8929_p3 }
  0x12   :  { %8939 = shalt.err (!%p8936_p7)
}
  0x13   :  { %s9083_s7 = smov 640   ;;  %s9084_s8 = smov 40  }
  0x14   :  { %39 = dma.hbm_to_vmem [thread:$0]  %s9453_s1, 61440, %s34_s22, [#allocation6], %s9083_s7, %s9083_s7, %s9084_s8  }
  0x15   :  { %s9085_s11 = smov [#allocation8]   ;;  %s8940_s15 = scalar_lea.hbm %s9455_s3, 4096 }
  0x16   :  { %s57_s12 = sshll.u32 %s9085_s11, 4  ;;  %p8941_p8 = scmp.ne.s32.totalorder %s9455_s3, %s8940_s15  ;;  %s58_s12 = int_to_ptr.vmem [resolvable:$true] %s57_s12 }
  0x17   :  { %p8944_p9 = scmp.lt.u32.totalorder %s8940_s15, %s9455_s3 }
  0x19   :  { %p8946_p10 = pnand %p8944_p9, %p8941_p8 }
  0x1b   :  { %8949 = shalt.err (!%p8946_p10)
}
  0x1c   :  { %s8950_s20 = scalar_lea.vmem %s58_s12, 4096  ;;  %p8955_p12 = scmp.lt.s32.totalorder %s58_s12, %s58_s12 }
  0x1d   :  { %p8951_p11 = scmp.ne.s32.totalorder %s58_s12, %s8950_s20  ;;  %p8956_p13 = scmp.lt.s32.totalorder %s8950_s20, %s8950_s20 }
  0x1f   :  { %p8957_p0 = por %p8956_p13, %p8955_p12 }
  0x21   :  { %p8958_p1 = pnand %p8957_p0, %p8951_p11 }
  0x23   :  { %8961 = shalt.err (!%p8958_p1)
}
  0x24   :  { %s9086_s1 = smov 64   ;;  %s9087_s21 = smov 4  }
  0x25   :  { %63 = dma.hbm_to_vmem [thread:$0]  %s9455_s3, 4096, %s58_s12, [#allocation9], %s9086_s1, %s9086_s1, %s9087_s21  }
  0x26   :  { %s9088_s24 = smov [#allocation2]   ;;  %s8962_s28 = scalar_lea.hbm %s9452_s0, 768 }
  0x27   :  { %s21_s25 = sshll.u32 %s9088_s24, 4  ;;  %p8963_p2 = scmp.ne.s32.totalorder %s9452_s0, %s8962_s28  ;;  %s22_s25 = int_to_ptr.vmem [resolvable:$true] %s21_s25 }
  0x28   :  { %p8966_p3 = scmp.lt.u32.totalorder %s8962_s28, %s9452_s0 }
  0x2a   :  { %p8968_p4 = pnand %p8966_p3, %p8963_p2 }
  0x2c   :  { %8971 = shalt.err (!%p8968_p4)
}
  0x2d   :  { %s8972_s9 = scalar_lea.vmem %s22_s25, 768  ;;  %p8977_p6 = scmp.lt.s32.totalorder %s22_s25, %s22_s25 }
  0x2e   :  { %p8973_p5 = scmp.ne.s32.totalorder %s22_s25, %s8972_s9  ;;  %p8978_p7 = scmp.lt.s32.totalorder %s8972_s9, %s8972_s9 }
  0x30   :  { %p8979_p8 = por %p8978_p7, %p8977_p6 }
  0x32   :  { %p8980_p9 = pnand %p8979_p8, %p8973_p5 }
  0x34   :  { %8983 = shalt.err (!%p8980_p9)
}
  0x35   :  { %s9089_s3 = smov 384   ;;  %s9090_s10 = smov 24  }
  0x36   :  { %27 = dma.hbm_to_vmem [thread:$0]  %s9452_s0, 768, %s22_s25, [#allocation3], %s9089_s3, %s9089_s3, %s9090_s10  }
  0x37   :  { %s9091_s13 = smov [#allocation7]   ;;  %s8984_s17 = scalar_lea.hbm %s9454_s2, 40960 }
  0x38   :  { %s45_s14 = sshll.u32 %s9091_s13, 4  ;;  %p8985_p10 = scmp.ne.s32.totalorder %s9454_s2, %s8984_s17  ;;  %s46_s14 = int_to_ptr.vmem [resolvable:$true] %s45_s14 }
  0x39   :  { %p8988_p11 = scmp.lt.u32.totalorder %s8984_s17, %s9454_s2 }
  0x3b   :  { %p8990_p12 = pnand %p8988_p11, %p8985_p10 }
  0x3d   :  { %8993 = shalt.err (!%p8990_p12)
}
  0x3e   :  { %s8994_s23 = scalar_lea.vmem %s46_s14, 40960  ;;  %p8999_p0 = scmp.lt.s32.totalorder %s46_s14, %s46_s14 }
  0x3f   :  { %p8995_p13 = scmp.ne.s32.totalorder %s46_s14, %s8994_s23  ;;  %p9000_p1 = scmp.lt.s32.totalorder %s8994_s23, %s8994_s23 }
  0x41   :  { %p9001_p2 = por %p9000_p1, %p8999_p0 }
  0x43   :  { %p9002_p3 = pnand %p9001_p2, %p8995_p13 }
  0x45   :  { %9005 = shalt.err (!%p9002_p3)
}
  0x46   :  { %s9092_s0 = smov 256   ;;  %s9093_s24 = smov 16  }
  0x47   :  { %51 = dma.hbm_to_vmem [thread:$0]  %s9454_s2, 40960, %s46_s14, [#allocation6], %s9092_s0, %s9092_s0, %s9093_s24  }
  0x48   :  { %s9094_s27 = smov [#allocation10]   ;;  %s9095_s29 = smov [#allocation11]  }
  0x49   :  { %s69_s28 = sshll.u32 %s9094_s27, 4  ;;  %s82_s30 = sshll.u32 %s9095_s29, 4  ;;  %s70_s28 = int_to_ptr.vmem [resolvable:$true] %s69_s28  ;;  %s83_s30 = int_to_ptr.vmem [resolvable:$true] %s82_s30 }
  0x4a   :  { %s9006_s9 = scalar_lea.hbm %s9456_s4, 1024 }
  0x4b   :  { %p9007_p4 = scmp.ne.s32.totalorder %s9456_s4, %s9006_s9  ;;  %p9010_p5 = scmp.lt.u32.totalorder %s9006_s9, %s9456_s4 }
  0x4d   :  { %p9012_p6 = pnand %p9010_p5, %p9007_p4 }
  0x4f   :  { %9015 = shalt.err (!%p9012_p6)
}
  0x50   :  { %s9016_s2 = scalar_lea.vmem %s70_s28, 1024  ;;  %p9021_p8 = scmp.lt.s32.totalorder %s70_s28, %s70_s28 }
  0x51   :  { %p9017_p7 = scmp.ne.s32.totalorder %s70_s28, %s9016_s2  ;;  %p9022_p9 = scmp.lt.s32.totalorder %s9016_s2, %s9016_s2 }
  0x53   :  { %p9023_p10 = por %p9022_p9, %p9021_p8 }
  0x55   :  { %p9024_p11 = pnand %p9023_p10, %p9017_p7 }
  0x57   :  { %9027 = shalt.err (!%p9024_p11)
}
  0x58   :  { %75 = dma.hbm_to_vmem [thread:$0]  %s9456_s4, 1024, %s70_s28, [#allocation9], %s9086_s1, %s9086_s1, %s9087_s21  }
  0x59   :  { %s9028_s17 = scalar_lea.hbm %s9457_s5, 256 }
  0x5a   :  { %p9029_p12 = scmp.ne.s32.totalorder %s9457_s5, %s9028_s17  ;;  %p9032_p13 = scmp.lt.u32.totalorder %s9028_s17, %s9457_s5 }
  0x5c   :  { %p9034_p0 = pnand %p9032_p13, %p9029_p12 }
  0x5e   :  { %9037 = shalt.err (!%p9034_p0)
}
  0x5f   :  { %s9038_s23 = scalar_lea.vmem %s83_s30, 256  ;;  %p9043_p2 = scmp.lt.s32.totalorder %s83_s30, %s83_s30 }
  0x60   :  { %p9039_p1 = scmp.ne.s32.totalorder %s83_s30, %s9038_s23  ;;  %p9044_p3 = scmp.lt.s32.totalorder %s9038_s23, %s9038_s23 }
  0x62   :  { %p9045_p4 = por %p9044_p3, %p9043_p2 }
  0x64   :  { %p9046_p5 = pnand %p9045_p4, %p9039_p1 }
  0x66   :  { %9049 = shalt.err (!%p9046_p5)
}
  0x67   :  { %85 = dma.hbm_to_vmem [thread:$0]  %s9457_s5, 256, %s83_s30, [#allocation12]  }
  0x68   :  { %9072 = dma.done.wait [#allocation3], 768  }
  0x69   :  { %9073 = vsyncadd [#allocation3], 4294966528 }
  0x6a   :  { %9074 = dma.done.wait [#allocation6], 102400  }
  0x6b   :  { %9075 = vsyncadd [#allocation6], 4294864896 }
  0x6c   :  { %9076 = dma.done.wait [#allocation9], 5120  }
  0x6d   :  { %9077 = vsyncadd [#allocation9], 4294962176 }
  0x6e   :  { %9078 = dma.done.wait [#allocation12], 256  }
  0x6f   :  { %9079 = vsyncadd [#allocation12], 4294967040  ;;  %v7657_v0 = vld [vmem:[#allocation5 + $0x4] ss:$40 sps:$4 sm:$0xff]   ;;  %v7661_v2 = vld [vmem:[#allocation5] ss:$40 sps:$4 sm:$0xff]  }
  0x70   :  { %v7659_v1 = vld [vmem:[#allocation5 + $0x504] ss:$40 sps:$4 sm:$0xff]   ;;  %3078 = vmatprep.subr.bf16.mxu1 %v7657_v0  ;;  %v7662_v3 = vld [vmem:[#allocation5 + $0x500] ss:$40 sps:$4 sm:$0xff]   ;;  %v7663_v4 = vld [vmem:[#allocation5 + $0x54] ss:$40 sps:$4 sm:$0xff]  }
  0x71   :  { %3121 = vmatprep.subr.bf16.mxu0 %v7659_v1  ;;  %3079 = vmatpush1.bf16.msra.mxu1 %v7661_v2  ;;  %v7665_v5 = vld [vmem:[#allocation5 + $0x554] ss:$40 sps:$4 sm:$0xff]   ;;  %v7667_v6 = vld [vmem:[#allocation5 + $0x50] ss:$40 sps:$4 sm:$0xff]   ;;  %v7669_v8 = vld [vmem:[#allocation5 + $0xa4] ss:$40 sps:$4 sm:$0xff]  }
  0x72   :  { %3122 = vmatpush1.bf16.msra.mxu0 %v7662_v3  ;;  %3080 = vmatprep.subr.bf16.mxu1 %v7663_v4  ;;  %v7668_v7 = vld [vmem:[#allocation5 + $0x550] ss:$40 sps:$4 sm:$0xff]   ;;  %v7671_v9 = vld [vmem:[#allocation5 + $0x5a4] ss:$40 sps:$4 sm:$0xff]   ;;  %v7673_v10 = vld [vmem:[#allocation5 + $0xa0] ss:$40 sps:$4 sm:$0xff]  }
  0x73   :  { %3123 = vmatprep.subr.bf16.mxu0 %v7665_v5  ;;  %v7674_v11 = vld [vmem:[#allocation5 + $0x5a0] ss:$40 sps:$4 sm:$0xff]   ;;  %v7675_v12 = vld [vmem:[#allocation5 + $0xf4] ss:$40 sps:$4 sm:$0xff]   ;;  %v7679_v14 = vld [vmem:[#allocation5 + $0xf0] ss:$40 sps:$4 sm:$0xff]  }
  0x74   :  { %v7677_v13 = vld [vmem:[#allocation5 + $0x5f4] ss:$40 sps:$4 sm:$0xff]   ;;  %v7680_v15 = vld [vmem:[#allocation5 + $0x5f0] ss:$40 sps:$4 sm:$0xff]   ;;  %v7681_v16 = vld [vmem:[#allocation5 + $0x144] ss:$40 sps:$4 sm:$0xff]  }
  0x75   :  { %3081 = vmatpush1.bf16.msra.mxu1 %v7667_v6  ;;  %v7683_v17 = vld [vmem:[#allocation5 + $0x644] ss:$40 sps:$4 sm:$0xff]   ;;  %v7685_v18 = vld [vmem:[#allocation5 + $0x140] ss:$40 sps:$4 sm:$0xff]   ;;  %v7687_v20 = vld [vmem:[#allocation5 + $0x194] ss:$40 sps:$4 sm:$0xff]  }
  0x76   :  { %3124 = vmatpush1.bf16.msra.mxu0 %v7668_v7  ;;  %3082 = vmatprep.subr.bf16.mxu1 %v7669_v8  ;;  %v7686_v19 = vld [vmem:[#allocation5 + $0x640] ss:$40 sps:$4 sm:$0xff]   ;;  %v7689_v21 = vld [vmem:[#allocation5 + $0x694] ss:$40 sps:$4 sm:$0xff]   ;;  %v7691_v22 = vld [vmem:[#allocation5 + $0x190] ss:$40 sps:$4 sm:$0xff]  }
  0x77   :  { %3125 = vmatprep.subr.bf16.mxu0 %v7671_v9  ;;  %v7692_v23 = vld [vmem:[#allocation5 + $0x690] ss:$40 sps:$4 sm:$0xff]   ;;  %v7693_v24 = vld [vmem:[#allocation5 + $0x1e4] ss:$40 sps:$4 sm:$0xff]   ;;  %v7697_v26 = vld [vmem:[#allocation5 + $0x1e0] ss:$40 sps:$4 sm:$0xff]  }
  0x78   :  { %v7695_v25 = vld [vmem:[#allocation5 + $0x6e4] ss:$40 sps:$4 sm:$0xff]   ;;  %v7698_v27 = vld [vmem:[#allocation5 + $0x6e0] ss:$40 sps:$4 sm:$0xff]   ;;  %v7699_v28 = vld [vmem:[#allocation5 + $0x234] ss:$40 sps:$4 sm:$0xff]  }
  0x79   :  { %3083 = vmatpush1.bf16.msra.mxu1 %v7673_v10  ;;  %v7701_v29 = vld [vmem:[#allocation5 + $0x734] ss:$40 sps:$4 sm:$0xff]   ;;  %v7703_v30 = vld [vmem:[#allocation5 + $0x230] ss:$40 sps:$4 sm:$0xff]   ;;  %v7705_v32 = vld [vmem:[#allocation5 + $0x284] ss:$40 sps:$4 sm:$0xff]  }
  0x7a   :  { %3126 = vmatpush1.bf16.msra.mxu0 %v7674_v11  ;;  %3084 = vmatprep.subr.bf16.mxu1 %v7675_v12  ;;  %v7704_v31 = vld [vmem:[#allocation5 + $0x730] ss:$40 sps:$4 sm:$0xff]   ;;  %v7707_v33 = vld [vmem:[#allocation5 + $0x784] ss:$40 sps:$4 sm:$0xff]   ;;  %v7709_v34 = vld [vmem:[#allocation5 + $0x280] ss:$40 sps:$4 sm:$0xff]  }
  0x7b   :  { %3127 = vmatprep.subr.bf16.mxu0 %v7677_v13  ;;  %v7710_v35 = vld [vmem:[#allocation5 + $0x780] ss:$40 sps:$4 sm:$0xff]   ;;  %v7711_v36 = vld [vmem:[#allocation5 + $0x2d4] ss:$40 sps:$4 sm:$0xff]   ;;  %v7715_v38 = vld [vmem:[#allocation5 + $0x2d0] ss:$40 sps:$4 sm:$0xff]  }
  0x7c   :  { %v7713_v37 = vld [vmem:[#allocation5 + $0x7d4] ss:$40 sps:$4 sm:$0xff]   ;;  %v7716_v39 = vld [vmem:[#allocation5 + $0x7d0] ss:$40 sps:$4 sm:$0xff]   ;;  %v7717_v40 = vld [vmem:[#allocation5 + $0x324] ss:$40 sps:$4 sm:$0xff]  }
  0x7d   :  { %3085 = vmatpush1.bf16.msra.mxu1 %v7679_v14  ;;  %v7719_v41 = vld [vmem:[#allocation5 + $0x824] ss:$40 sps:$4 sm:$0xff]   ;;  %v7721_v42 = vld [vmem:[#allocation5 + $0x320] ss:$40 sps:$4 sm:$0xff]   ;;  %v7723_v44 = vld [vmem:[#allocation5 + $0x374] ss:$40 sps:$4 sm:$0xff]  }
  0x7e   :  { %3128 = vmatpush1.bf16.msra.mxu0 %v7680_v15  ;;  %3086 = vmatprep.subr.bf16.mxu1 %v7681_v16  ;;  %v7722_v43 = vld [vmem:[#allocation5 + $0x820] ss:$40 sps:$4 sm:$0xff]   ;;  %v7725_v45 = vld [vmem:[#allocation5 + $0x874] ss:$40 sps:$4 sm:$0xff]   ;;  %v7727_v46 = vld [vmem:[#allocation5 + $0x370] ss:$40 sps:$4 sm:$0xff]  }
  0x7f   :  { %3129 = vmatprep.subr.bf16.mxu0 %v7683_v17  ;;  %v7728_v47 = vld [vmem:[#allocation5 + $0x870] ss:$40 sps:$4 sm:$0xff]   ;;  %v9213_v48 = vld [vmem:[#allocation2 + $0x4] ss:$24 sps:$4 sm:$0xff]   ;;  %v7733_v52 = vld [vmem:[#allocation5 + $0x3c0] ss:$40 sps:$4 sm:$0xff]  }
  0x80   :  { %v9215_v49 = vld [vmem:[#allocation2 + $0xc] ss:$24 sps:$4 sm:$0xff]   ;;  %v7729_v50 = vld [vmem:[#allocation5 + $0x3c4] ss:$40 sps:$4 sm:$0xff]   ;;  %3110 = vmatprep.mubr.bf16.mxu1 %v9213_v48  ;;  %v7734_v53 = vld [vmem:[#allocation5 + $0x8c0] ss:$40 sps:$4 sm:$0xff]  }
  0x81   :  { %3087 = vmatpush1.bf16.msra.mxu1 %v7685_v18  ;;  %v7731_v51 = vld [vmem:[#allocation5 + $0x8c4] ss:$40 sps:$4 sm:$0xff]   ;;  %3153 = vmatprep.mubr.bf16.mxu0 %v9215_v49  ;;  %v7735_v54 = vld [vmem:[#allocation5 + $0x414] ss:$40 sps:$4 sm:$0xff]   ;;  %v7739_v56 = vld [vmem:[#allocation5 + $0x410] ss:$40 sps:$4 sm:$0xff]  }
  0x82   :  { %3130 = vmatpush1.bf16.msra.mxu0 %v7686_v19  ;;  %3088 = vmatprep.subr.bf16.mxu1 %v7687_v20  ;;  %v7737_v55 = vld [vmem:[#allocation5 + $0x914] ss:$40 sps:$4 sm:$0xff]   ;;  %v7740_v57 = vld [vmem:[#allocation5 + $0x910] ss:$40 sps:$4 sm:$0xff]   ;;  %v7741_v58 = vld [vmem:[#allocation5 + $0x464] ss:$40 sps:$4 sm:$0xff]  }
  0x83   :  { %3131 = vmatprep.subr.bf16.mxu0 %v7689_v21  ;;  %v7743_v59 = vld [vmem:[#allocation5 + $0x964] ss:$40 sps:$4 sm:$0xff]   ;;  %v7745_v60 = vld [vmem:[#allocation5 + $0x460] ss:$40 sps:$4 sm:$0xff]   ;;  %v7747_v62 = vld [vmem:[#allocation5 + $0x4b4] ss:$40 sps:$4 sm:$0xff]  }
  0x84   :  { %v7746_v61 = vld [vmem:[#allocation5 + $0x960] ss:$40 sps:$4 sm:$0xff]   ;;  %v7749_v63 = vld [vmem:[#allocation5 + $0x9b4] ss:$40 sps:$4 sm:$0xff]   ;;  %v7751_v0 = vld [vmem:[#allocation5 + $0x4b0] ss:$40 sps:$4 sm:$0xff]  }
  0x85   :  { %3089 = vmatpush1.bf16.msra.mxu1 %v7691_v22  ;;  %v7752_v1 = vld [vmem:[#allocation5 + $0x9b0] ss:$40 sps:$4 sm:$0xff]   ;;  %v7759_v2 = vld [vmem:[#allocation5 + $0xa04] ss:$40 sps:$4 sm:$0xff]   ;;  %v7757_v4 = vld [vmem:[#allocation5 + $0xa00] ss:$40 sps:$4 sm:$0xff]  }
  0x86   :  { %3132 = vmatpush1.bf16.msra.mxu0 %v7692_v23  ;;  %3090 = vmatprep.subr.bf16.mxu1 %v7693_v24  ;;  %v7762_v3 = vld [vmem:[#allocation5 + $0xc] ss:$40 sps:$4 sm:$0xff]   ;;  %v7760_v5 = vld [vmem:[#allocation5 + $0x8] ss:$40 sps:$4 sm:$0xff]   ;;  %v7770_v9 = vld [vmem:[#allocation5 + $0x5c] ss:$40 sps:$4 sm:$0xff]  }
  0x87   :  { %3133 = vmatprep.subr.bf16.mxu0 %v7695_v25  ;;  %v9219_v6 = vld [vmem:[#allocation2] ss:$24 sps:$4 sm:$0xff]   ;;  %v7767_v8 = vld [vmem:[#allocation5 + $0xa54] ss:$40 sps:$4 sm:$0xff]   ;;  %v7768_v11 = vld [vmem:[#allocation5 + $0x58] ss:$40 sps:$4 sm:$0xff]  }
  0x88   :  { %v9221_v7 = vld [vmem:[#allocation2 + $0x8] ss:$24 sps:$4 sm:$0xff]   ;;  %v7773_v12 = vld [vmem:[#allocation5 + $0xaa4] ss:$40 sps:$4 sm:$0xff]   ;;  %v7771_v14 = vld [vmem:[#allocation5 + $0xaa0] ss:$40 sps:$4 sm:$0xff]  }
  0x89   :  { %3091 = vmatpush1.bf16.msra.mxu1 %v7697_v26  ;;  %v7765_v10 = vld [vmem:[#allocation5 + $0xa50] ss:$40 sps:$4 sm:$0xff]   ;;  %v7776_v13 = vld [vmem:[#allocation5 + $0xac] ss:$40 sps:$4 sm:$0xff]   ;;  %v7782_v17 = vld [vmem:[#allocation5 + $0xfc] ss:$40 sps:$4 sm:$0xff]  }
  0x8a   :  { %3134 = vmatpush1.bf16.msra.mxu0 %v7698_v27  ;;  %3092 = vmatprep.subr.bf16.mxu1 %v7699_v28  ;;  %v7774_v15 = vld [vmem:[#allocation5 + $0xa8] ss:$40 sps:$4 sm:$0xff]   ;;  %v7779_v16 = vld [vmem:[#allocation5 + $0xaf4] ss:$40 sps:$4 sm:$0xff]   ;;  %v7780_v19 = vld [vmem:[#allocation5 + $0xf8] ss:$40 sps:$4 sm:$0xff]  }
  0x8b   :  { %3135 = vmatprep.subr.bf16.mxu0 %v7701_v29  ;;  %v7777_v18 = vld [vmem:[#allocation5 + $0xaf0] ss:$40 sps:$4 sm:$0xff]   ;;  %v7785_v20 = vld [vmem:[#allocation5 + $0xb44] ss:$40 sps:$4 sm:$0xff]   ;;  %v7783_v22 = vld [vmem:[#allocation5 + $0xb40] ss:$40 sps:$4 sm:$0xff]  }
  0x8c   :  { %v7788_v21 = vld [vmem:[#allocation5 + $0x14c] ss:$40 sps:$4 sm:$0xff]   ;;  %v7786_v23 = vld [vmem:[#allocation5 + $0x148] ss:$40 sps:$4 sm:$0xff]   ;;  %v7794_v25 = vld [vmem:[#allocation5 + $0x19c] ss:$40 sps:$4 sm:$0xff]  }
  0x8d   :  { %3093 = vmatpush1.bf16.msra.mxu1 %v7703_v30  ;;  %v7791_v24 = vld [vmem:[#allocation5 + $0xb94] ss:$40 sps:$4 sm:$0xff]   ;;  %v7789_v26 = vld [vmem:[#allocation5 + $0xb90] ss:$40 sps:$4 sm:$0xff]   ;;  %v7797_v28 = vld [vmem:[#allocation5 + $0xbe4] ss:$40 sps:$4 sm:$0xff]  }
  0x8e   :  { %3136 = vmatpush1.bf16.msra.mxu0 %v7704_v31  ;;  %3094 = vmatprep.subr.bf16.mxu1 %v7705_v32  ;;  %v7792_v27 = vld [vmem:[#allocation5 + $0x198] ss:$40 sps:$4 sm:$0xff]   ;;  %v7800_v29 = vld [vmem:[#allocation5 + $0x1ec] ss:$40 sps:$4 sm:$0xff]   ;;  %v7798_v31 = vld [vmem:[#allocation5 + $0x1e8] ss:$40 sps:$4 sm:$0xff]  }
  0x8f   :  { %3137 = vmatprep.subr.bf16.mxu0 %v7707_v33  ;;  %v7795_v30 = vld [vmem:[#allocation5 + $0xbe0] ss:$40 sps:$4 sm:$0xff]   ;;  %v7803_v32 = vld [vmem:[#allocation5 + $0xc34] ss:$40 sps:$4 sm:$0xff]   ;;  %vm9098_vm0 = vmmov 0   ;;  %s9099_s5 = smov [#allocation13]  }
  0x90   :  { %v9226_v33 = vld [vmem:[#allocation2 + $0x14] ss:$24 sps:$4 sm:$0xff]   ;;  %s6594_s24 = sshll.u32 %s9099_s5, 4  ;;  %s6595_s24 = int_to_ptr.vmem [resolvable:$true] %s6594_s24 }
  0x91   :  { %3095 = vmatpush1.bf16.msra.mxu1 %v7709_v34  ;;  %v7806_v34 = vld [vmem:[#allocation5 + $0x23c] ss:$40 sps:$4 sm:$0xff]   ;;  %s9050_s25 = scalar_lea.vmem %s6595_s24, 128  ;;  %p9055_p7 = scmp.lt.s32.totalorder %s6595_s24, %s6595_s24 }
  0x92   :  { %3138 = vmatpush1.bf16.msra.mxu0 %v7710_v35  ;;  %3096 = vmatprep.subr.bf16.mxu1 %v7711_v36  ;;  %v7801_v35 = vld [vmem:[#allocation5 + $0xc30] ss:$40 sps:$4 sm:$0xff]   ;;  %p9051_p6 = scmp.ne.s32.totalorder %s6595_s24, %s9050_s25  ;;  %p9056_p8 = scmp.lt.s32.totalorder %s9050_s25, %s9050_s25 }
  0x93   :  { %3139 = vmatprep.subr.bf16.mxu0 %v7713_v37  ;;  %v7804_v36 = vld [vmem:[#allocation5 + $0x238] ss:$40 sps:$4 sm:$0xff]   ;;  %v7809_v37 = vld [vmem:[#allocation5 + $0xc84] ss:$40 sps:$4 sm:$0xff]  }
  0x94   :  { %p9057_p9 = por %p9056_p8, %p9055_p7 }
  0x95   :  { %3097 = vmatpush1.bf16.msra.mxu1 %v7715_v38  ;;  %v7812_v38 = vld [vmem:[#allocation5 + $0x28c] ss:$40 sps:$4 sm:$0xff]  }
  0x96   :  { %3140 = vmatpush1.bf16.msra.mxu0 %v7716_v39  ;;  %3098 = vmatprep.subr.bf16.mxu1 %v7717_v40  ;;  %v7807_v39 = vld [vmem:[#allocation5 + $0xc80] ss:$40 sps:$4 sm:$0xff]   ;;  %p9058_p10 = pnand %p9057_p9, %p9051_p6 }
  0x97   :  { %3141 = vmatprep.subr.bf16.mxu0 %v7719_v41  ;;  %v7810_v40 = vld [vmem:[#allocation5 + $0x288] ss:$40 sps:$4 sm:$0xff]   ;;  %v7815_v41 = vld [vmem:[#allocation5 + $0xcd4] ss:$40 sps:$4 sm:$0xff]  }
  0x99   :  { %3099 = vmatpush1.bf16.msra.mxu1 %v7721_v42  ;;  %v7818_v42 = vld [vmem:[#allocation5 + $0x2dc] ss:$40 sps:$4 sm:$0xff]  }
  0x9a   :  { %3142 = vmatpush1.bf16.msra.mxu0 %v7722_v43  ;;  %3100 = vmatprep.subr.bf16.mxu1 %v7723_v44  ;;  %v7813_v43 = vld [vmem:[#allocation5 + $0xcd0] ss:$40 sps:$4 sm:$0xff]  }
  0x9b   :  { %3143 = vmatprep.subr.bf16.mxu0 %v7725_v45  ;;  %v7816_v44 = vld [vmem:[#allocation5 + $0x2d8] ss:$40 sps:$4 sm:$0xff]   ;;  %v7821_v45 = vld [vmem:[#allocation5 + $0xd24] ss:$40 sps:$4 sm:$0xff]  }
  0x9d   :  { %3101 = vmatpush1.bf16.msra.mxu1 %v7727_v46  ;;  %v7824_v46 = vld [vmem:[#allocation5 + $0x32c] ss:$40 sps:$4 sm:$0xff]  }
  0x9e   :  { %3144 = vmatpush1.bf16.msra.mxu0 %v7728_v47  ;;  %3102 = vmatprep.subr.bf16.mxu1 %v7729_v50  ;;  %v7819_v47 = vld [vmem:[#allocation5 + $0xd20] ss:$40 sps:$4 sm:$0xff]  }
  0x9f   :  { %3145 = vmatprep.subr.bf16.mxu0 %v7731_v51  ;;  %v7822_v50 = vld [vmem:[#allocation5 + $0x328] ss:$40 sps:$4 sm:$0xff]   ;;  %v7827_v51 = vld [vmem:[#allocation5 + $0xd74] ss:$40 sps:$4 sm:$0xff]  }
  0xa1   :  { %3103 = vmatpush1.bf16.msra.mxu1 %v7733_v52  ;;  %v7830_v52 = vld [vmem:[#allocation5 + $0x37c] ss:$40 sps:$4 sm:$0xff]  }
  0xa2   :  { %3146 = vmatpush1.bf16.msra.mxu0 %v7734_v53  ;;  %3104 = vmatprep.subr.bf16.mxu1 %v7735_v54  ;;  %v7825_v53 = vld [vmem:[#allocation5 + $0xd70] ss:$40 sps:$4 sm:$0xff]  }
  0xa3   :  { %3147 = vmatprep.subr.bf16.mxu0 %v7737_v55  ;;  %v7828_v54 = vld [vmem:[#allocation5 + $0x378] ss:$40 sps:$4 sm:$0xff]   ;;  %v7833_v55 = vld [vmem:[#allocation5 + $0xdc4] ss:$40 sps:$4 sm:$0xff]  }
  0xa5   :  { %3105 = vmatpush1.bf16.msra.mxu1 %v7739_v56  ;;  %v7836_v56 = vld [vmem:[#allocation5 + $0x3cc] ss:$40 sps:$4 sm:$0xff]  }
  0xa6   :  { %3148 = vmatpush1.bf16.msra.mxu0 %v7740_v57  ;;  %3106 = vmatprep.subr.bf16.mxu1 %v7741_v58  ;;  %v7831_v57 = vld [vmem:[#allocation5 + $0xdc0] ss:$40 sps:$4 sm:$0xff]  }
  0xa7   :  { %3149 = vmatprep.subr.bf16.mxu0 %v7743_v59  ;;  %v7834_v58 = vld [vmem:[#allocation5 + $0x3c8] ss:$40 sps:$4 sm:$0xff]   ;;  %v7839_v59 = vld [vmem:[#allocation5 + $0xe14] ss:$40 sps:$4 sm:$0xff]  }
  0xa9   :  { %3107 = vmatpush1.bf16.msra.mxu1 %v7745_v60  ;;  %v7842_v60 = vld [vmem:[#allocation5 + $0x41c] ss:$40 sps:$4 sm:$0xff]  }
  0xaa   :  { %3150 = vmatpush1.bf16.msra.mxu0 %v7746_v61  ;;  %3108 = vmatprep.subr.bf16.mxu1 %v7747_v62  ;;  %v7837_v61 = vld [vmem:[#allocation5 + $0xe10] ss:$40 sps:$4 sm:$0xff]  }
  0xab   :  { %3151 = vmatprep.subr.bf16.mxu0 %v7749_v63  ;;  %v7840_v62 = vld [vmem:[#allocation5 + $0x418] ss:$40 sps:$4 sm:$0xff]   ;;  %v7845_v63 = vld [vmem:[#allocation5 + $0xe64] ss:$40 sps:$4 sm:$0xff]  }
  0xad   :  { %3109 = vmatpush1.bf16.msra.mxu1 %v7751_v0  ;;  %v7848_v0 = vld [vmem:[#allocation5 + $0x46c] ss:$40 sps:$4 sm:$0xff]  }
  0xae   :  { %3152 = vmatpush1.bf16.msra.mxu0 %v7752_v1  ;;  %3207 = vmatprep.subr.bf16.mxu1 %v7762_v3  ;;  %v7843_v1 = vld [vmem:[#allocation5 + $0xe60] ss:$40 sps:$4 sm:$0xff]   ;;  %v7851_v3 = vld [vmem:[#allocation5 + $0xeb4] ss:$40 sps:$4 sm:$0xff]  }
  0xaf   :  { %3164 = vmatprep.subr.bf16.mxu0 %v7759_v2  ;;  %v7846_v2 = vld [vmem:[#allocation5 + $0x468] ss:$40 sps:$4 sm:$0xff]  }
  0xb0   :  { %3111 = vmatmul.mubr.bf16.vlgmr.msra.gmra.mrb[0].mxu1 %v9219_v6 }
  0xb1   :  { %3154 = vmatmul.mubr.bf16.vlgmr.msra.gmra.mrb[0].mxu0 %v9221_v7  ;;  %3208 = vmatpush1.bf16.msra.mxu1 %v7760_v5  ;;  %v7849_v5 = vld [vmem:[#allocation5 + $0xeb0] ss:$40 sps:$4 sm:$0xff]  }
  0xb2   :  { %3165 = vmatpush1.bf16.msra.mxu0 %v7757_v4  ;;  %3209 = vmatprep.subr.bf16.mxu1 %v7770_v9  ;;  %v7854_v4 = vld [vmem:[#allocation5 + $0x4bc] ss:$40 sps:$4 sm:$0xff]   ;;  %v7860_v9 = vld [vmem:[#allocation5 + $0x50c] ss:$40 sps:$4 sm:$0xff]  }
  0xb3   :  { %3166 = vmatprep.subr.bf16.mxu0 %v7767_v8  ;;  %3239 = vmatprep.mubr.bf16.mxu1 %v9213_v48  ;;  %v7852_v8 = vld [vmem:[#allocation5 + $0x4b8] ss:$40 sps:$4 sm:$0xff]  }
  0xb4   :  { %3196 = vmatprep.mubr.bf16.mxu0 %v9226_v33 }
  0xb5   :  { %3210 = vmatpush1.bf16.msra.mxu1 %v7768_v11  ;;  %v9229_v11 = vld [vmem:[#allocation2 + $0x10] ss:$24 sps:$4 sm:$0xff]  }
  0xb6   :  { %3167 = vmatpush1.bf16.msra.mxu0 %v7765_v10  ;;  %3211 = vmatprep.subr.bf16.mxu1 %v7776_v13  ;;  %v7863_v10 = vld [vmem:[#allocation5 + $0x14] ss:$40 sps:$4 sm:$0xff]   ;;  %v7861_v13 = vld [vmem:[#allocation5 + $0x10] ss:$40 sps:$4 sm:$0xff]  }
  0xb7   :  { %3168 = vmatprep.subr.bf16.mxu0 %v7773_v12  ;;  %v7858_v12 = vld [vmem:[#allocation5 + $0x508] ss:$40 sps:$4 sm:$0xff]  }
  0xb9   :  { %3212 = vmatpush1.bf16.msra.mxu1 %v7774_v15  ;;  %v7869_v15 = vld [vmem:[#allocation5 + $0x64] ss:$40 sps:$4 sm:$0xff]  }
  0xba   :  { %3169 = vmatpush1.bf16.msra.mxu0 %v7771_v14  ;;  %3213 = vmatprep.subr.bf16.mxu1 %v7782_v17  ;;  %v7866_v14 = vld [vmem:[#allocation5 + $0x55c] ss:$40 sps:$4 sm:$0xff]   ;;  %v7867_v17 = vld [vmem:[#allocation5 + $0x60] ss:$40 sps:$4 sm:$0xff]  }
  0xbb   :  { %3170 = vmatprep.subr.bf16.mxu0 %v7779_v16  ;;  %v7864_v16 = vld [vmem:[#allocation5 + $0x558] ss:$40 sps:$4 sm:$0xff]  }
  0xbd   :  { %3214 = vmatpush1.bf16.msra.mxu1 %v7780_v19  ;;  %v7875_v19 = vld [vmem:[#allocation5 + $0xb4] ss:$40 sps:$4 sm:$0xff]  }
  0xbe   :  { %3171 = vmatpush1.bf16.msra.mxu0 %v7777_v18  ;;  %3215 = vmatprep.subr.bf16.mxu1 %v7788_v21  ;;  %v7872_v18 = vld [vmem:[#allocation5 + $0x5ac] ss:$40 sps:$4 sm:$0xff]   ;;  %v7873_v21 = vld [vmem:[#allocation5 + $0xb0] ss:$40 sps:$4 sm:$0xff]  }
  0xbf   :  { %3172 = vmatprep.subr.bf16.mxu0 %v7785_v20  ;;  %v7870_v20 = vld [vmem:[#allocation5 + $0x5a8] ss:$40 sps:$4 sm:$0xff]  }
  0xc1   :  { %3216 = vmatpush1.bf16.msra.mxu1 %v7786_v23  ;;  %v7881_v23 = vld [vmem:[#allocation5 + $0x104] ss:$40 sps:$4 sm:$0xff]  }
  0xc2   :  { %3173 = vmatpush1.bf16.msra.mxu0 %v7783_v22  ;;  %3217 = vmatprep.subr.bf16.mxu1 %v7794_v25  ;;  %v7878_v22 = vld [vmem:[#allocation5 + $0x5fc] ss:$40 sps:$4 sm:$0xff]   ;;  %v7879_v25 = vld [vmem:[#allocation5 + $0x100] ss:$40 sps:$4 sm:$0xff]  }
  0xc3   :  { %3174 = vmatprep.subr.bf16.mxu0 %v7791_v24  ;;  %v7876_v24 = vld [vmem:[#allocation5 + $0x5f8] ss:$40 sps:$4 sm:$0xff]  }
  0xc5   :  { %3218 = vmatpush1.bf16.msra.mxu1 %v7792_v27  ;;  %v7887_v27 = vld [vmem:[#allocation5 + $0x154] ss:$40 sps:$4 sm:$0xff]  }
  0xc6   :  { %3175 = vmatpush1.bf16.msra.mxu0 %v7789_v26  ;;  %3219 = vmatprep.subr.bf16.mxu1 %v7800_v29  ;;  %v7884_v26 = vld [vmem:[#allocation5 + $0x64c] ss:$40 sps:$4 sm:$0xff]  }
  0xc7   :  { %3176 = vmatprep.subr.bf16.mxu0 %v7797_v28  ;;  %v7882_v28 = vld [vmem:[#allocation5 + $0x648] ss:$40 sps:$4 sm:$0xff]   ;;  %v7893_v29 = vld [vmem:[#allocation5 + $0x1a4] ss:$40 sps:$4 sm:$0xff]  }
  0xc9   :  { %3220 = vmatpush1.bf16.msra.mxu1 %v7798_v31  ;;  %v7891_v31 = vld [vmem:[#allocation5 + $0x1a0] ss:$40 sps:$4 sm:$0xff]  }
  0xca   :  { %3177 = vmatpush1.bf16.msra.mxu0 %v7795_v30  ;;  %3221 = vmatprep.subr.bf16.mxu1 %v7806_v34  ;;  %v7888_v30 = vld [vmem:[#allocation5 + $0x698] ss:$40 sps:$4 sm:$0xff]   ;;  %v7899_v34 = vld [vmem:[#allocation5 + $0x1f4] ss:$40 sps:$4 sm:$0xff]  }
  0xcb   :  { %3178 = vmatprep.subr.bf16.mxu0 %v7803_v32  ;;  %v7896_v32 = vld [vmem:[#allocation5 + $0x6ec] ss:$40 sps:$4 sm:$0xff]  }
  0xcd   :  { %3222 = vmatpush1.bf16.msra.mxu1 %v7804_v36  ;;  %v7897_v36 = vld [vmem:[#allocation5 + $0x1f0] ss:$40 sps:$4 sm:$0xff]  }
  0xce   :  { %3179 = vmatpush1.bf16.msra.mxu0 %v7801_v35  ;;  %3223 = vmatprep.subr.bf16.mxu1 %v7812_v38  ;;  %v7894_v35 = vld [vmem:[#allocation5 + $0x6e8] ss:$40 sps:$4 sm:$0xff]   ;;  %v7905_v38 = vld [vmem:[#allocation5 + $0x244] ss:$40 sps:$4 sm:$0xff]  }
  0xcf   :  { %3180 = vmatprep.subr.bf16.mxu0 %v7809_v37  ;;  %v7902_v37 = vld [vmem:[#allocation5 + $0x73c] ss:$40 sps:$4 sm:$0xff]  }
  0xd1   :  { %3224 = vmatpush1.bf16.msra.mxu1 %v7810_v40  ;;  %v7903_v40 = vld [vmem:[#allocation5 + $0x240] ss:$40 sps:$4 sm:$0xff]  }
  0xd2   :  { %3181 = vmatpush1.bf16.msra.mxu0 %v7807_v39  ;;  %3225 = vmatprep.subr.bf16.mxu1 %v7818_v42  ;;  %v7900_v39 = vld [vmem:[#allocation5 + $0x738] ss:$40 sps:$4 sm:$0xff]   ;;  %v7911_v42 = vld [vmem:[#allocation5 + $0x294] ss:$40 sps:$4 sm:$0xff]  }
  0xd3   :  { %3182 = vmatprep.subr.bf16.mxu0 %v7815_v41  ;;  %v7908_v41 = vld [vmem:[#allocation5 + $0x78c] ss:$40 sps:$4 sm:$0xff]  }
  0xd5   :  { %3226 = vmatpush1.bf16.msra.mxu1 %v7816_v44  ;;  %v7909_v44 = vld [vmem:[#allocation5 + $0x290] ss:$40 sps:$4 sm:$0xff]  }
  0xd6   :  { %3183 = vmatpush1.bf16.msra.mxu0 %v7813_v43  ;;  %3227 = vmatprep.subr.bf16.mxu1 %v7824_v46  ;;  %v7906_v43 = vld [vmem:[#allocation5 + $0x788] ss:$40 sps:$4 sm:$0xff]   ;;  %v7917_v46 = vld [vmem:[#allocation5 + $0x2e4] ss:$40 sps:$4 sm:$0xff]  }
  0xd7   :  { %3184 = vmatprep.subr.bf16.mxu0 %v7821_v45  ;;  %v7914_v45 = vld [vmem:[#allocation5 + $0x7dc] ss:$40 sps:$4 sm:$0xff]  }
  0xd9   :  { %3228 = vmatpush1.bf16.msra.mxu1 %v7822_v50  ;;  %v7915_v50 = vld [vmem:[#allocation5 + $0x2e0] ss:$40 sps:$4 sm:$0xff]  }
  0xda   :  { %3185 = vmatpush1.bf16.msra.mxu0 %v7819_v47  ;;  %3229 = vmatprep.subr.bf16.mxu1 %v7830_v52  ;;  %v7912_v47 = vld [vmem:[#allocation5 + $0x7d8] ss:$40 sps:$4 sm:$0xff]   ;;  %v7923_v52 = vld [vmem:[#allocation5 + $0x334] ss:$40 sps:$4 sm:$0xff]  }
  0xdb   :  { %3186 = vmatprep.subr.bf16.mxu0 %v7827_v51  ;;  %v7920_v51 = vld [vmem:[#allocation5 + $0x82c] ss:$40 sps:$4 sm:$0xff]  }
  0xdd   :  { %3230 = vmatpush1.bf16.msra.mxu1 %v7828_v54  ;;  %v7921_v54 = vld [vmem:[#allocation5 + $0x330] ss:$40 sps:$4 sm:$0xff]  }
  0xde   :  { %3187 = vmatpush1.bf16.msra.mxu0 %v7825_v53  ;;  %3231 = vmatprep.subr.bf16.mxu1 %v7836_v56  ;;  %v7918_v53 = vld [vmem:[#allocation5 + $0x828] ss:$40 sps:$4 sm:$0xff]   ;;  %v7929_v56 = vld [vmem:[#allocation5 + $0x384] ss:$40 sps:$4 sm:$0xff]  }
  0xdf   :  { %3188 = vmatprep.subr.bf16.mxu0 %v7833_v55  ;;  %v7926_v55 = vld [vmem:[#allocation5 + $0x87c] ss:$40 sps:$4 sm:$0xff]  }
  0xe1   :  { %3232 = vmatpush1.bf16.msra.mxu1 %v7834_v58  ;;  %v7927_v58 = vld [vmem:[#allocation5 + $0x380] ss:$40 sps:$4 sm:$0xff]  }
  0xe2   :  { %3189 = vmatpush1.bf16.msra.mxu0 %v7831_v57  ;;  %3233 = vmatprep.subr.bf16.mxu1 %v7842_v60  ;;  %v7924_v57 = vld [vmem:[#allocation5 + $0x878] ss:$40 sps:$4 sm:$0xff]   ;;  %v7935_v60 = vld [vmem:[#allocation5 + $0x3d4] ss:$40 sps:$4 sm:$0xff]  }
  0xe3   :  { %3190 = vmatprep.subr.bf16.mxu0 %v7839_v59  ;;  %v7932_v59 = vld [vmem:[#allocation5 + $0x8cc] ss:$40 sps:$4 sm:$0xff]  }
  0xe5   :  { %3234 = vmatpush1.bf16.msra.mxu1 %v7840_v62  ;;  %v7933_v62 = vld [vmem:[#allocation5 + $0x3d0] ss:$40 sps:$4 sm:$0xff]  }
  0xe6   :  { %3191 = vmatpush1.bf16.msra.mxu0 %v7837_v61  ;;  %3235 = vmatprep.subr.bf16.mxu1 %v7848_v0  ;;  %v7930_v61 = vld [vmem:[#allocation5 + $0x8c8] ss:$40 sps:$4 sm:$0xff]   ;;  %v7941_v0 = vld [vmem:[#allocation5 + $0x424] ss:$40 sps:$4 sm:$0xff]  }
  0xe7   :  { %3192 = vmatprep.subr.bf16.mxu0 %v7845_v63  ;;  %v7938_v63 = vld [vmem:[#allocation5 + $0x91c] ss:$40 sps:$4 sm:$0xff]  }
  0xe9   :  { %3236 = vmatpush1.bf16.msra.mxu1 %v7846_v2  ;;  %v7939_v2 = vld [vmem:[#allocation5 + $0x420] ss:$40 sps:$4 sm:$0xff]  }
  0xea   :  { %3193 = vmatpush1.bf16.msra.mxu0 %v7843_v1  ;;  %3237 = vmatprep.subr.bf16.mxu1 %v7854_v4  ;;  %v7936_v1 = vld [vmem:[#allocation5 + $0x918] ss:$40 sps:$4 sm:$0xff]   ;;  %v7947_v4 = vld [vmem:[#allocation5 + $0x474] ss:$40 sps:$4 sm:$0xff]  }
  0xeb   :  { %3194 = vmatprep.subr.bf16.mxu0 %v7851_v3  ;;  %v7944_v3 = vld [vmem:[#allocation5 + $0x96c] ss:$40 sps:$4 sm:$0xff]  }
  0xed   :  { %3238 = vmatpush1.bf16.msra.mxu1 %v7852_v8  ;;  %v7945_v8 = vld [vmem:[#allocation5 + $0x470] ss:$40 sps:$4 sm:$0xff]  }
  0xee   :  { %3195 = vmatpush1.bf16.msra.mxu0 %v7849_v5  ;;  %3250 = vmatprep.subr.bf16.mxu1 %v7860_v9  ;;  %v7942_v5 = vld [vmem:[#allocation5 + $0x968] ss:$40 sps:$4 sm:$0xff]   ;;  %v7950_v9 = vld [vmem:[#allocation5 + $0x9bc] ss:$40 sps:$4 sm:$0xff]  }
  0xef   :  { %3336 = vmatprep.subr.bf16.mxu0 %v7863_v10  ;;  %v7953_v10 = vld [vmem:[#allocation5 + $0x4c4] ss:$40 sps:$4 sm:$0xff]  }
  0xf0   :  { %3240 = vmatmul.mubr.bf16.vlgmr.msra.gmra.mrb[4].mxu1 %v9219_v6 }
  0xf1   :  { %3197 = vmatmul.mubr.bf16.vlgmr.msra.gmra.mrb[0].mxu0 %v9229_v11  ;;  %3251 = vmatpush1.bf16.msra.mxu1 %v7858_v12  ;;  %v7948_v12 = vld [vmem:[#allocation5 + $0x9b8] ss:$40 sps:$4 sm:$0xff]  }
  0xf2   :  { %3337 = vmatpush1.bf16.msra.mxu0 %v7861_v13  ;;  %3252 = vmatprep.subr.bf16.mxu1 %v7866_v14  ;;  %v7951_v13 = vld [vmem:[#allocation5 + $0x4c0] ss:$40 sps:$4 sm:$0xff]   ;;  %v7956_v14 = vld [vmem:[#allocation5 + $0xa0c] ss:$40 sps:$4 sm:$0xff]  }
  0xf3   :  { %3338 = vmatprep.subr.bf16.mxu0 %v7869_v15  ;;  %3282 = vmatprep.mubr.bf16.mxu1 %v9215_v49  ;;  %v7885_v49 = vld [vmem:[#allocation5 + $0x150] ss:$40 sps:$4 sm:$0xff]   ;;  %v7959_v15 = vld [vmem:[#allocation5 + $0x514] ss:$40 sps:$4 sm:$0xff]  }
  0xf4   :  { %3368 = vmatprep.mubr.bf16.mxu0 %v9213_v48  ;;  %v7890_v48 = vld [vmem:[#allocation5 + $0x69c] ss:$40 sps:$4 sm:$0xff]  }
  0xf5   :  { %3253 = vmatpush1.bf16.msra.mxu1 %v7864_v16  ;;  %v7954_v16 = vld [vmem:[#allocation5 + $0xa08] ss:$40 sps:$4 sm:$0xff]  }
  0xf6   :  { %3339 = vmatpush1.bf16.msra.mxu0 %v7867_v17  ;;  %3254 = vmatprep.subr.bf16.mxu1 %v7872_v18  ;;  %v7957_v17 = vld [vmem:[#allocation5 + $0x510] ss:$40 sps:$4 sm:$0xff]   ;;  %v7962_v18 = vld [vmem:[#allocation5 + $0xa5c] ss:$40 sps:$4 sm:$0xff]  }
  0xf7   :  { %3340 = vmatprep.subr.bf16.mxu0 %v7875_v19  ;;  %v7965_v19 = vld [vmem:[#allocation5 + $0x564] ss:$40 sps:$4 sm:$0xff]  }
  0xf9   :  { %3255 = vmatpush1.bf16.msra.mxu1 %v7870_v20  ;;  %v7960_v20 = vld [vmem:[#allocation5 + $0xa58] ss:$40 sps:$4 sm:$0xff]  }
  0xfa   :  { %3341 = vmatpush1.bf16.msra.mxu0 %v7873_v21  ;;  %3256 = vmatprep.subr.bf16.mxu1 %v7878_v22  ;;  %v7963_v21 = vld [vmem:[#allocation5 + $0x560] ss:$40 sps:$4 sm:$0xff]   ;;  %v7968_v22 = vld [vmem:[#allocation5 + $0xaac] ss:$40 sps:$4 sm:$0xff]  }
  0xfb   :  { %3342 = vmatprep.subr.bf16.mxu0 %v7881_v23  ;;  %v7971_v23 = vld [vmem:[#allocation5 + $0x5b4] ss:$40 sps:$4 sm:$0xff]  }
  0xfd   :  { %3257 = vmatpush1.bf16.msra.mxu1 %v7876_v24  ;;  %v9238_v24 = vld [vmem:[#allocation2 + $0xc] ss:$24 sps:$4 sm:$0xff]  }
  0xfe   :  { %3343 = vmatpush1.bf16.msra.mxu0 %v7879_v25  ;;  %3258 = vmatprep.subr.bf16.mxu1 %v7884_v26  ;;  %v7966_v25 = vld [vmem:[#allocation5 + $0xaa8] ss:$40 sps:$4 sm:$0xff]  }
  0xff   :  { %3344 = vmatprep.subr.bf16.mxu0 %v7887_v27  ;;  %v7969_v26 = vld [vmem:[#allocation5 + $0x5b0] ss:$40 sps:$4 sm:$0xff]  }
 0x100   :  { %v7972_v27 = vld [vmem:[#allocation5 + $0xaf8] ss:$40 sps:$4 sm:$0xff]  }
 0x101   :  { %3259 = vmatpush1.bf16.msra.mxu1 %v7882_v28  ;;  %v7975_v28 = vld [vmem:[#allocation5 + $0x600] ss:$40 sps:$4 sm:$0xff]  }
 0x102   :  { %3345 = vmatpush1.bf16.msra.mxu0 %v7885_v49  ;;  %3260 = vmatprep.subr.bf16.mxu1 %v7890_v48  ;;  %v7980_v49 = vld [vmem:[#allocation5 + $0xb4c] ss:$40 sps:$4 sm:$0xff]   ;;  %v7978_v48 = vld [vmem:[#allocation5 + $0xb48] ss:$40 sps:$4 sm:$0xff]  }
 0x103   :  { %3346 = vmatprep.subr.bf16.mxu0 %v7893_v29  ;;  %v7981_v29 = vld [vmem:[#allocation5 + $0x650] ss:$40 sps:$4 sm:$0xff]  }
 0x105   :  { %3261 = vmatpush1.bf16.msra.mxu1 %v7888_v30  ;;  %v7986_v30 = vld [vmem:[#allocation5 + $0xb9c] ss:$40 sps:$4 sm:$0xff]  }
 0x106   :  { %3347 = vmatpush1.bf16.msra.mxu0 %v7891_v31  ;;  %3262 = vmatprep.subr.bf16.mxu1 %v7896_v32  ;;  %v7989_v31 = vld [vmem:[#allocation5 + $0x6a4] ss:$40 sps:$4 sm:$0xff]   ;;  %v7984_v32 = vld [vmem:[#allocation5 + $0xb98] ss:$40 sps:$4 sm:$0xff]  }
 0x107   :  { %3348 = vmatprep.subr.bf16.mxu0 %v7899_v34  ;;  %v7987_v34 = vld [vmem:[#allocation5 + $0x6a0] ss:$40 sps:$4 sm:$0xff]  }
 0x109   :  { %3263 = vmatpush1.bf16.msra.mxu1 %v7894_v35  ;;  %v7992_v35 = vld [vmem:[#allocation5 + $0xbec] ss:$40 sps:$4 sm:$0xff]  }
 0x10a   :  { %3349 = vmatpush1.bf16.msra.mxu0 %v7897_v36  ;;  %3264 = vmatprep.subr.bf16.mxu1 %v7902_v37  ;;  %v7995_v36 = vld [vmem:[#allocation5 + $0x6f4] ss:$40 sps:$4 sm:$0xff]   ;;  %v7990_v37 = vld [vmem:[#allocation5 + $0xbe8] ss:$40 sps:$4 sm:$0xff]  }
 0x10b   :  { %3350 = vmatprep.subr.bf16.mxu0 %v7905_v38  ;;  %v7993_v38 = vld [vmem:[#allocation5 + $0x6f0] ss:$40 sps:$4 sm:$0xff]  }
 0x10d   :  { %3265 = vmatpush1.bf16.msra.mxu1 %v7900_v39  ;;  %v7998_v39 = vld [vmem:[#allocation5 + $0xc3c] ss:$40 sps:$4 sm:$0xff]  }
 0x10e   :  { %3351 = vmatpush1.bf16.msra.mxu0 %v7903_v40  ;;  %3266 = vmatprep.subr.bf16.mxu1 %v7908_v41  ;;  %v8001_v40 = vld [vmem:[#allocation5 + $0x744] ss:$40 sps:$4 sm:$0xff]   ;;  %v7996_v41 = vld [vmem:[#allocation5 + $0xc38] ss:$40 sps:$4 sm:$0xff]  }
 0x10f   :  { %3352 = vmatprep.subr.bf16.mxu0 %v7911_v42  ;;  %v7999_v42 = vld [vmem:[#allocation5 + $0x740] ss:$40 sps:$4 sm:$0xff]  }
 0x111   :  { %3267 = vmatpush1.bf16.msra.mxu1 %v7906_v43  ;;  %v8004_v43 = vld [vmem:[#allocation5 + $0xc8c] ss:$40 sps:$4 sm:$0xff]  }
 0x112   :  { %3353 = vmatpush1.bf16.msra.mxu0 %v7909_v44  ;;  %3268 = vmatprep.subr.bf16.mxu1 %v7914_v45  ;;  %v8007_v44 = vld [vmem:[#allocation5 + $0x794] ss:$40 sps:$4 sm:$0xff]   ;;  %v8002_v45 = vld [vmem:[#allocation5 + $0xc88] ss:$40 sps:$4 sm:$0xff]  }
 0x113   :  { %3354 = vmatprep.subr.bf16.mxu0 %v7917_v46  ;;  %v8005_v46 = vld [vmem:[#allocation5 + $0x790] ss:$40 sps:$4 sm:$0xff]  }
 0x115   :  { %3269 = vmatpush1.bf16.msra.mxu1 %v7912_v47  ;;  %v8010_v47 = vld [vmem:[#allocation5 + $0xcdc] ss:$40 sps:$4 sm:$0xff]  }
 0x116   :  { %3355 = vmatpush1.bf16.msra.mxu0 %v7915_v50  ;;  %3270 = vmatprep.subr.bf16.mxu1 %v7920_v51  ;;  %v8013_v50 = vld [vmem:[#allocation5 + $0x7e4] ss:$40 sps:$4 sm:$0xff]   ;;  %v8008_v51 = vld [vmem:[#allocation5 + $0xcd8] ss:$40 sps:$4 sm:$0xff]  }
 0x117   :  { %3356 = vmatprep.subr.bf16.mxu0 %v7923_v52  ;;  %v8011_v52 = vld [vmem:[#allocation5 + $0x7e0] ss:$40 sps:$4 sm:$0xff]  }
 0x119   :  { %3271 = vmatpush1.bf16.msra.mxu1 %v7918_v53  ;;  %v8016_v53 = vld [vmem:[#allocation5 + $0xd2c] ss:$40 sps:$4 sm:$0xff]  }
 0x11a   :  { %3357 = vmatpush1.bf16.msra.mxu0 %v7921_v54  ;;  %3272 = vmatprep.subr.bf16.mxu1 %v7926_v55  ;;  %v8019_v54 = vld [vmem:[#allocation5 + $0x834] ss:$40 sps:$4 sm:$0xff]   ;;  %v8014_v55 = vld [vmem:[#allocation5 + $0xd28] ss:$40 sps:$4 sm:$0xff]  }
 0x11b   :  { %3358 = vmatprep.subr.bf16.mxu0 %v7929_v56  ;;  %v8017_v56 = vld [vmem:[#allocation5 + $0x830] ss:$40 sps:$4 sm:$0xff]  }
 0x11d   :  { %3273 = vmatpush1.bf16.msra.mxu1 %v7924_v57  ;;  %v8022_v57 = vld [vmem:[#allocation5 + $0xd7c] ss:$40 sps:$4 sm:$0xff]  }
 0x11e   :  { %3359 = vmatpush1.bf16.msra.mxu0 %v7927_v58  ;;  %3274 = vmatprep.subr.bf16.mxu1 %v7932_v59  ;;  %v8025_v58 = vld [vmem:[#allocation5 + $0x884] ss:$40 sps:$4 sm:$0xff]   ;;  %v8020_v59 = vld [vmem:[#allocation5 + $0xd78] ss:$40 sps:$4 sm:$0xff]  }
 0x11f   :  { %3360 = vmatprep.subr.bf16.mxu0 %v7935_v60  ;;  %v8023_v60 = vld [vmem:[#allocation5 + $0x880] ss:$40 sps:$4 sm:$0xff]  }
 0x121   :  { %3275 = vmatpush1.bf16.msra.mxu1 %v7930_v61  ;;  %v8028_v61 = vld [vmem:[#allocation5 + $0xdcc] ss:$40 sps:$4 sm:$0xff]  }
 0x122   :  { %3361 = vmatpush1.bf16.msra.mxu0 %v7933_v62  ;;  %3276 = vmatprep.subr.bf16.mxu1 %v7938_v63  ;;  %v8031_v62 = vld [vmem:[#allocation5 + $0x8d4] ss:$40 sps:$4 sm:$0xff]   ;;  %v8026_v63 = vld [vmem:[#allocation5 + $0xdc8] ss:$40 sps:$4 sm:$0xff]  }
 0x123   :  { %3362 = vmatprep.subr.bf16.mxu0 %v7941_v0  ;;  %v8029_v0 = vld [vmem:[#allocation5 + $0x8d0] ss:$40 sps:$4 sm:$0xff]  }
 0x125   :  { %3277 = vmatpush1.bf16.msra.mxu1 %v7936_v1  ;;  %v8034_v1 = vld [vmem:[#allocation5 + $0xe1c] ss:$40 sps:$4 sm:$0xff]  }
 0x126   :  { %3363 = vmatpush1.bf16.msra.mxu0 %v7939_v2  ;;  %3278 = vmatprep.subr.bf16.mxu1 %v7944_v3  ;;  %v8037_v2 = vld [vmem:[#allocation5 + $0x924] ss:$40 sps:$4 sm:$0xff]   ;;  %v8032_v3 = vld [vmem:[#allocation5 + $0xe18] ss:$40 sps:$4 sm:$0xff]  }
 0x127   :  { %3364 = vmatprep.subr.bf16.mxu0 %v7947_v4  ;;  %v8035_v4 = vld [vmem:[#allocation5 + $0x920] ss:$40 sps:$4 sm:$0xff]  }
 0x129   :  { %3279 = vmatpush1.bf16.msra.mxu1 %v7942_v5  ;;  %v8040_v5 = vld [vmem:[#allocation5 + $0xe6c] ss:$40 sps:$4 sm:$0xff]  }
 0x12a   :  { %3365 = vmatpush1.bf16.msra.mxu0 %v7945_v8  ;;  %3280 = vmatprep.subr.bf16.mxu1 %v7950_v9  ;;  %v8043_v8 = vld [vmem:[#allocation5 + $0x974] ss:$40 sps:$4 sm:$0xff]   ;;  %v8038_v9 = vld [vmem:[#allocation5 + $0xe68] ss:$40 sps:$4 sm:$0xff]  }
 0x12b   :  { %3366 = vmatprep.subr.bf16.mxu0 %v7953_v10  ;;  %v8041_v10 = vld [vmem:[#allocation5 + $0x970] ss:$40 sps:$4 sm:$0xff]  }
 0x12d   :  { %3281 = vmatpush1.bf16.msra.mxu1 %v7948_v12  ;;  %v8046_v12 = vld [vmem:[#allocation5 + $0xebc] ss:$40 sps:$4 sm:$0xff]  }
 0x12e   :  { %3367 = vmatpush1.bf16.msra.mxu0 %v7951_v13  ;;  %3293 = vmatprep.subr.bf16.mxu1 %v7956_v14  ;;  %v8049_v13 = vld [vmem:[#allocation5 + $0x9c4] ss:$40 sps:$4 sm:$0xff]   ;;  %v8044_v14 = vld [vmem:[#allocation5 + $0xeb8] ss:$40 sps:$4 sm:$0xff]  }
 0x12f   :  { %3379 = vmatprep.subr.bf16.mxu0 %v7959_v15  ;;  %v8047_v15 = vld [vmem:[#allocation5 + $0x9c0] ss:$40 sps:$4 sm:$0xff]  }
 0x130   :  { %3283 = vmatmul.mubr.bf16.vlgmr.msra.gmra.mrb[4].mxu1 %v9221_v7  ;;  %v7974_v7 = vld [vmem:[#allocation5 + $0xafc] ss:$40 sps:$4 sm:$0xff]  }
 0x131   :  { %3369 = vmatmul.mubr.bf16.vlgmr.msra.gmra.mrb[4].mxu0 %v9219_v6  ;;  %3294 = vmatpush1.bf16.msra.mxu1 %v7954_v16  ;;  %v7977_v6 = vld [vmem:[#allocation5 + $0x604] ss:$40 sps:$4 sm:$0xff]   ;;  %v8052_v16 = vld [vmem:[#allocation5 + $0xa14] ss:$40 sps:$4 sm:$0xff]  }
 0x132   :  { %3380 = vmatpush1.bf16.msra.mxu0 %v7957_v17  ;;  %3295 = vmatprep.subr.bf16.mxu1 %v7962_v18  ;;  %v8055_v17 = vld [vmem:[#allocation5 + $0x1c] ss:$40 sps:$4 sm:$0xff]   ;;  %v8050_v18 = vld [vmem:[#allocation5 + $0xa10] ss:$40 sps:$4 sm:$0xff]  }
 0x133   :  { %3381 = vmatprep.subr.bf16.mxu0 %v7965_v19  ;;  %3325 = vmatprep.mubr.bf16.mxu1 %v9226_v33  ;;  %v7983_v33 = vld [vmem:[#allocation5 + $0x654] ss:$40 sps:$4 sm:$0xff]   ;;  %v8053_v19 = vld [vmem:[#allocation5 + $0x18] ss:$40 sps:$4 sm:$0xff]  }
 0x134   :  { %3411 = vmatprep.mubr.bf16.mxu0 %v9238_v24 }
 0x135   :  { %3296 = vmatpush1.bf16.msra.mxu1 %v7960_v20  ;;  %v8058_v20 = vld [vmem:[#allocation5 + $0xa64] ss:$40 sps:$4 sm:$0xff]  }
 0x136   :  { %3382 = vmatpush1.bf16.msra.mxu0 %v7963_v21  ;;  %3297 = vmatprep.subr.bf16.mxu1 %v7968_v22  ;;  %v8061_v21 = vld [vmem:[#allocation5 + $0x6c] ss:$40 sps:$4 sm:$0xff]   ;;  %v8907_v22 = vld [vmem:[#allocation2 + $0x8] ss:$24 sps:$4 sm:$0xff]  }
 0x137   :  { %3383 = vmatprep.subr.bf16.mxu0 %v7971_v23  ;;  %v8056_v23 = vld [vmem:[#allocation5 + $0xa60] ss:$40 sps:$4 sm:$0xff]  }
 0x139   :  { %3298 = vmatpush1.bf16.msra.mxu1 %v7966_v25  ;;  %v8059_v25 = vld [vmem:[#allocation5 + $0x68] ss:$40 sps:$4 sm:$0xff]  }
 0x13a   :  { %3384 = vmatpush1.bf16.msra.mxu0 %v7969_v26  ;;  %3299 = vmatprep.subr.bf16.mxu1 %v7974_v7  ;;  %v8064_v26 = vld [vmem:[#allocation5 + $0xab4] ss:$40 sps:$4 sm:$0xff]  }
 0x13b   :  { %3385 = vmatprep.subr.bf16.mxu0 %v7977_v6  ;;  %v8067_v7 = vld [vmem:[#allocation5 + $0xbc] ss:$40 sps:$4 sm:$0xff]  }
 0x13c   :  { %v8908_v6 = vld [vmem:[#allocation2 + $0x14] ss:$24 sps:$4 sm:$0xff]  }
 0x13d   :  { %3300 = vmatpush1.bf16.msra.mxu1 %v7972_v27  ;;  %v9242_v27 = vld [vmem:[#allocation2 + $0x4] ss:$24 sps:$4 sm:$0xff]  }
 0x13e   :  { %3386 = vmatpush1.bf16.msra.mxu0 %v7975_v28  ;;  %3301 = vmatprep.subr.bf16.mxu1 %v7980_v49  ;;  %v8062_v28 = vld [vmem:[#allocation5 + $0xab0] ss:$40 sps:$4 sm:$0xff]   ;;  %v8070_v49 = vld [vmem:[#allocation5 + $0xb04] ss:$40 sps:$4 sm:$0xff]  }
 0x13f   :  { %3387 = vmatprep.subr.bf16.mxu0 %v7983_v33  ;;  %v8073_v33 = vld [vmem:[#allocation5 + $0x10c] ss:$40 sps:$4 sm:$0xff]  }
 0x141   :  { %3302 = vmatpush1.bf16.msra.mxu1 %v7978_v48  ;;  %v8068_v48 = vld [vmem:[#allocation5 + $0xb00] ss:$40 sps:$4 sm:$0xff]  }
 0x142   :  { %3388 = vmatpush1.bf16.msra.mxu0 %v7981_v29  ;;  %3303 = vmatprep.subr.bf16.mxu1 %v7986_v30  ;;  %v8071_v29 = vld [vmem:[#allocation5 + $0x108] ss:$40 sps:$4 sm:$0xff]   ;;  %v8076_v30 = vld [vmem:[#allocation5 + $0xb54] ss:$40 sps:$4 sm:$0xff]  }
 0x143   :  { %3389 = vmatprep.subr.bf16.mxu0 %v7989_v31  ;;  %v8079_v31 = vld [vmem:[#allocation5 + $0x15c] ss:$40 sps:$4 sm:$0xff]  }
 0x145   :  { %3304 = vmatpush1.bf16.msra.mxu1 %v7984_v32  ;;  %v8074_v32 = vld [vmem:[#allocation5 + $0xb50] ss:$40 sps:$4 sm:$0xff]  }
 0x146   :  { %3390 = vmatpush1.bf16.msra.mxu0 %v7987_v34  ;;  %3305 = vmatprep.subr.bf16.mxu1 %v7992_v35  ;;  %v8077_v34 = vld [vmem:[#allocation5 + $0x158] ss:$40 sps:$4 sm:$0xff]   ;;  %v8082_v35 = vld [vmem:[#allocation5 + $0xba4] ss:$40 sps:$4 sm:$0xff]  }
 0x147   :  { %3391 = vmatprep.subr.bf16.mxu0 %v7995_v36  ;;  %v8085_v36 = vld [vmem:[#allocation5 + $0x1ac] ss:$40 sps:$4 sm:$0xff]  }
 0x149   :  { %3306 = vmatpush1.bf16.msra.mxu1 %v7990_v37  ;;  %v8080_v37 = vld [vmem:[#allocation5 + $0xba0] ss:$40 sps:$4 sm:$0xff]  }
 0x14a   :  { %3392 = vmatpush1.bf16.msra.mxu0 %v7993_v38  ;;  %3307 = vmatprep.subr.bf16.mxu1 %v7998_v39  ;;  %v8083_v38 = vld [vmem:[#allocation5 + $0x1a8] ss:$40 sps:$4 sm:$0xff]   ;;  %v8088_v39 = vld [vmem:[#allocation5 + $0xbf4] ss:$40 sps:$4 sm:$0xff]  }
 0x14b   :  { %3393 = vmatprep.subr.bf16.mxu0 %v8001_v40  ;;  %v8091_v40 = vld [vmem:[#allocation5 + $0x1fc] ss:$40 sps:$4 sm:$0xff]  }
 0x14d   :  { %3308 = vmatpush1.bf16.msra.mxu1 %v7996_v41 }
 0x14e   :  { %3394 = vmatpush1.bf16.msra.mxu0 %v7999_v42  ;;  %3309 = vmatprep.subr.bf16.mxu1 %v8004_v43  ;;  %v8086_v43 = vld [vmem:[#allocation5 + $0xbf0] ss:$40 sps:$4 sm:$0xff]  }
 0x14f   :  { %3395 = vmatprep.subr.bf16.mxu0 %v8007_v44  ;;  %v8089_v44 = vld [vmem:[#allocation5 + $0x1f8] ss:$40 sps:$4 sm:$0xff]  }
 0x151   :  { %3310 = vmatpush1.bf16.msra.mxu1 %v8002_v45 }
 0x152   :  { %3396 = vmatpush1.bf16.msra.mxu0 %v8005_v46  ;;  %3311 = vmatprep.subr.bf16.mxu1 %v8010_v47  ;;  %v8094_v46 = vld [vmem:[#allocation5 + $0xc44] ss:$40 sps:$4 sm:$0xff]  }
 0x153   :  { %3397 = vmatprep.subr.bf16.mxu0 %v8013_v50  ;;  %v8097_v47 = vld [vmem:[#allocation5 + $0x24c] ss:$40 sps:$4 sm:$0xff]  }
 0x155   :  { %3312 = vmatpush1.bf16.msra.mxu1 %v8008_v51  ;;  %v8092_v51 = vld [vmem:[#allocation5 + $0xc40] ss:$40 sps:$4 sm:$0xff]  }
 0x156   :  { %3398 = vmatpush1.bf16.msra.mxu0 %v8011_v52  ;;  %3313 = vmatprep.subr.bf16.mxu1 %v8016_v53  ;;  %v8095_v52 = vld [vmem:[#allocation5 + $0x248] ss:$40 sps:$4 sm:$0xff]   ;;  %v8100_v53 = vld [vmem:[#allocation5 + $0xc94] ss:$40 sps:$4 sm:$0xff]  }
 0x157   :  { %3399 = vmatprep.subr.bf16.mxu0 %v8019_v54  ;;  %v8103_v54 = vld [vmem:[#allocation5 + $0x29c] ss:$40 sps:$4 sm:$0xff]  }
 0x159   :  { %3314 = vmatpush1.bf16.msra.mxu1 %v8014_v55  ;;  %v8098_v55 = vld [vmem:[#allocation5 + $0xc90] ss:$40 sps:$4 sm:$0xff]  }
 0x15a   :  { %3400 = vmatpush1.bf16.msra.mxu0 %v8017_v56  ;;  %3315 = vmatprep.subr.bf16.mxu1 %v8022_v57  ;;  %v8101_v56 = vld [vmem:[#allocation5 + $0x298] ss:$40 sps:$4 sm:$0xff]   ;;  %v8106_v57 = vld [vmem:[#allocation5 + $0xce4] ss:$40 sps:$4 sm:$0xff]  }
 0x15b   :  { %3401 = vmatprep.subr.bf16.mxu0 %v8025_v58  ;;  %v8109_v58 = vld [vmem:[#allocation5 + $0x2ec] ss:$40 sps:$4 sm:$0xff]  }
 0x15d   :  { %3316 = vmatpush1.bf16.msra.mxu1 %v8020_v59  ;;  %v8104_v59 = vld [vmem:[#allocation5 + $0xce0] ss:$40 sps:$4 sm:$0xff]  }
 0x15e   :  { %3402 = vmatpush1.bf16.msra.mxu0 %v8023_v60  ;;  %3317 = vmatprep.subr.bf16.mxu1 %v8028_v61  ;;  %v8107_v60 = vld [vmem:[#allocation5 + $0x2e8] ss:$40 sps:$4 sm:$0xff]   ;;  %v8112_v61 = vld [vmem:[#allocation5 + $0xd34] ss:$40 sps:$4 sm:$0xff]  }
 0x15f   :  { %3403 = vmatprep.subr.bf16.mxu0 %v8031_v62  ;;  %v8115_v62 = vld [vmem:[#allocation5 + $0x33c] ss:$40 sps:$4 sm:$0xff]  }
 0x161   :  { %3318 = vmatpush1.bf16.msra.mxu1 %v8026_v63  ;;  %v8110_v63 = vld [vmem:[#allocation5 + $0xd30] ss:$40 sps:$4 sm:$0xff]  }
 0x162   :  { %3404 = vmatpush1.bf16.msra.mxu0 %v8029_v0  ;;  %3319 = vmatprep.subr.bf16.mxu1 %v8034_v1  ;;  %v8113_v0 = vld [vmem:[#allocation5 + $0x338] ss:$40 sps:$4 sm:$0xff]   ;;  %v8118_v1 = vld [vmem:[#allocation5 + $0xd84] ss:$40 sps:$4 sm:$0xff]  }
 0x163   :  { %3405 = vmatprep.subr.bf16.mxu0 %v8037_v2  ;;  %v8121_v2 = vld [vmem:[#allocation5 + $0x38c] ss:$40 sps:$4 sm:$0xff]  }
 0x165   :  { %3320 = vmatpush1.bf16.msra.mxu1 %v8032_v3  ;;  %v8116_v3 = vld [vmem:[#allocation5 + $0xd80] ss:$40 sps:$4 sm:$0xff]  }
 0x166   :  { %3406 = vmatpush1.bf16.msra.mxu0 %v8035_v4  ;;  %3321 = vmatprep.subr.bf16.mxu1 %v8040_v5  ;;  %v8119_v4 = vld [vmem:[#allocation5 + $0x388] ss:$40 sps:$4 sm:$0xff]   ;;  %v8124_v5 = vld [vmem:[#allocation5 + $0xdd4] ss:$40 sps:$4 sm:$0xff]  }
 0x167   :  { %3407 = vmatprep.subr.bf16.mxu0 %v8043_v8  ;;  %v8127_v8 = vld [vmem:[#allocation5 + $0x3dc] ss:$40 sps:$4 sm:$0xff]  }
 0x169   :  { %3322 = vmatpush1.bf16.msra.mxu1 %v8038_v9  ;;  %v8122_v9 = vld [vmem:[#allocation5 + $0xdd0] ss:$40 sps:$4 sm:$0xff]  }
 0x16a   :  { %3408 = vmatpush1.bf16.msra.mxu0 %v8041_v10  ;;  %3323 = vmatprep.subr.bf16.mxu1 %v8046_v12  ;;  %v8125_v10 = vld [vmem:[#allocation5 + $0x3d8] ss:$40 sps:$4 sm:$0xff]   ;;  %v8130_v12 = vld [vmem:[#allocation5 + $0xe24] ss:$40 sps:$4 sm:$0xff]  }
 0x16b   :  { %3409 = vmatprep.subr.bf16.mxu0 %v8049_v13  ;;  %v8133_v13 = vld [vmem:[#allocation5 + $0x42c] ss:$40 sps:$4 sm:$0xff]  }
 0x16d   :  { %3324 = vmatpush1.bf16.msra.mxu1 %v8044_v14  ;;  %v8128_v14 = vld [vmem:[#allocation5 + $0xe20] ss:$40 sps:$4 sm:$0xff]  }
 0x16e   :  { %3410 = vmatpush1.bf16.msra.mxu0 %v8047_v15  ;;  %3465 = vmatprep.subr.bf16.mxu1 %v8055_v17  ;;  %v8131_v15 = vld [vmem:[#allocation5 + $0x428] ss:$40 sps:$4 sm:$0xff]   ;;  %v8139_v17 = vld [vmem:[#allocation5 + $0x47c] ss:$40 sps:$4 sm:$0xff]  }
 0x16f   :  { %3422 = vmatprep.subr.bf16.mxu0 %v8052_v16  ;;  %v8136_v16 = vld [vmem:[#allocation5 + $0xe74] ss:$40 sps:$4 sm:$0xff]  }
 0x170   :  { %3326 = vmatmul.mubr.bf16.vlgmr.msra.gmra.mrb[4].mxu1 %v9229_v11  ;;  %v8065_v11 = vld [vmem:[#allocation5 + $0xb8] ss:$40 sps:$4 sm:$0xff]  }
 0x171   :  { %3412 = vmatmul.mubr.bf16.vlgmr.msra.gmra.mrb[4].mxu0 %v8907_v22  ;;  %3466 = vmatpush1.bf16.msra.mxu1 %v8053_v19  ;;  %v8137_v19 = vld [vmem:[#allocation5 + $0x478] ss:$40 sps:$4 sm:$0xff]  }
 0x172   :  { %3423 = vmatpush1.bf16.msra.mxu0 %v8050_v18  ;;  %3467 = vmatprep.subr.bf16.mxu1 %v8061_v21  ;;  %v8134_v18 = vld [vmem:[#allocation5 + $0xe70] ss:$40 sps:$4 sm:$0xff]   ;;  %v8145_v21 = vld [vmem:[#allocation5 + $0x4cc] ss:$40 sps:$4 sm:$0xff]   ;;  %v8140_v22 = vld [vmem:[#allocation5 + $0xec0] ss:$40 sps:$4 sm:$0xff]  }
 0x173   :  { %3424 = vmatprep.subr.bf16.mxu0 %v8058_v20  ;;  %3454 = vmatprep.mubr.bf16.mxu0 %v8908_v6  ;;  %v8142_v20 = vld [vmem:[#allocation5 + $0xec4] ss:$40 sps:$4 sm:$0xff]   ;;  %v8149_v6 = vld [vmem:[#allocation5 + $0x20] ss:$40 sps:$4 sm:$0xff]  }
 0x174   :  { %3497 = vmatprep.mubr.bf16.mxu1 %v9242_v27 }
 0x175   :  { %3468 = vmatpush1.bf16.msra.mxu1 %v8059_v25  ;;  %v8148_v25 = vld [vmem:[#allocation5 + $0x51c] ss:$40 sps:$4 sm:$0xff]  }
 0x176   :  { %3425 = vmatpush1.bf16.msra.mxu0 %v8056_v23  ;;  %3469 = vmatprep.subr.bf16.mxu1 %v8067_v7  ;;  %v8143_v23 = vld [vmem:[#allocation5 + $0x4c8] ss:$40 sps:$4 sm:$0xff]   ;;  %v8146_v7 = vld [vmem:[#allocation5 + $0x518] ss:$40 sps:$4 sm:$0xff]  }
 0x177   :  { %3426 = vmatprep.subr.bf16.mxu0 %v8064_v26  ;;  %v8151_v26 = vld [vmem:[#allocation5 + $0x24] ss:$40 sps:$4 sm:$0xff]  }
 0x179   :  { %3470 = vmatpush1.bf16.msra.mxu1 %v8065_v11  ;;  %v8157_v11 = vld [vmem:[#allocation5 + $0x74] ss:$40 sps:$4 sm:$0xff]  }
 0x17a   :  { %3427 = vmatpush1.bf16.msra.mxu0 %v8062_v28  ;;  %3471 = vmatprep.subr.bf16.mxu1 %v8073_v33  ;;  %v8154_v28 = vld [vmem:[#allocation5 + $0x56c] ss:$40 sps:$4 sm:$0xff]   ;;  %v8155_v33 = vld [vmem:[#allocation5 + $0x70] ss:$40 sps:$4 sm:$0xff]  }
 0x17b   :  { %3428 = vmatprep.subr.bf16.mxu0 %v8070_v49  ;;  %v8152_v49 = vld [vmem:[#allocation5 + $0x568] ss:$40 sps:$4 sm:$0xff]  }
 0x17d   :  { %3472 = vmatpush1.bf16.msra.mxu1 %v8071_v29  ;;  %v9253_v29 = vld [vmem:[#allocation2] ss:$24 sps:$4 sm:$0xff]  }
 0x17e   :  { %3429 = vmatpush1.bf16.msra.mxu0 %v8068_v48  ;;  %3473 = vmatprep.subr.bf16.mxu1 %v8079_v31  ;;  %v8910_v48 = vld [vmem:[#allocation2 + $0x10] ss:$24 sps:$4 sm:$0xff]   ;;  %v8160_v31 = vld [vmem:[#allocation5 + $0x5bc] ss:$40 sps:$4 sm:$0xff]  }
 0x17f   :  { %3430 = vmatprep.subr.bf16.mxu0 %v8076_v30  ;;  %v598_v30 = vlaneseq }
 0x181   :  { %3474 = vmatpush1.bf16.msra.mxu1 %v8077_v34  ;;  %v8158_v34 = vld [vmem:[#allocation5 + $0x5b8] ss:$40 sps:$4 sm:$0xff]  }
 0x182   :  { %3431 = vmatpush1.bf16.msra.mxu0 %v8074_v32  ;;  %3475 = vmatprep.subr.bf16.mxu1 %v8085_v36  ;;  %v8163_v32 = vld [vmem:[#allocation5 + $0xc4] ss:$40 sps:$4 sm:$0xff]   ;;  %v9258_v36 = vshrl.u32 %v598_v30, 7  ;;  %v8218_v30 = vld [vmem:[#allocation5 + $0x8d8] ss:$40 sps:$4 sm:$0xff]  }
 0x183   :  { %3432 = vmatprep.subr.bf16.mxu0 %v8082_v35  ;;  %v9245_v41 = vpop.f32.mrb[0].mxu1  ;;  %v8161_v35 = vld [vmem:[#allocation5 + $0xc0] ss:$40 sps:$4 sm:$0xff]  }
 0x184   :  { %v9247_v42 = vpop.f32.mrb[1].mxu1 }
 0x185   :  { %3476 = vmatpush1.bf16.msra.mxu1 %v8083_v38  ;;  %v9249_v45 = vpop.f32.mrb[2].mxu1  ;;  %v8169_v38 = vld [vmem:[#allocation5 + $0x114] ss:$40 sps:$4 sm:$0xff]  }
 0x186   :  { %3433 = vmatpush1.bf16.msra.mxu0 %v8080_v37  ;;  %3477 = vmatprep.subr.bf16.mxu1 %v8091_v40  ;;  %v9251_v50 = vpop.f32.mrb[3].mxu1  ;;  %v8166_v37 = vld [vmem:[#allocation5 + $0x60c] ss:$40 sps:$4 sm:$0xff]   ;;  %v8164_v40 = vld [vmem:[#allocation5 + $0x608] ss:$40 sps:$4 sm:$0xff]  }
 0x187   :  { %3434 = vmatprep.subr.bf16.mxu0 %v8088_v39  ;;  %v105_v39 = vld [vmem:[#allocation11] sm:$0xff] }
 0x189   :  { %3478 = vmatpush1.bf16.msra.mxu1 %v8089_v44  ;;  %v9261_v44 = vsub.s32 0, %v9258_v36 }
 0x18a   :  { %3435 = vmatpush1.bf16.msra.mxu0 %v8086_v43  ;;  %3479 = vmatprep.subr.bf16.mxu1 %v8097_v47  ;;  %v8167_v43 = vld [vmem:[#allocation5 + $0x110] ss:$40 sps:$4 sm:$0xff]  }
 0x18b   :  { %3436 = vmatprep.subr.bf16.mxu0 %v8094_v46  ;;  %v9264_v46 = vsub.s32 1, %v9258_v36  ;;  %v8170_v47 = vld [vmem:[#allocation5 + $0x658] ss:$40 sps:$4 sm:$0xff]  }
 0x18d   :  { %3480 = vmatpush1.bf16.msra.mxu1 %v8095_v52  ;;  %v601_v52 = vrot.slane %v105_v39, %v9261_v44 }
 0x18e   :  { %3437 = vmatpush1.bf16.msra.mxu0 %v8092_v51  ;;  %3481 = vmatprep.subr.bf16.mxu1 %v8103_v54  ;;  %v8173_v51 = vld [vmem:[#allocation5 + $0x160] ss:$40 sps:$4 sm:$0xff]   ;;  %v8181_v54 = vld [vmem:[#allocation5 + $0x1b4] ss:$40 sps:$4 sm:$0xff]  }
 0x18f   :  { %3438 = vmatprep.subr.bf16.mxu0 %v8100_v53  ;;  %v8178_v53 = vld [vmem:[#allocation5 + $0x6ac] ss:$40 sps:$4 sm:$0xff]  }
 0x191   :  { %3482 = vmatpush1.bf16.msra.mxu1 %v8101_v56  ;;  %v8176_v56 = vld [vmem:[#allocation5 + $0x6a8] ss:$40 sps:$4 sm:$0xff]  }
 0x192   :  { %3439 = vmatpush1.bf16.msra.mxu0 %v8098_v55  ;;  %3483 = vmatprep.subr.bf16.mxu1 %v8109_v58  ;;  %v605_v55 = vrot.slane %v105_v39, %v9264_v46  ;;  %v8184_v58 = vld [vmem:[#allocation5 + $0x6fc] ss:$40 sps:$4 sm:$0xff]  }
 0x193   :  { %3440 = vmatprep.subr.bf16.mxu0 %v8106_v57  ;;  %v8179_v57 = vld [vmem:[#allocation5 + $0x1b0] ss:$40 sps:$4 sm:$0xff]   ;;  %v8235_v39 = vld [vmem:[#allocation5 + $0x484] ss:$40 sps:$4 sm:$0xff]  }
 0x195   :  { %3484 = vmatpush1.bf16.msra.mxu1 %v8107_v60  ;;  %v3113_v60 = vadd.f32 %v9245_v41, %v601_v52 }
 0x196   :  { %3441 = vmatpush1.bf16.msra.mxu0 %v8104_v59  ;;  %3485 = vmatprep.subr.bf16.mxu1 %v8115_v62  ;;  %v8187_v59 = vld [vmem:[#allocation5 + $0x204] ss:$40 sps:$4 sm:$0xff]  }
 0x197   :  { %3442 = vmatprep.subr.bf16.mxu0 %v8112_v61  ;;  %v3115_v61 = vadd.f32 %v9247_v42, %v605_v55 }
 0x199   :  { %3486 = vmatpush1.bf16.msra.mxu1 %v8113_v0  ;;  %v8185_v0 = vld [vmem:[#allocation5 + $0x200] ss:$40 sps:$4 sm:$0xff]  }
 0x19a   :  { %3443 = vmatpush1.bf16.msra.mxu0 %v8110_v63  ;;  %3487 = vmatprep.subr.bf16.mxu1 %v8121_v2  ;;  %v8182_v63 = vld [vmem:[#allocation5 + $0x6f8] ss:$40 sps:$4 sm:$0xff]  }
 0x19b   :  { %3444 = vmatprep.subr.bf16.mxu0 %v8118_v1  ;;  %v3117_v1 = vadd.f32 %v9249_v45, %v601_v52  ;;  %v8244_v52 = vld [vmem:[#allocation5 + $0xa1c] ss:$40 sps:$4 sm:$0xff]  }
 0x19d   :  { %3488 = vmatpush1.bf16.msra.mxu1 %v8119_v4  ;;  %v8190_v4 = vld [vmem:[#allocation5 + $0x74c] ss:$40 sps:$4 sm:$0xff]  }
 0x19e   :  { %3445 = vmatpush1.bf16.msra.mxu0 %v8116_v3  ;;  %3489 = vmatprep.subr.bf16.mxu1 %v8127_v8  ;;  %v3119_v8 = vadd.f32 %v9251_v50, %v605_v55  ;;  %v8245_v55 = vld [vmem:[#allocation5 + $0x520] ss:$40 sps:$4 sm:$0xff]  }
 0x19f   :  { %3446 = vmatprep.subr.bf16.mxu0 %v8124_v5  ;;  %v8193_v5 = vld [vmem:[#allocation5 + $0x254] ss:$40 sps:$4 sm:$0xff]  }
 0x1a1   :  { %3490 = vmatpush1.bf16.msra.mxu1 %v8125_v10 }
 0x1a2   :  { %3447 = vmatpush1.bf16.msra.mxu0 %v8122_v9  ;;  %3491 = vmatprep.subr.bf16.mxu1 %v8133_v13  ;;  %v8188_v13 = vld [vmem:[#allocation5 + $0x748] ss:$40 sps:$4 sm:$0xff]  }
 0x1a3   :  { %3448 = vmatprep.subr.bf16.mxu0 %v8130_v12 }
 0x1a5   :  { %3492 = vmatpush1.bf16.msra.mxu1 %v8131_v15  ;;  %v8196_v15 = vld [vmem:[#allocation5 + $0x79c] ss:$40 sps:$4 sm:$0xff]  }
 0x1a6   :  { %3449 = vmatpush1.bf16.msra.mxu0 %v8128_v14  ;;  %3493 = vmatprep.subr.bf16.mxu1 %v8139_v17  ;;  %v8191_v14 = vld [vmem:[#allocation5 + $0x250] ss:$40 sps:$4 sm:$0xff]  }
 0x1a7   :  { %3450 = vmatprep.subr.bf16.mxu0 %v8136_v16  ;;  %v8199_v16 = vld [vmem:[#allocation5 + $0x2a4] ss:$40 sps:$4 sm:$0xff]   ;;  %v8194_v17 = vld [vmem:[#allocation5 + $0x798] ss:$40 sps:$4 sm:$0xff]  }
 0x1a9   :  { %3494 = vmatpush1.bf16.msra.mxu1 %v8137_v19  ;;  %v8202_v19 = vld [vmem:[#allocation5 + $0x7ec] ss:$40 sps:$4 sm:$0xff]  }
 0x1aa   :  { %3451 = vmatpush1.bf16.msra.mxu0 %v8134_v18  ;;  %3495 = vmatprep.subr.bf16.mxu1 %v8145_v21  ;;  %v8197_v18 = vld [vmem:[#allocation5 + $0x2a0] ss:$40 sps:$4 sm:$0xff]  }
 0x1ab   :  { %3452 = vmatprep.subr.bf16.mxu0 %v8142_v20  ;;  %v8205_v20 = vld [vmem:[#allocation5 + $0x2f4] ss:$40 sps:$4 sm:$0xff]   ;;  %v8200_v21 = vld [vmem:[#allocation5 + $0x7e8] ss:$40 sps:$4 sm:$0xff]  }
 0x1ad   :  { %3496 = vmatpush1.bf16.msra.mxu1 %v8143_v23  ;;  %v8208_v23 = vld [vmem:[#allocation5 + $0x83c] ss:$40 sps:$4 sm:$0xff]  }
 0x1ae   :  { %3453 = vmatpush1.bf16.msra.mxu0 %v8140_v22  ;;  %3508 = vmatprep.subr.bf16.mxu1 %v8148_v25  ;;  %v8203_v22 = vld [vmem:[#allocation5 + $0x2f0] ss:$40 sps:$4 sm:$0xff]   ;;  %v8211_v25 = vld [vmem:[#allocation5 + $0x344] ss:$40 sps:$4 sm:$0xff]  }
 0x1af   :  { %3594 = vmatprep.subr.bf16.mxu0 %v8151_v26  ;;  %v8206_v26 = vld [vmem:[#allocation5 + $0x838] ss:$40 sps:$4 sm:$0xff]  }
 0x1b0   :  { %3498 = vmatmul.mubr.bf16.vlgmr.msra.gmra.mrb[8].mxu1 %v9253_v29 }
 0x1b1   :  { %3455 = vmatmul.mubr.bf16.vlgmr.msra.gmra.mrb[4].mxu0 %v8910_v48  ;;  %3509 = vmatpush1.bf16.msra.mxu1 %v8146_v7  ;;  %v8209_v7 = vld [vmem:[#allocation5 + $0x340] ss:$40 sps:$4 sm:$0xff]   ;;  %v8223_v48 = vld [vmem:[#allocation5 + $0x3e4] ss:$40 sps:$4 sm:$0xff]  }
 0x1b2   :  { %3595 = vmatpush1.bf16.msra.mxu0 %v8149_v6  ;;  %3510 = vmatprep.subr.bf16.mxu1 %v8154_v28  ;;  %v8214_v6 = vld [vmem:[#allocation5 + $0x88c] ss:$40 sps:$4 sm:$0xff]  }
 0x1b3   :  { %3596 = vmatprep.subr.bf16.mxu0 %v8157_v11  ;;  %3540 = vmatprep.mubr.bf16.mxu1 %v9238_v24  ;;  %v8172_v24 = vld [vmem:[#allocation5 + $0x65c] ss:$40 sps:$4 sm:$0xff]   ;;  %v8212_v11 = vld [vmem:[#allocation5 + $0x888] ss:$40 sps:$4 sm:$0xff]  }
 0x1b4   :  { %3626 = vmatprep.mubr.bf16.mxu0 %v9242_v27  ;;  %v8175_v27 = vld [vmem:[#allocation5 + $0x164] ss:$40 sps:$4 sm:$0xff]   ;;  %v8217_v28 = vld [vmem:[#allocation5 + $0x394] ss:$40 sps:$4 sm:$0xff]  }
 0x1b5   :  { %3511 = vmatpush1.bf16.msra.mxu1 %v8152_v49  ;;  %v8215_v49 = vld [vmem:[#allocation5 + $0x390] ss:$40 sps:$4 sm:$0xff]  }
 0x1b6   :  { %3597 = vmatpush1.bf16.msra.mxu0 %v8155_v33  ;;  %3512 = vmatprep.subr.bf16.mxu1 %v8160_v31  ;;  %v8220_v33 = vld [vmem:[#allocation5 + $0x8dc] ss:$40 sps:$4 sm:$0xff]   ;;  %v8221_v31 = vld [vmem:[#allocation5 + $0x3e0] ss:$40 sps:$4 sm:$0xff]  }
 0x1b7   :  { %3598 = vmatprep.subr.bf16.mxu0 %v8163_v32  ;;  %v8226_v32 = vld [vmem:[#allocation5 + $0x92c] ss:$40 sps:$4 sm:$0xff]  }
 0x1b9   :  { %3513 = vmatpush1.bf16.msra.mxu1 %v8158_v34  ;;  %v8229_v34 = vld [vmem:[#allocation5 + $0x434] ss:$40 sps:$4 sm:$0xff]  }
 0x1ba   :  { %3599 = vmatpush1.bf16.msra.mxu0 %v8161_v35  ;;  %3514 = vmatprep.subr.bf16.mxu1 %v8166_v37  ;;  %v8224_v35 = vld [vmem:[#allocation5 + $0x928] ss:$40 sps:$4 sm:$0xff]  }
 0x1bb   :  { %3600 = vmatprep.subr.bf16.mxu0 %v8169_v38  ;;  %v8227_v37 = vld [vmem:[#allocation5 + $0x430] ss:$40 sps:$4 sm:$0xff]   ;;  %v8232_v38 = vld [vmem:[#allocation5 + $0x97c] ss:$40 sps:$4 sm:$0xff]  }
 0x1bd   :  { %3515 = vmatpush1.bf16.msra.mxu1 %v8164_v40  ;;  %v8230_v40 = vld [vmem:[#allocation5 + $0x978] ss:$40 sps:$4 sm:$0xff]  }
 0x1be   :  { %3601 = vmatpush1.bf16.msra.mxu0 %v8167_v43  ;;  %3516 = vmatprep.subr.bf16.mxu1 %v8172_v24  ;;  %v8233_v43 = vld [vmem:[#allocation5 + $0x480] ss:$40 sps:$4 sm:$0xff]   ;;  %v8238_v24 = vld [vmem:[#allocation5 + $0x9cc] ss:$40 sps:$4 sm:$0xff]  }
 0x1bf   :  { %3602 = vmatprep.subr.bf16.mxu0 %v8175_v27  ;;  %v8241_v27 = vld [vmem:[#allocation5 + $0x4d4] ss:$40 sps:$4 sm:$0xff]  }
 0x1c1   :  { %3517 = vmatpush1.bf16.msra.mxu1 %v8170_v47  ;;  %v8236_v47 = vld [vmem:[#allocation5 + $0x9c8] ss:$40 sps:$4 sm:$0xff]  }
 0x1c2   :  { %3603 = vmatpush1.bf16.msra.mxu0 %v8173_v51  ;;  %3518 = vmatprep.subr.bf16.mxu1 %v8178_v53  ;;  %v8239_v51 = vld [vmem:[#allocation5 + $0x4d0] ss:$40 sps:$4 sm:$0xff]   ;;  %v8247_v53 = vld [vmem:[#allocation5 + $0x524] ss:$40 sps:$4 sm:$0xff]  }
 0x1c3   :  { %3604 = vmatprep.subr.bf16.mxu0 %v8181_v54  ;;  %v8242_v54 = vld [vmem:[#allocation5 + $0xa18] ss:$40 sps:$4 sm:$0xff]  }
 0x1c4   :  { %v3198_v62 = vpop.f32.mrb[0].mxu0 }
 0x1c5   :  { %v9271_v2 = vadd.f32 %v3198_v62, %v3113_v60  ;;  %v3200_v3 = vpop.f32.mrb[1].mxu0  ;;  %3519 = vmatpush1.bf16.msra.mxu1 %v8176_v56  ;;  %v8250_v56 = vld [vmem:[#allocation5 + $0xa6c] ss:$40 sps:$4 sm:$0xff]   ;;  %v8251_v60 = vld [vmem:[#allocation5 + $0x570] ss:$40 sps:$4 sm:$0xff]  }
 0x1c6   :  { %v9274_v9 = vadd.f32 %v3200_v3, %v3115_v61  ;;  %v3202_v10 = vpop.f32.mrb[2].mxu0  ;;  %3605 = vmatpush1.bf16.msra.mxu0 %v8179_v57  ;;  %3520 = vmatprep.subr.bf16.mxu1 %v8184_v58  ;;  %v8253_v57 = vld [vmem:[#allocation5 + $0x574] ss:$40 sps:$4 sm:$0xff]   ;;  %v9284_v58 = vld [vmem:[#allocation2 + $0x8] ss:$24 sps:$4 sm:$0xff]  }
 0x1c7   :  { %v9276_v41 = vadd.f32 %v3202_v10, %v3117_v1  ;;  %v3204_v42 = vpop.f32.mrb[3].mxu0  ;;  %3606 = vmatprep.subr.bf16.mxu0 %v8187_v59  ;;  %v8248_v59 = vld [vmem:[#allocation5 + $0xa68] ss:$40 sps:$4 sm:$0xff]   ;;  %v8256_v61 = vld [vmem:[#allocation5 + $0xabc] ss:$40 sps:$4 sm:$0xff]  }
 0x1c8   :  { %v9278_v12 = vadd.f32 %v3204_v42, %v3119_v8  ;;  %v8259_v62 = vld [vmem:[#allocation5 + $0x5c4] ss:$40 sps:$4 sm:$0xff]   ;;  %v8914_v3 = vld [vmem:[#allocation2 + $0xc] ss:$24 sps:$4 sm:$0xff]   ;;  %v8263_v8 = vld [vmem:[#allocation5 + $0x610] ss:$40 sps:$4 sm:$0xff]  }
 0x1c9   :  { %v3723_v45 = vpack.c.bf16 %v9276_v41, %v9271_v2  ;;  %3521 = vmatpush1.bf16.msra.mxu1 %v8182_v63  ;;  %v8254_v63 = vld [vmem:[#allocation5 + $0xab8] ss:$40 sps:$4 sm:$0xff]   ;;  %v9288_v1 = vld [vmem:[#allocation2 + $0x14] ss:$24 sps:$4 sm:$0xff]  }
 0x1ca   :  { %v3724_v50 = vpack.c.bf16 %v9278_v12, %v9274_v9  ;;  %3607 = vmatpush1.bf16.msra.mxu0 %v8185_v0  ;;  %3522 = vmatprep.subr.bf16.mxu1 %v8190_v4  ;;  %v8257_v0 = vld [vmem:[#allocation5 + $0x5c0] ss:$40 sps:$4 sm:$0xff]   ;;  %v8265_v4 = vld [vmem:[#allocation5 + $0x614] ss:$40 sps:$4 sm:$0xff]   ;;  %v8271_v42 = vld [vmem:[#allocation5 + $0x664] ss:$40 sps:$4 sm:$0xff]  }
 0x1cb   :  { %3608 = vmatprep.subr.bf16.mxu0 %v8193_v5  ;;  %v8260_v5 = vld [vmem:[#allocation5 + $0xb08] ss:$40 sps:$4 sm:$0xff]   ;;  %v8268_v10 = vld [vmem:[#allocation5 + $0xb5c] ss:$40 sps:$4 sm:$0xff]  }
 0x1cc   :  { %v8358_v9 = vld [vmem:[#allocation5 + $0xb14] ss:$40 sps:$4 sm:$0xff]   ;;  %v8440_v2 = vld [vmem:[#allocation7 + $0x220] ss:$16 sps:$4 sm:$0xff]   ;;  %v8443_v41 = vld [vmem:[#allocation7 + $0x28] ss:$16 sps:$4 sm:$0xff]  }
 0x1cd   :  { %3523 = vmatpush1.bf16.msra.mxu1 %v8188_v13  ;;  %v8266_v13 = vld [vmem:[#allocation5 + $0xb58] ss:$40 sps:$4 sm:$0xff]   ;;  %v8361_v12 = vld [vmem:[#allocation7 + $0x64] ss:$16 sps:$4 sm:$0xff]  }
 0x1ce   :  { %3609 = vmatpush1.bf16.msra.mxu0 %v8191_v14  ;;  %3524 = vmatprep.subr.bf16.mxu1 %v8196_v15  ;;  %v8269_v14 = vld [vmem:[#allocation5 + $0x660] ss:$40 sps:$4 sm:$0xff]   ;;  %v8274_v15 = vld [vmem:[#allocation5 + $0xbac] ss:$40 sps:$4 sm:$0xff]  }
 0x1cf   :  { %3610 = vmatprep.subr.bf16.mxu0 %v8199_v16  ;;  %v8277_v16 = vld [vmem:[#allocation5 + $0x6b4] ss:$40 sps:$4 sm:$0xff]  }
 0x1d1   :  { %3525 = vmatpush1.bf16.msra.mxu1 %v8194_v17  ;;  %v8272_v17 = vld [vmem:[#allocation5 + $0xba8] ss:$40 sps:$4 sm:$0xff]  }
 0x1d2   :  { %3611 = vmatpush1.bf16.msra.mxu0 %v8197_v18  ;;  %3526 = vmatprep.subr.bf16.mxu1 %v8202_v19  ;;  %v8275_v18 = vld [vmem:[#allocation5 + $0x6b0] ss:$40 sps:$4 sm:$0xff]   ;;  %v8280_v19 = vld [vmem:[#allocation5 + $0xbfc] ss:$40 sps:$4 sm:$0xff]  }
 0x1d3   :  { %3612 = vmatprep.subr.bf16.mxu0 %v8205_v20  ;;  %v8283_v20 = vld [vmem:[#allocation5 + $0x704] ss:$40 sps:$4 sm:$0xff]  }
 0x1d5   :  { %3527 = vmatpush1.bf16.msra.mxu1 %v8200_v21  ;;  %v8278_v21 = vld [vmem:[#allocation5 + $0xbf8] ss:$40 sps:$4 sm:$0xff]  }
 0x1d6   :  { %3613 = vmatpush1.bf16.msra.mxu0 %v8203_v22  ;;  %3528 = vmatprep.subr.bf16.mxu1 %v8208_v23  ;;  %v8281_v22 = vld [vmem:[#allocation5 + $0x700] ss:$40 sps:$4 sm:$0xff]   ;;  %v8286_v23 = vld [vmem:[#allocation5 + $0xc4c] ss:$40 sps:$4 sm:$0xff]  }
 0x1d7   :  { %3614 = vmatprep.subr.bf16.mxu0 %v8211_v25  ;;  %v8289_v25 = vld [vmem:[#allocation5 + $0x754] ss:$40 sps:$4 sm:$0xff]  }
 0x1d9   :  { %3529 = vmatpush1.bf16.msra.mxu1 %v8206_v26  ;;  %v8284_v26 = vld [vmem:[#allocation5 + $0xc48] ss:$40 sps:$4 sm:$0xff]  }
 0x1da   :  { %3615 = vmatpush1.bf16.msra.mxu0 %v8209_v7  ;;  %3530 = vmatprep.subr.bf16.mxu1 %v8214_v6  ;;  %v8287_v7 = vld [vmem:[#allocation5 + $0x750] ss:$40 sps:$4 sm:$0xff]   ;;  %v8292_v6 = vld [vmem:[#allocation5 + $0xc9c] ss:$40 sps:$4 sm:$0xff]  }
 0x1db   :  { %3616 = vmatprep.subr.bf16.mxu0 %v8217_v28  ;;  %v8295_v28 = vld [vmem:[#allocation5 + $0x7a4] ss:$40 sps:$4 sm:$0xff]  }
 0x1dd   :  { %3531 = vmatpush1.bf16.msra.mxu1 %v8212_v11  ;;  %v8290_v11 = vld [vmem:[#allocation5 + $0xc98] ss:$40 sps:$4 sm:$0xff]  }
 0x1de   :  { %3617 = vmatpush1.bf16.msra.mxu0 %v8215_v49  ;;  %3532 = vmatprep.subr.bf16.mxu1 %v8220_v33  ;;  %v8293_v49 = vld [vmem:[#allocation5 + $0x7a0] ss:$40 sps:$4 sm:$0xff]   ;;  %v8298_v33 = vld [vmem:[#allocation5 + $0xcec] ss:$40 sps:$4 sm:$0xff]  }
 0x1df   :  { %3618 = vmatprep.subr.bf16.mxu0 %v8223_v48  ;;  %v8301_v48 = vld [vmem:[#allocation5 + $0x7f4] ss:$40 sps:$4 sm:$0xff]  }
 0x1e1   :  { %3533 = vmatpush1.bf16.msra.mxu1 %v8218_v30  ;;  %v8296_v30 = vld [vmem:[#allocation5 + $0xce8] ss:$40 sps:$4 sm:$0xff]  }
 0x1e2   :  { %3619 = vmatpush1.bf16.msra.mxu0 %v8221_v31  ;;  %3534 = vmatprep.subr.bf16.mxu1 %v8226_v32  ;;  %v8299_v31 = vld [vmem:[#allocation5 + $0x7f0] ss:$40 sps:$4 sm:$0xff]   ;;  %v8304_v32 = vld [vmem:[#allocation5 + $0xd3c] ss:$40 sps:$4 sm:$0xff]  }
 0x1e3   :  { %3620 = vmatprep.subr.bf16.mxu0 %v8229_v34  ;;  %v8307_v34 = vld [vmem:[#allocation5 + $0x844] ss:$40 sps:$4 sm:$0xff]  }
 0x1e5   :  { %3535 = vmatpush1.bf16.msra.mxu1 %v8224_v35  ;;  %v8302_v35 = vld [vmem:[#allocation5 + $0xd38] ss:$40 sps:$4 sm:$0xff]  }
 0x1e6   :  { %3621 = vmatpush1.bf16.msra.mxu0 %v8227_v37  ;;  %3536 = vmatprep.subr.bf16.mxu1 %v8232_v38  ;;  %v8305_v37 = vld [vmem:[#allocation5 + $0x840] ss:$40 sps:$4 sm:$0xff]   ;;  %v8310_v38 = vld [vmem:[#allocation5 + $0xd8c] ss:$40 sps:$4 sm:$0xff]  }
 0x1e7   :  { %3622 = vmatprep.subr.bf16.mxu0 %v8235_v39  ;;  %v8313_v39 = vld [vmem:[#allocation5 + $0x894] ss:$40 sps:$4 sm:$0xff]  }
 0x1e9   :  { %3537 = vmatpush1.bf16.msra.mxu1 %v8230_v40  ;;  %v8308_v40 = vld [vmem:[#allocation5 + $0xd88] ss:$40 sps:$4 sm:$0xff]  }
 0x1ea   :  { %3623 = vmatpush1.bf16.msra.mxu0 %v8233_v43  ;;  %3538 = vmatprep.subr.bf16.mxu1 %v8238_v24  ;;  %v8311_v43 = vld [vmem:[#allocation5 + $0x890] ss:$40 sps:$4 sm:$0xff]   ;;  %v8316_v24 = vld [vmem:[#allocation5 + $0xddc] ss:$40 sps:$4 sm:$0xff]  }
 0x1eb   :  { %3624 = vmatprep.subr.bf16.mxu0 %v8241_v27  ;;  %v8319_v27 = vld [vmem:[#allocation5 + $0x8e4] ss:$40 sps:$4 sm:$0xff]  }
 0x1ed   :  { %3539 = vmatpush1.bf16.msra.mxu1 %v8236_v47  ;;  %v8314_v47 = vld [vmem:[#allocation5 + $0xdd8] ss:$40 sps:$4 sm:$0xff]  }
 0x1ee   :  { %3625 = vmatpush1.bf16.msra.mxu0 %v8239_v51  ;;  %3551 = vmatprep.subr.bf16.mxu1 %v8244_v52  ;;  %v8317_v51 = vld [vmem:[#allocation5 + $0x8e0] ss:$40 sps:$4 sm:$0xff]   ;;  %v8322_v52 = vld [vmem:[#allocation5 + $0xe2c] ss:$40 sps:$4 sm:$0xff]  }
 0x1ef   :  { %3637 = vmatprep.subr.bf16.mxu0 %v8247_v53  ;;  %v8325_v53 = vld [vmem:[#allocation5 + $0x934] ss:$40 sps:$4 sm:$0xff]  }
 0x1f0   :  { %3541 = vmatmul.mubr.bf16.vlgmr.msra.gmra.mrb[8].mxu1 %v9284_v58 }
 0x1f1   :  { %3627 = vmatmul.mubr.bf16.vlgmr.msra.gmra.mrb[8].mxu0 %v9253_v29  ;;  %3552 = vmatpush1.bf16.msra.mxu1 %v8242_v54  ;;  %v8262_v29 = vld [vmem:[#allocation5 + $0xb0c] ss:$40 sps:$4 sm:$0xff]   ;;  %v8320_v54 = vld [vmem:[#allocation5 + $0xe28] ss:$40 sps:$4 sm:$0xff]  }
 0x1f2   :  { %3638 = vmatpush1.bf16.msra.mxu0 %v8245_v55  ;;  %3553 = vmatprep.subr.bf16.mxu1 %v8250_v56  ;;  %v8323_v55 = vld [vmem:[#allocation5 + $0x930] ss:$40 sps:$4 sm:$0xff]   ;;  %v8328_v56 = vld [vmem:[#allocation5 + $0xe7c] ss:$40 sps:$4 sm:$0xff]  }
 0x1f3   :  { %3639 = vmatprep.subr.bf16.mxu0 %v8253_v57  ;;  %3583 = vmatprep.mubr.bf16.mxu1 %v9288_v1  ;;  %v8331_v57 = vld [vmem:[#allocation5 + $0x984] ss:$40 sps:$4 sm:$0xff]  }
 0x1f4   :  { %3669 = vmatprep.mubr.bf16.mxu0 %v8914_v3  ;;  %v8340_v3 = vld [vmem:[#allocation5 + $0xa24] ss:$40 sps:$4 sm:$0xff]  }
 0x1f5   :  { %3554 = vmatpush1.bf16.msra.mxu1 %v8248_v59  ;;  %v8326_v59 = vld [vmem:[#allocation5 + $0xe78] ss:$40 sps:$4 sm:$0xff]  }
 0x1f6   :  { %3640 = vmatpush1.bf16.msra.mxu0 %v8251_v60  ;;  %3555 = vmatprep.subr.bf16.mxu1 %v8256_v61  ;;  %v8329_v60 = vld [vmem:[#allocation5 + $0x980] ss:$40 sps:$4 sm:$0xff]   ;;  %v8334_v61 = vld [vmem:[#allocation5 + $0xecc] ss:$40 sps:$4 sm:$0xff]  }
 0x1f7   :  { %3641 = vmatprep.subr.bf16.mxu0 %v8259_v62  ;;  %v8337_v62 = vld [vmem:[#allocation5 + $0x9d4] ss:$40 sps:$4 sm:$0xff]  }
 0x1f9   :  { %3556 = vmatpush1.bf16.msra.mxu1 %v8254_v63  ;;  %v8332_v63 = vld [vmem:[#allocation5 + $0xec8] ss:$40 sps:$4 sm:$0xff]  }
 0x1fa   :  { %3642 = vmatpush1.bf16.msra.mxu0 %v8257_v0  ;;  %3557 = vmatprep.subr.bf16.mxu1 %v8262_v29  ;;  %v8335_v0 = vld [vmem:[#allocation5 + $0x9d0] ss:$40 sps:$4 sm:$0xff]   ;;  %v8343_v29 = vld [vmem:[#allocation7 + $0x4] ss:$16 sps:$4 sm:$0xff]  }
 0x1fb   :  { %3643 = vmatprep.subr.bf16.mxu0 %v8265_v4  ;;  %v8338_v4 = vld [vmem:[#allocation5 + $0xa20] ss:$40 sps:$4 sm:$0xff]  }
 0x1fd   :  { %3558 = vmatpush1.bf16.msra.mxu1 %v8260_v5  ;;  %v8341_v5 = vld [vmem:[#allocation7] ss:$16 sps:$4 sm:$0xff]  }
 0x1fe   :  { %3644 = vmatpush1.bf16.msra.mxu0 %v8263_v8  ;;  %3559 = vmatprep.subr.bf16.mxu1 %v8268_v10  ;;  %v8346_v8 = vld [vmem:[#allocation5 + $0xa74] ss:$40 sps:$4 sm:$0xff]   ;;  %v8344_v10 = vld [vmem:[#allocation5 + $0xa70] ss:$40 sps:$4 sm:$0xff]  }
 0x1ff   :  { %3645 = vmatprep.subr.bf16.mxu0 %v8271_v42  ;;  %v8347_v42 = vld [vmem:[#allocation7 + $0x20] ss:$16 sps:$4 sm:$0xff]  }
 0x201   :  { %3560 = vmatpush1.bf16.msra.mxu1 %v8266_v13  ;;  %v8349_v13 = vld [vmem:[#allocation7 + $0x24] ss:$16 sps:$4 sm:$0xff]  }
 0x202   :  { %3646 = vmatpush1.bf16.msra.mxu0 %v8269_v14  ;;  %3561 = vmatprep.subr.bf16.mxu1 %v8274_v15  ;;  %v9291_v14 = vld [vmem:[#allocation2 + $0x10] ss:$24 sps:$4 sm:$0xff]   ;;  %v9096_v15 = vmov 0  }
 0x203   :  { %3647 = vmatprep.subr.bf16.mxu0 %v8277_v16  ;;  %v9299_v16 = vmax.bf16 %v9096_v15, %v3724_v50  ;;  %v8356_v50 = vld [vmem:[#allocation5 + $0xb10] ss:$40 sps:$4 sm:$0xff]  }
 0x205   :  { %3562 = vmatpush1.bf16.msra.mxu1 %v8272_v17  ;;  %v8352_v17 = vld [vmem:[#allocation5 + $0xac4] ss:$40 sps:$4 sm:$0xff]  }
 0x206   :  { %3648 = vmatpush1.bf16.msra.mxu0 %v8275_v18  ;;  %3563 = vmatprep.subr.bf16.mxu1 %v8280_v19  ;;  %v8355_v18 = vld [vmem:[#allocation7 + $0x44] ss:$16 sps:$4 sm:$0xff]   ;;  %v8350_v19 = vld [vmem:[#allocation5 + $0xac0] ss:$40 sps:$4 sm:$0xff]  }
 0x207   :  { %3649 = vmatprep.subr.bf16.mxu0 %v8283_v20  ;;  %v8353_v20 = vld [vmem:[#allocation7 + $0x40] ss:$16 sps:$4 sm:$0xff]  }
 0x209   :  { %3564 = vmatpush1.bf16.msra.mxu1 %v8278_v21  ;;  %v8364_v21 = vld [vmem:[#allocation5 + $0xb64] ss:$40 sps:$4 sm:$0xff]  }
 0x20a   :  { %3650 = vmatpush1.bf16.msra.mxu0 %v8281_v22  ;;  %3565 = vmatprep.subr.bf16.mxu1 %v8286_v23  ;;  %v8367_v22 = vld [vmem:[#allocation7 + $0x84] ss:$16 sps:$4 sm:$0xff]   ;;  %v8362_v23 = vld [vmem:[#allocation5 + $0xb60] ss:$40 sps:$4 sm:$0xff]  }
 0x20b   :  { %3651 = vmatprep.subr.bf16.mxu0 %v8289_v25  ;;  %v8365_v25 = vld [vmem:[#allocation7 + $0x80] ss:$16 sps:$4 sm:$0xff]  }
 0x20d   :  { %3566 = vmatpush1.bf16.msra.mxu1 %v8284_v26  ;;  %v8370_v26 = vld [vmem:[#allocation5 + $0xbb4] ss:$40 sps:$4 sm:$0xff]  }
 0x20e   :  { %3652 = vmatpush1.bf16.msra.mxu0 %v8287_v7  ;;  %3567 = vmatprep.subr.bf16.mxu1 %v8292_v6  ;;  %v8373_v7 = vld [vmem:[#allocation7 + $0xa4] ss:$16 sps:$4 sm:$0xff]   ;;  %v612_v6 = vsub.s32 3, %v9258_v36 }
 0x20f   :  { %3653 = vmatprep.subr.bf16.mxu0 %v8295_v28  ;;  %v8368_v28 = vld [vmem:[#allocation5 + $0xbb0] ss:$40 sps:$4 sm:$0xff]  }
 0x211   :  { %3568 = vmatpush1.bf16.msra.mxu1 %v8290_v11  ;;  %v8371_v11 = vld [vmem:[#allocation7 + $0xa0] ss:$16 sps:$4 sm:$0xff]  }
 0x212   :  { %3654 = vmatpush1.bf16.msra.mxu0 %v8293_v49  ;;  %3569 = vmatprep.subr.bf16.mxu1 %v8298_v33  ;;  %v9305_v49 = vld [vmem:[#allocation11] sm:$0xff] }
 0x213   :  { %3655 = vmatprep.subr.bf16.mxu0 %v8301_v48  ;;  %v8376_v48 = vld [vmem:[#allocation5 + $0xc04] ss:$40 sps:$4 sm:$0xff]  }
 0x215   :  { %3570 = vmatpush1.bf16.msra.mxu1 %v8296_v30  ;;  %v8379_v30 = vld [vmem:[#allocation7 + $0xc4] ss:$16 sps:$4 sm:$0xff]  }
 0x216   :  { %3656 = vmatpush1.bf16.msra.mxu0 %v8299_v31  ;;  %3571 = vmatprep.subr.bf16.mxu1 %v8304_v32  ;;  %v613_v32 = vrot.slane %v9305_v49, %v612_v6 }
 0x217   :  { %3657 = vmatprep.subr.bf16.mxu0 %v8307_v34  ;;  %v8374_v34 = vld [vmem:[#allocation5 + $0xc00] ss:$40 sps:$4 sm:$0xff]  }
 0x219   :  { %3572 = vmatpush1.bf16.msra.mxu1 %v8302_v35  ;;  %v8377_v35 = vld [vmem:[#allocation7 + $0xc0] ss:$16 sps:$4 sm:$0xff]  }
 0x21a   :  { %3658 = vmatpush1.bf16.msra.mxu0 %v8305_v37  ;;  %3573 = vmatprep.subr.bf16.mxu1 %v8310_v38 }
 0x21b   :  { %3659 = vmatprep.subr.bf16.mxu0 %v8313_v39 }
 0x21d   :  { %3574 = vmatpush1.bf16.msra.mxu1 %v8308_v40 }
 0x21e   :  { %3660 = vmatpush1.bf16.msra.mxu0 %v8311_v43  ;;  %3575 = vmatprep.subr.bf16.mxu1 %v8316_v24  ;;  %v8382_v24 = vld [vmem:[#allocation5 + $0xc54] ss:$40 sps:$4 sm:$0xff]  }
 0x21f   :  { %3661 = vmatprep.subr.bf16.mxu0 %v8319_v27  ;;  %v8385_v27 = vld [vmem:[#allocation7 + $0xe4] ss:$16 sps:$4 sm:$0xff]  }
 0x221   :  { %3576 = vmatpush1.bf16.msra.mxu1 %v8314_v47 }
 0x222   :  { %3662 = vmatpush1.bf16.msra.mxu0 %v8317_v51  ;;  %3577 = vmatprep.subr.bf16.mxu1 %v8322_v52  ;;  %v8380_v52 = vld [vmem:[#allocation5 + $0xc50] ss:$40 sps:$4 sm:$0xff]  }
 0x223   :  { %3663 = vmatprep.subr.bf16.mxu0 %v8325_v53  ;;  %v8383_v53 = vld [vmem:[#allocation7 + $0xe0] ss:$16 sps:$4 sm:$0xff]  }
 0x225   :  { %3578 = vmatpush1.bf16.msra.mxu1 %v8320_v54 }
 0x226   :  { %3664 = vmatpush1.bf16.msra.mxu0 %v8323_v55  ;;  %3579 = vmatprep.subr.bf16.mxu1 %v8328_v56  ;;  %v8388_v56 = vld [vmem:[#allocation5 + $0xca4] ss:$40 sps:$4 sm:$0xff]  }
 0x227   :  { %3665 = vmatprep.subr.bf16.mxu0 %v8331_v57  ;;  %v8391_v57 = vld [vmem:[#allocation7 + $0x104] ss:$16 sps:$4 sm:$0xff]  }
 0x229   :  { %3580 = vmatpush1.bf16.msra.mxu1 %v8326_v59  ;;  %v8386_v59 = vld [vmem:[#allocation5 + $0xca0] ss:$40 sps:$4 sm:$0xff]  }
 0x22a   :  { %3666 = vmatpush1.bf16.msra.mxu0 %v8329_v60  ;;  %3581 = vmatprep.subr.bf16.mxu1 %v8334_v61  ;;  %v8389_v60 = vld [vmem:[#allocation7 + $0x100] ss:$16 sps:$4 sm:$0xff]   ;;  %v8394_v61 = vld [vmem:[#allocation5 + $0xcf4] ss:$40 sps:$4 sm:$0xff]  }
 0x22b   :  { %3667 = vmatprep.subr.bf16.mxu0 %v8337_v62  ;;  %v8397_v62 = vld [vmem:[#allocation7 + $0x124] ss:$16 sps:$4 sm:$0xff]  }
 0x22d   :  { %3582 = vmatpush1.bf16.msra.mxu1 %v8332_v63  ;;  %v8392_v63 = vld [vmem:[#allocation5 + $0xcf0] ss:$40 sps:$4 sm:$0xff]  }
 0x22e   :  { %3668 = vmatpush1.bf16.msra.mxu0 %v8335_v0  ;;  %5684 = vmatprep.subr.bf16.mxu1 %v8343_v29  ;;  %v8395_v0 = vld [vmem:[#allocation7 + $0x120] ss:$16 sps:$4 sm:$0xff]   ;;  %v8403_v29 = vld [vmem:[#allocation7 + $0x144] ss:$16 sps:$4 sm:$0xff]  }
 0x22f   :  { %3680 = vmatprep.subr.bf16.mxu0 %v8340_v3  ;;  %v8400_v3 = vld [vmem:[#allocation5 + $0xd44] ss:$40 sps:$4 sm:$0xff]  }
 0x230   :  { %3584 = vmatmul.mubr.bf16.vlgmr.msra.gmra.mrb[8].mxu1 %v9291_v14 }
 0x231   :  { %3670 = vmatmul.mubr.bf16.vlgmr.msra.gmra.mrb[8].mxu0 %v9284_v58  ;;  %5685 = vmatpush1.bf16.msra.mxu1 %v8341_v5  ;;  %v8359_v58 = vld [vmem:[#allocation7 + $0x60] ss:$16 sps:$4 sm:$0xff]  }
 0x232   :  { %3681 = vmatpush1.bf16.msra.mxu0 %v8338_v4  ;;  %5716 = vmatprep.mubr.bf16.mxu1 %v9299_v16  ;;  %v8398_v4 = vld [vmem:[#allocation5 + $0xd40] ss:$40 sps:$4 sm:$0xff]  }
 0x233   :  { %3682 = vmatprep.subr.bf16.mxu0 %v8346_v8  ;;  %5686 = vmatprep.subr.bf16.mxu1 %v8349_v13  ;;  %v8401_v5 = vld [vmem:[#allocation7 + $0x140] ss:$16 sps:$4 sm:$0xff]   ;;  %v8406_v8 = vld [vmem:[#allocation5 + $0xd94] ss:$40 sps:$4 sm:$0xff]  }
 0x234   :  { %3712 = vmatprep.mubr.bf16.mxu0 %v9288_v1  ;;  %v608_v1 = vsub.s32 2, %v9258_v36  ;;  %v8407_v13 = vld [vmem:[#allocation7 + $0x160] ss:$16 sps:$4 sm:$0xff]  }
 0x235   :  { %5687 = vmatpush1.bf16.msra.mxu1 %v8347_v42  ;;  %v8404_v42 = vld [vmem:[#allocation5 + $0xd90] ss:$40 sps:$4 sm:$0xff]  }
 0x236   :  { %3683 = vmatpush1.bf16.msra.mxu0 %v8344_v10  ;;  %5688 = vmatprep.subr.bf16.mxu1 %v8355_v18  ;;  %v609_v33 = vrot.slane %v9305_v49, %v608_v1  ;;  %v8409_v10 = vld [vmem:[#allocation7 + $0x164] ss:$16 sps:$4 sm:$0xff]  }
 0x237   :  { %3684 = vmatprep.subr.bf16.mxu0 %v8352_v17  ;;  %v8412_v17 = vld [vmem:[#allocation5 + $0xde4] ss:$40 sps:$4 sm:$0xff]  }
 0x238   :  { %v8415_v18 = vld [vmem:[#allocation7 + $0x184] ss:$16 sps:$4 sm:$0xff]  }
 0x239   :  { %5689 = vmatpush1.bf16.msra.mxu1 %v8353_v20  ;;  %v8413_v20 = vld [vmem:[#allocation7 + $0x180] ss:$16 sps:$4 sm:$0xff]  }
 0x23a   :  { %3685 = vmatpush1.bf16.msra.mxu0 %v8350_v19  ;;  %5690 = vmatprep.subr.bf16.mxu1 %v8361_v12  ;;  %v8410_v19 = vld [vmem:[#allocation5 + $0xde0] ss:$40 sps:$4 sm:$0xff]   ;;  %v8421_v12 = vld [vmem:[#allocation7 + $0x1a4] ss:$16 sps:$4 sm:$0xff]  }
 0x23b   :  { %3686 = vmatprep.subr.bf16.mxu0 %v8358_v9  ;;  %v8418_v9 = vld [vmem:[#allocation5 + $0xe34] ss:$40 sps:$4 sm:$0xff]  }
 0x23d   :  { %5691 = vmatpush1.bf16.msra.mxu1 %v8359_v58  ;;  %v8419_v58 = vld [vmem:[#allocation7 + $0x1a0] ss:$16 sps:$4 sm:$0xff]  }
 0x23e   :  { %3687 = vmatpush1.bf16.msra.mxu0 %v8356_v50  ;;  %5692 = vmatprep.subr.bf16.mxu1 %v8367_v22  ;;  %v8416_v50 = vld [vmem:[#allocation5 + $0xe30] ss:$40 sps:$4 sm:$0xff]   ;;  %v8427_v22 = vld [vmem:[#allocation7 + $0x1c4] ss:$16 sps:$4 sm:$0xff]  }
 0x23f   :  { %3688 = vmatprep.subr.bf16.mxu0 %v8364_v21  ;;  %v8424_v21 = vld [vmem:[#allocation5 + $0xe84] ss:$40 sps:$4 sm:$0xff]  }
 0x241   :  { %5693 = vmatpush1.bf16.msra.mxu1 %v8365_v25  ;;  %v8425_v25 = vld [vmem:[#allocation7 + $0x1c0] ss:$16 sps:$4 sm:$0xff]  }
 0x242   :  { %3689 = vmatpush1.bf16.msra.mxu0 %v8362_v23  ;;  %5694 = vmatprep.subr.bf16.mxu1 %v8373_v7  ;;  %v8422_v23 = vld [vmem:[#allocation5 + $0xe80] ss:$40 sps:$4 sm:$0xff]   ;;  %v8433_v7 = vld [vmem:[#allocation7 + $0x1e4] ss:$16 sps:$4 sm:$0xff]  }
 0x243   :  { %3690 = vmatprep.subr.bf16.mxu0 %v8370_v26  ;;  %v3327_v31 = vpop.f32.mrb[4].mxu1  ;;  %v8430_v26 = vld [vmem:[#allocation5 + $0xed4] ss:$40 sps:$4 sm:$0xff]  }
 0x244   :  { %v3329_v37 = vpop.f32.mrb[5].mxu1  ;;  %v9313_v39 = vadd.f32 %v3327_v31, %v609_v33  ;;  %v9329_v31 = vmax.bf16 %v9096_v15, %v3723_v45  ;;  %v8448_v45 = vld [vmem:[#allocation7 + $0x244] ss:$16 sps:$4 sm:$0xff]  }
 0x245   :  { %v3331_v38 = vpop.f32.mrb[6].mxu1  ;;  %5695 = vmatpush1.bf16.msra.mxu1 %v8371_v11  ;;  %v9317_v47 = vadd.f32 %v3329_v37, %v613_v32  ;;  %v8431_v11 = vld [vmem:[#allocation7 + $0x1e0] ss:$16 sps:$4 sm:$0xff]   ;;  %v8445_v37 = vld [vmem:[#allocation7 + $0x2c] ss:$16 sps:$4 sm:$0xff]  }
 0x246   :  { %3691 = vmatpush1.bf16.msra.mxu0 %v8368_v28  ;;  %v9315_v40 = vadd.f32 %v3331_v38, %v609_v33  ;;  %v3333_v43 = vpop.f32.mrb[7].mxu1  ;;  %5696 = vmatprep.subr.bf16.mxu1 %v8379_v30  ;;  %v8428_v28 = vld [vmem:[#allocation5 + $0xed0] ss:$40 sps:$4 sm:$0xff]   ;;  %v8436_v33 = vld [vmem:[#allocation7 + $0x204] ss:$16 sps:$4 sm:$0xff]  }
 0x247   :  { %3692 = vmatprep.subr.bf16.mxu0 %v8376_v48  ;;  %v9319_v51 = vadd.f32 %v3333_v43, %v613_v32  ;;  %v8439_v48 = vld [vmem:[#allocation7 + $0xc] ss:$16 sps:$4 sm:$0xff]   ;;  %v8434_v30 = vld [vmem:[#allocation7 + $0x200] ss:$16 sps:$4 sm:$0xff]   ;;  %v8437_v32 = vld [vmem:[#allocation7 + $0x8] ss:$16 sps:$4 sm:$0xff]  }
 0x248   :  { %v3725_v54 = vpack.c.bf16 %v9315_v40, %v9313_v39  ;;  %v8451_v38 = vld [vmem:[#allocation7 + $0x4c] ss:$16 sps:$4 sm:$0xff]   ;;  %v8446_v43 = vld [vmem:[#allocation7 + $0x240] ss:$16 sps:$4 sm:$0xff]   ;;  %v8539_v40 = vld [vmem:[#allocation7 + $0x228] ss:$16 sps:$4 sm:$0xff]  }
 0x249   :  { %v3726_v55 = vpack.c.bf16 %v9319_v51, %v9317_v47  ;;  %5697 = vmatpush1.bf16.msra.mxu1 %v8377_v35  ;;  %v8442_v35 = vld [vmem:[#allocation7 + $0x224] ss:$16 sps:$4 sm:$0xff]   ;;  %v8452_v47 = vld [vmem:[#allocation7 + $0x260] ss:$16 sps:$4 sm:$0xff]   ;;  %v8455_v51 = vld [vmem:[#allocation7 + $0x68] ss:$16 sps:$4 sm:$0xff]  }
 0x24a   :  { %3693 = vmatpush1.bf16.msra.mxu0 %v8374_v34  ;;  %5698 = vmatprep.subr.bf16.mxu1 %v8385_v27  ;;  %v8457_v27 = vld [vmem:[#allocation7 + $0x6c] ss:$16 sps:$4 sm:$0xff]   ;;  %v8536_v39 = vld [vmem:[#allocation7 + $0x420] ss:$16 sps:$4 sm:$0xff]  }
 0x24b   :  { %3694 = vmatprep.subr.bf16.mxu0 %v8382_v24  ;;  %v9335_v34 = vmax.bf16 %v9096_v15, %v3726_v55  ;;  %v8449_v24 = vld [vmem:[#allocation7 + $0x48] ss:$16 sps:$4 sm:$0xff]  }
 0x24c   :  { %v8461_v55 = vld [vmem:[#allocation7 + $0x88] ss:$16 sps:$4 sm:$0xff]  }
 0x24d   :  { %5699 = vmatpush1.bf16.msra.mxu1 %v8383_v53  ;;  %v8458_v53 = vld [vmem:[#allocation7 + $0x280] ss:$16 sps:$4 sm:$0xff]  }
 0x24e   :  { %3695 = vmatpush1.bf16.msra.mxu0 %v8380_v52  ;;  %5700 = vmatprep.subr.bf16.mxu1 %v8391_v57  ;;  %v8460_v52 = vld [vmem:[#allocation7 + $0x284] ss:$16 sps:$4 sm:$0xff]  }
 0x24f   :  { %3696 = vmatprep.subr.bf16.mxu0 %v8388_v56  ;;  %v616_v56 = vsub.s32 4, %v9258_v36  ;;  %v8466_v57 = vld [vmem:[#allocation7 + $0x2a4] ss:$16 sps:$4 sm:$0xff]  }
 0x251   :  { %5701 = vmatpush1.bf16.msra.mxu1 %v8389_v60  ;;  %v8469_v60 = vld [vmem:[#allocation7 + $0xac] ss:$16 sps:$4 sm:$0xff]  }
 0x252   :  { %3697 = vmatpush1.bf16.msra.mxu0 %v8386_v59  ;;  %5702 = vmatprep.subr.bf16.mxu1 %v8397_v62  ;;  %v620_v59 = vsub.s32 5, %v9258_v36  ;;  %v617_v62 = vrot.slane %v9305_v49, %v616_v56  ;;  %v8518_v56 = vld [vmem:[#allocation7 + $0x3c0] ss:$16 sps:$4 sm:$0xff]  }
 0x253   :  { %3698 = vmatprep.subr.bf16.mxu0 %v8394_v61  ;;  %v8464_v61 = vld [vmem:[#allocation7 + $0x2a0] ss:$16 sps:$4 sm:$0xff]  }
 0x255   :  { %5703 = vmatpush1.bf16.msra.mxu1 %v8395_v0  ;;  %v8472_v0 = vld [vmem:[#allocation7 + $0x2c4] ss:$16 sps:$4 sm:$0xff]  }
 0x256   :  { %3699 = vmatpush1.bf16.msra.mxu0 %v8392_v63  ;;  %5704 = vmatprep.subr.bf16.mxu1 %v8403_v29  ;;  %v8467_v63 = vld [vmem:[#allocation7 + $0xa8] ss:$16 sps:$4 sm:$0xff]   ;;  %v621_v29 = vrot.slane %v9305_v49, %v620_v59  ;;  %v8526_v59 = vld [vmem:[#allocation7 + $0x3e4] ss:$16 sps:$4 sm:$0xff]  }
 0x257   :  { %3700 = vmatprep.subr.bf16.mxu0 %v8400_v3 }
 0x259   :  { %5705 = vmatpush1.bf16.msra.mxu1 %v8401_v5 }
 0x25a   :  { %3701 = vmatpush1.bf16.msra.mxu0 %v8398_v4  ;;  %5706 = vmatprep.subr.bf16.mxu1 %v8409_v10  ;;  %v8475_v4 = vld [vmem:[#allocation7 + $0xcc] ss:$16 sps:$4 sm:$0xff]   ;;  %v8470_v10 = vld [vmem:[#allocation7 + $0x2c0] ss:$16 sps:$4 sm:$0xff]  }
 0x25b   :  { %3702 = vmatprep.subr.bf16.mxu0 %v8406_v8 }
 0x25d   :  { %5707 = vmatpush1.bf16.msra.mxu1 %v8407_v13 }
 0x25e   :  { %3703 = vmatpush1.bf16.msra.mxu0 %v8404_v42  ;;  %5708 = vmatprep.subr.bf16.mxu1 %v8415_v18  ;;  %v8473_v18 = vld [vmem:[#allocation7 + $0xc8] ss:$16 sps:$4 sm:$0xff]  }
 0x25f   :  { %3704 = vmatprep.subr.bf16.mxu0 %v8412_v17 }
 0x261   :  { %5709 = vmatpush1.bf16.msra.mxu1 %v8413_v20 }
 0x262   :  { %3705 = vmatpush1.bf16.msra.mxu0 %v8410_v19  ;;  %5710 = vmatprep.subr.bf16.mxu1 %v8421_v12  ;;  %v8478_v19 = vld [vmem:[#allocation7 + $0x2e4] ss:$16 sps:$4 sm:$0xff]   ;;  %v8481_v12 = vld [vmem:[#allocation7 + $0xec] ss:$16 sps:$4 sm:$0xff]  }
 0x263   :  { %3706 = vmatprep.subr.bf16.mxu0 %v8418_v9 }
 0x265   :  { %5711 = vmatpush1.bf16.msra.mxu1 %v8419_v58 }
 0x266   :  { %3707 = vmatpush1.bf16.msra.mxu0 %v8416_v50  ;;  %5712 = vmatprep.subr.bf16.mxu1 %v8427_v22  ;;  %v8479_v22 = vld [vmem:[#allocation7 + $0xe8] ss:$16 sps:$4 sm:$0xff]  }
 0x267   :  { %3708 = vmatprep.subr.bf16.mxu0 %v8424_v21  ;;  %v8476_v21 = vld [vmem:[#allocation7 + $0x2e0] ss:$16 sps:$4 sm:$0xff]  }
 0x269   :  { %5713 = vmatpush1.bf16.msra.mxu1 %v8425_v25  ;;  %v8487_v25 = vld [vmem:[#allocation7 + $0x10c] ss:$16 sps:$4 sm:$0xff]  }
 0x26a   :  { %3709 = vmatpush1.bf16.msra.mxu0 %v8422_v23  ;;  %5714 = vmatprep.subr.bf16.mxu1 %v8433_v7  ;;  %v8484_v23 = vld [vmem:[#allocation7 + $0x304] ss:$16 sps:$4 sm:$0xff]   ;;  %v8485_v7 = vld [vmem:[#allocation7 + $0x108] ss:$16 sps:$4 sm:$0xff]  }
 0x26b   :  { %3710 = vmatprep.subr.bf16.mxu0 %v8430_v26  ;;  %v8482_v26 = vld [vmem:[#allocation7 + $0x300] ss:$16 sps:$4 sm:$0xff]  }
 0x26d   :  { %5715 = vmatpush1.bf16.msra.mxu1 %v8431_v11  ;;  %v8493_v11 = vld [vmem:[#allocation7 + $0x12c] ss:$16 sps:$4 sm:$0xff]  }
 0x26e   :  { %3711 = vmatpush1.bf16.msra.mxu0 %v8428_v28  ;;  %5727 = vmatprep.subr.bf16.mxu1 %v8436_v33  ;;  %v8490_v28 = vld [vmem:[#allocation7 + $0x324] ss:$16 sps:$4 sm:$0xff]   ;;  %v8488_v33 = vld [vmem:[#allocation7 + $0x320] ss:$16 sps:$4 sm:$0xff]  }
 0x26f   :  { %5899 = vmatprep.subr.bf16.mxu0 %v8439_v48  ;;  %v8491_v48 = vld [vmem:[#allocation7 + $0x128] ss:$16 sps:$4 sm:$0xff]  }
 0x270   :  { %5717 = vmatmul.mubr.bf16.vlgmr.msra.gmra.mrb[12].mxu1 %v9329_v31 }
 0x271   :  { %3713 = vmatmul.mubr.bf16.vlgmr.msra.gmra.mrb[8].mxu0 %v9291_v14  ;;  %5728 = vmatpush1.bf16.msra.mxu1 %v8434_v30  ;;  %v8454_v14 = vld [vmem:[#allocation7 + $0x264] ss:$16 sps:$4 sm:$0xff]  }
 0x272   :  { %5759 = vmatprep.mubr.bf16.mxu1 %v9335_v34  ;;  %5900 = vmatpush1.bf16.msra.mxu0 %v8437_v32  ;;  %v8496_v30 = vld [vmem:[#allocation7 + $0x344] ss:$16 sps:$4 sm:$0xff]   ;;  %v8499_v32 = vld [vmem:[#allocation7 + $0x14c] ss:$16 sps:$4 sm:$0xff]  }
 0x273   :  { %5931 = vmatprep.mubr.bf16.mxu0 %v9299_v16  ;;  %5729 = vmatprep.subr.bf16.mxu1 %v8442_v35  ;;  %v8463_v16 = vld [vmem:[#allocation7 + $0x8c] ss:$16 sps:$4 sm:$0xff]   ;;  %v8494_v35 = vld [vmem:[#allocation7 + $0x340] ss:$16 sps:$4 sm:$0xff]  }
 0x274   :  { %5901 = vmatprep.subr.bf16.mxu0 %v8445_v37  ;;  %v8497_v37 = vld [vmem:[#allocation7 + $0x148] ss:$16 sps:$4 sm:$0xff]  }
 0x275   :  { %5730 = vmatpush1.bf16.msra.mxu1 %v8440_v2  ;;  %v8502_v2 = vld [vmem:[#allocation7 + $0x364] ss:$16 sps:$4 sm:$0xff]  }
 0x276   :  { %5902 = vmatpush1.bf16.msra.mxu0 %v8443_v41  ;;  %5731 = vmatprep.subr.bf16.mxu1 %v8448_v45  ;;  %v8505_v41 = vld [vmem:[#allocation7 + $0x16c] ss:$16 sps:$4 sm:$0xff]   ;;  %v8500_v45 = vld [vmem:[#allocation7 + $0x360] ss:$16 sps:$4 sm:$0xff]  }
 0x277   :  { %5903 = vmatprep.subr.bf16.mxu0 %v8451_v38  ;;  %v8503_v38 = vld [vmem:[#allocation7 + $0x168] ss:$16 sps:$4 sm:$0xff]  }
 0x279   :  { %5732 = vmatpush1.bf16.msra.mxu1 %v8446_v43  ;;  %v8508_v43 = vld [vmem:[#allocation7 + $0x384] ss:$16 sps:$4 sm:$0xff]  }
 0x27a   :  { %5904 = vmatpush1.bf16.msra.mxu0 %v8449_v24  ;;  %5733 = vmatprep.subr.bf16.mxu1 %v8454_v14  ;;  %v8511_v24 = vld [vmem:[#allocation7 + $0x18c] ss:$16 sps:$4 sm:$0xff]   ;;  %v8506_v14 = vld [vmem:[#allocation7 + $0x380] ss:$16 sps:$4 sm:$0xff]  }
 0x27b   :  { %5905 = vmatprep.subr.bf16.mxu0 %v8457_v27  ;;  %v8509_v27 = vld [vmem:[#allocation7 + $0x188] ss:$16 sps:$4 sm:$0xff]  }
 0x27d   :  { %5734 = vmatpush1.bf16.msra.mxu1 %v8452_v47  ;;  %v8514_v47 = vld [vmem:[#allocation7 + $0x3a4] ss:$16 sps:$4 sm:$0xff]  }
 0x27e   :  { %5906 = vmatpush1.bf16.msra.mxu0 %v8455_v51  ;;  %5735 = vmatprep.subr.bf16.mxu1 %v8460_v52  ;;  %v8517_v51 = vld [vmem:[#allocation7 + $0x1ac] ss:$16 sps:$4 sm:$0xff]   ;;  %v8512_v52 = vld [vmem:[#allocation7 + $0x3a0] ss:$16 sps:$4 sm:$0xff]  }
 0x27f   :  { %5907 = vmatprep.subr.bf16.mxu0 %v8463_v16  ;;  %v8515_v16 = vld [vmem:[#allocation7 + $0x1a8] ss:$16 sps:$4 sm:$0xff]  }
 0x281   :  { %5736 = vmatpush1.bf16.msra.mxu1 %v8458_v53  ;;  %v8520_v53 = vld [vmem:[#allocation7 + $0x3c4] ss:$16 sps:$4 sm:$0xff]  }
 0x282   :  { %5908 = vmatpush1.bf16.msra.mxu0 %v8461_v55  ;;  %5737 = vmatprep.subr.bf16.mxu1 %v8466_v57  ;;  %v8523_v55 = vld [vmem:[#allocation7 + $0x1cc] ss:$16 sps:$4 sm:$0xff]   ;;  %v8521_v57 = vld [vmem:[#allocation7 + $0x1c8] ss:$16 sps:$4 sm:$0xff]  }
 0x283   :  { %5909 = vmatprep.subr.bf16.mxu0 %v8469_v60  ;;  %v8529_v60 = vld [vmem:[#allocation7 + $0x1ec] ss:$16 sps:$4 sm:$0xff]  }
 0x284   :  { %v3456_v3 = vpop.f32.mrb[4].mxu0 }
 0x285   :  { %v3458_v5 = vpop.f32.mrb[5].mxu0  ;;  %5738 = vmatpush1.bf16.msra.mxu1 %v8464_v61  ;;  %v9345_v42 = vadd.f32 %v3456_v3, %v617_v62  ;;  %v8524_v61 = vld [vmem:[#allocation7 + $0x3e0] ss:$16 sps:$4 sm:$0xff]  }
 0x286   :  { %v3460_v8 = vpop.f32.mrb[6].mxu0  ;;  %5910 = vmatpush1.bf16.msra.mxu0 %v8467_v63  ;;  %5739 = vmatprep.subr.bf16.mxu1 %v8472_v0  ;;  %v9349_v20 = vadd.f32 %v3458_v5, %v621_v29  ;;  %v8532_v63 = vld [vmem:[#allocation7 + $0x404] ss:$16 sps:$4 sm:$0xff]   ;;  %v8535_v0 = vld [vmem:[#allocation7 + $0x20c] ss:$16 sps:$4 sm:$0xff]  }
 0x287   :  { %v9347_v13 = vadd.f32 %v3460_v8, %v617_v62  ;;  %v3462_v17 = vpop.f32.mrb[7].mxu0  ;;  %5911 = vmatprep.subr.bf16.mxu0 %v8475_v4  ;;  %v8527_v62 = vld [vmem:[#allocation7 + $0x1e8] ss:$16 sps:$4 sm:$0xff]   ;;  %v8530_v3 = vld [vmem:[#allocation7 + $0x400] ss:$16 sps:$4 sm:$0xff]  }
 0x288   :  { %v9351_v9 = vadd.f32 %v3462_v17, %v621_v29  ;;  %v9361_v29 = vmax.bf16 %v9096_v15, %v3725_v54  ;;  %v8533_v4 = vld [vmem:[#allocation7 + $0x208] ss:$16 sps:$4 sm:$0xff]   ;;  %v8538_v5 = vld [vmem:[#allocation7 + $0x424] ss:$16 sps:$4 sm:$0xff]   ;;  %v8547_v17 = vld [vmem:[#allocation7 + $0x24c] ss:$16 sps:$4 sm:$0xff]  }
 0x289   :  { %v3727_v50 = vpack.c.bf16 %v9347_v13, %v9345_v42  ;;  %5740 = vmatpush1.bf16.msra.mxu1 %v8470_v10  ;;  %v8541_v10 = vld [vmem:[#allocation7 + $0x22c] ss:$16 sps:$4 sm:$0xff]   ;;  %v8544_v54 = vld [vmem:[#allocation7 + $0x444] ss:$16 sps:$4 sm:$0xff]  }
 0x28a   :  { %v3728_v58 = vpack.c.bf16 %v9351_v9, %v9349_v20  ;;  %5912 = vmatpush1.bf16.msra.mxu0 %v8473_v18  ;;  %5741 = vmatprep.subr.bf16.mxu1 %v8478_v19  ;;  %v8542_v18 = vld [vmem:[#allocation7 + $0x440] ss:$16 sps:$4 sm:$0xff]   ;;  %v8545_v19 = vld [vmem:[#allocation7 + $0x248] ss:$16 sps:$4 sm:$0xff]   ;;  %v8550_v20 = vld [vmem:[#allocation7 + $0x464] ss:$16 sps:$4 sm:$0xff]  }
 0x28b   :  { %5913 = vmatprep.subr.bf16.mxu0 %v8481_v12  ;;  %v8548_v9 = vld [vmem:[#allocation7 + $0x460] ss:$16 sps:$4 sm:$0xff]   ;;  %v8551_v12 = vld [vmem:[#allocation7 + $0x268] ss:$16 sps:$4 sm:$0xff]   ;;  %v8640_v42 = vld [vmem:[#allocation7 + $0x644] ss:$16 sps:$4 sm:$0xff]  }
 0x28c   :  { %v9368_v8 = vmax.bf16 %v9096_v15, %v3728_v58  ;;  %v8556_v58 = vld [vmem:[#allocation7 + $0x484] ss:$16 sps:$4 sm:$0xff]   ;;  %v8643_v13 = vld [vmem:[#allocation7 + $0x44c] ss:$16 sps:$4 sm:$0xff]  }
 0x28d   :  { %5742 = vmatpush1.bf16.msra.mxu1 %v8476_v21  ;;  %v8559_v21 = vld [vmem:[#allocation7 + $0x28c] ss:$16 sps:$4 sm:$0xff]  }
 0x28e   :  { %5914 = vmatpush1.bf16.msra.mxu0 %v8479_v22  ;;  %5743 = vmatprep.subr.bf16.mxu1 %v8484_v23  ;;  %v8557_v22 = vld [vmem:[#allocation7 + $0x288] ss:$16 sps:$4 sm:$0xff]   ;;  %v8562_v23 = vld [vmem:[#allocation7 + $0x4a4] ss:$16 sps:$4 sm:$0xff]  }
 0x28f   :  { %5915 = vmatprep.subr.bf16.mxu0 %v8487_v25  ;;  %v8565_v25 = vld [vmem:[#allocation7 + $0x2ac] ss:$16 sps:$4 sm:$0xff]  }
 0x291   :  { %5744 = vmatpush1.bf16.msra.mxu1 %v8482_v26  ;;  %v8560_v26 = vld [vmem:[#allocation7 + $0x4a0] ss:$16 sps:$4 sm:$0xff]  }
 0x292   :  { %5916 = vmatpush1.bf16.msra.mxu0 %v8485_v7  ;;  %5745 = vmatprep.subr.bf16.mxu1 %v8490_v28  ;;  %v8563_v7 = vld [vmem:[#allocation7 + $0x2a8] ss:$16 sps:$4 sm:$0xff]   ;;  %v8568_v28 = vld [vmem:[#allocation7 + $0x4c4] ss:$16 sps:$4 sm:$0xff]  }
 0x293   :  { %5917 = vmatprep.subr.bf16.mxu0 %v8493_v11  ;;  %v8571_v11 = vld [vmem:[#allocation7 + $0x2cc] ss:$16 sps:$4 sm:$0xff]  }
 0x295   :  { %5746 = vmatpush1.bf16.msra.mxu1 %v8488_v33  ;;  %v8566_v33 = vld [vmem:[#allocation7 + $0x4c0] ss:$16 sps:$4 sm:$0xff]  }
 0x296   :  { %5918 = vmatpush1.bf16.msra.mxu0 %v8491_v48  ;;  %5747 = vmatprep.subr.bf16.mxu1 %v8496_v30  ;;  %v8569_v48 = vld [vmem:[#allocation7 + $0x2c8] ss:$16 sps:$4 sm:$0xff]   ;;  %v8574_v30 = vld [vmem:[#allocation7 + $0x4e4] ss:$16 sps:$4 sm:$0xff]  }
 0x297   :  { %5919 = vmatprep.subr.bf16.mxu0 %v8499_v32  ;;  %v8577_v32 = vld [vmem:[#allocation7 + $0x2ec] ss:$16 sps:$4 sm:$0xff]  }
 0x299   :  { %5748 = vmatpush1.bf16.msra.mxu1 %v8494_v35  ;;  %v8572_v35 = vld [vmem:[#allocation7 + $0x4e0] ss:$16 sps:$4 sm:$0xff]  }
 0x29a   :  { %5920 = vmatpush1.bf16.msra.mxu0 %v8497_v37  ;;  %5749 = vmatprep.subr.bf16.mxu1 %v8502_v2  ;;  %v8575_v37 = vld [vmem:[#allocation7 + $0x2e8] ss:$16 sps:$4 sm:$0xff]   ;;  %v8580_v2 = vld [vmem:[#allocation7 + $0x504] ss:$16 sps:$4 sm:$0xff]  }
 0x29b   :  { %5921 = vmatprep.subr.bf16.mxu0 %v8505_v41  ;;  %v8583_v41 = vld [vmem:[#allocation7 + $0x30c] ss:$16 sps:$4 sm:$0xff]  }
 0x29d   :  { %5750 = vmatpush1.bf16.msra.mxu1 %v8500_v45  ;;  %v8578_v45 = vld [vmem:[#allocation7 + $0x500] ss:$16 sps:$4 sm:$0xff]  }
 0x29e   :  { %5922 = vmatpush1.bf16.msra.mxu0 %v8503_v38  ;;  %5751 = vmatprep.subr.bf16.mxu1 %v8508_v43  ;;  %v8581_v38 = vld [vmem:[#allocation7 + $0x308] ss:$16 sps:$4 sm:$0xff]   ;;  %v8586_v43 = vld [vmem:[#allocation7 + $0x524] ss:$16 sps:$4 sm:$0xff]  }
 0x29f   :  { %5923 = vmatprep.subr.bf16.mxu0 %v8511_v24  ;;  %v8589_v24 = vld [vmem:[#allocation7 + $0x32c] ss:$16 sps:$4 sm:$0xff]  }
 0x2a1   :  { %5752 = vmatpush1.bf16.msra.mxu1 %v8506_v14  ;;  %v8584_v14 = vld [vmem:[#allocation7 + $0x520] ss:$16 sps:$4 sm:$0xff]  }
 0x2a2   :  { %5924 = vmatpush1.bf16.msra.mxu0 %v8509_v27  ;;  %5753 = vmatprep.subr.bf16.mxu1 %v8514_v47  ;;  %v8587_v27 = vld [vmem:[#allocation7 + $0x328] ss:$16 sps:$4 sm:$0xff]   ;;  %v8592_v47 = vld [vmem:[#allocation7 + $0x544] ss:$16 sps:$4 sm:$0xff]  }
 0x2a3   :  { %5925 = vmatprep.subr.bf16.mxu0 %v8517_v51  ;;  %v8595_v51 = vld [vmem:[#allocation7 + $0x34c] ss:$16 sps:$4 sm:$0xff]  }
 0x2a5   :  { %5754 = vmatpush1.bf16.msra.mxu1 %v8512_v52  ;;  %v8590_v52 = vld [vmem:[#allocation7 + $0x540] ss:$16 sps:$4 sm:$0xff]  }
 0x2a6   :  { %5926 = vmatpush1.bf16.msra.mxu0 %v8515_v16  ;;  %5755 = vmatprep.subr.bf16.mxu1 %v8520_v53  ;;  %v8593_v16 = vld [vmem:[#allocation7 + $0x348] ss:$16 sps:$4 sm:$0xff]   ;;  %v8598_v53 = vld [vmem:[#allocation7 + $0x564] ss:$16 sps:$4 sm:$0xff]  }
 0x2a7   :  { %5927 = vmatprep.subr.bf16.mxu0 %v8523_v55  ;;  %v8601_v55 = vld [vmem:[#allocation7 + $0x36c] ss:$16 sps:$4 sm:$0xff]  }
 0x2a9   :  { %5756 = vmatpush1.bf16.msra.mxu1 %v8518_v56  ;;  %v8596_v56 = vld [vmem:[#allocation7 + $0x560] ss:$16 sps:$4 sm:$0xff]  }
 0x2aa   :  { %5928 = vmatpush1.bf16.msra.mxu0 %v8521_v57  ;;  %5757 = vmatprep.subr.bf16.mxu1 %v8526_v59  ;;  %v8599_v57 = vld [vmem:[#allocation7 + $0x368] ss:$16 sps:$4 sm:$0xff]   ;;  %v8604_v59 = vld [vmem:[#allocation7 + $0x584] ss:$16 sps:$4 sm:$0xff]  }
 0x2ab   :  { %5929 = vmatprep.subr.bf16.mxu0 %v8529_v60  ;;  %v8607_v60 = vld [vmem:[#allocation7 + $0x38c] ss:$16 sps:$4 sm:$0xff]  }
 0x2ad   :  { %5758 = vmatpush1.bf16.msra.mxu1 %v8524_v61  ;;  %v8602_v61 = vld [vmem:[#allocation7 + $0x580] ss:$16 sps:$4 sm:$0xff]  }
 0x2ae   :  { %5930 = vmatpush1.bf16.msra.mxu0 %v8527_v62  ;;  %5770 = vmatprep.subr.bf16.mxu1 %v8532_v63  ;;  %v8605_v62 = vld [vmem:[#allocation7 + $0x388] ss:$16 sps:$4 sm:$0xff]   ;;  %v8610_v63 = vld [vmem:[#allocation7 + $0x5a4] ss:$16 sps:$4 sm:$0xff]  }
 0x2af   :  { %5942 = vmatprep.subr.bf16.mxu0 %v8535_v0  ;;  %v8613_v0 = vld [vmem:[#allocation7 + $0x3ac] ss:$16 sps:$4 sm:$0xff]  }
 0x2b0   :  { %5760 = vmatmul.mubr.bf16.vlgmr.msra.gmra.mrb[12].mxu1 %v9361_v29 }
 0x2b1   :  { %5932 = vmatmul.mubr.bf16.vlgmr.msra.gmra.mrb[12].mxu0 %v9329_v31  ;;  %5771 = vmatpush1.bf16.msra.mxu1 %v8530_v3  ;;  %v8553_v31 = vld [vmem:[#allocation7 + $0x26c] ss:$16 sps:$4 sm:$0xff]   ;;  %v8608_v3 = vld [vmem:[#allocation7 + $0x5a0] ss:$16 sps:$4 sm:$0xff]  }
 0x2b2   :  { %5802 = vmatprep.mubr.bf16.mxu1 %v9368_v8  ;;  %5943 = vmatpush1.bf16.msra.mxu0 %v8533_v4  ;;  %v8611_v4 = vld [vmem:[#allocation7 + $0x3a8] ss:$16 sps:$4 sm:$0xff]  }
 0x2b3   :  { %5974 = vmatprep.mubr.bf16.mxu0 %v9335_v34  ;;  %5772 = vmatprep.subr.bf16.mxu1 %v8538_v5  ;;  %v8554_v34 = vld [vmem:[#allocation7 + $0x480] ss:$16 sps:$4 sm:$0xff]   ;;  %v8616_v5 = vld [vmem:[#allocation7 + $0x5c4] ss:$16 sps:$4 sm:$0xff]  }
 0x2b4   :  { %5944 = vmatprep.subr.bf16.mxu0 %v8541_v10  ;;  %v8619_v10 = vld [vmem:[#allocation7 + $0x3cc] ss:$16 sps:$4 sm:$0xff]  }
 0x2b5   :  { %5773 = vmatpush1.bf16.msra.mxu1 %v8536_v39  ;;  %v8614_v39 = vld [vmem:[#allocation7 + $0x5c0] ss:$16 sps:$4 sm:$0xff]  }
 0x2b6   :  { %5945 = vmatpush1.bf16.msra.mxu0 %v8539_v40  ;;  %5774 = vmatprep.subr.bf16.mxu1 %v8544_v54  ;;  %v8617_v40 = vld [vmem:[#allocation7 + $0x3c8] ss:$16 sps:$4 sm:$0xff]   ;;  %v8622_v54 = vld [vmem:[#allocation7 + $0x5e4] ss:$16 sps:$4 sm:$0xff]  }
 0x2b7   :  { %5946 = vmatprep.subr.bf16.mxu0 %v8547_v17  ;;  %v8625_v17 = vld [vmem:[#allocation7 + $0x3ec] ss:$16 sps:$4 sm:$0xff]  }
 0x2b9   :  { %5775 = vmatpush1.bf16.msra.mxu1 %v8542_v18  ;;  %v8620_v18 = vld [vmem:[#allocation7 + $0x5e0] ss:$16 sps:$4 sm:$0xff]  }
 0x2ba   :  { %5947 = vmatpush1.bf16.msra.mxu0 %v8545_v19  ;;  %5776 = vmatprep.subr.bf16.mxu1 %v8550_v20  ;;  %v8623_v19 = vld [vmem:[#allocation7 + $0x3e8] ss:$16 sps:$4 sm:$0xff]   ;;  %v8628_v20 = vld [vmem:[#allocation7 + $0x604] ss:$16 sps:$4 sm:$0xff]  }
 0x2bb   :  { %5948 = vmatprep.subr.bf16.mxu0 %v8553_v31  ;;  %v8631_v31 = vld [vmem:[#allocation7 + $0x40c] ss:$16 sps:$4 sm:$0xff]  }
 0x2bd   :  { %5777 = vmatpush1.bf16.msra.mxu1 %v8548_v9  ;;  %v8626_v9 = vld [vmem:[#allocation7 + $0x600] ss:$16 sps:$4 sm:$0xff]  }
 0x2be   :  { %5949 = vmatpush1.bf16.msra.mxu0 %v8551_v12  ;;  %5778 = vmatprep.subr.bf16.mxu1 %v8556_v58  ;;  %v9377_v12 = vmax.bf16 %v9096_v15, %v3727_v50  ;;  %v8629_v58 = vld [vmem:[#allocation7 + $0x408] ss:$16 sps:$4 sm:$0xff]   ;;  %v8638_v50 = vld [vmem:[#allocation7 + $0x640] ss:$16 sps:$4 sm:$0xff]  }
 0x2bf   :  { %5950 = vmatprep.subr.bf16.mxu0 %v8559_v21  ;;  %v8634_v21 = vld [vmem:[#allocation7 + $0x624] ss:$16 sps:$4 sm:$0xff]  }
 0x2c1   :  { %5779 = vmatpush1.bf16.msra.mxu1 %v8554_v34  ;;  %v8637_v34 = vld [vmem:[#allocation7 + $0x42c] ss:$16 sps:$4 sm:$0xff]  }
 0x2c2   :  { %5951 = vmatpush1.bf16.msra.mxu0 %v8557_v22  ;;  %5780 = vmatprep.subr.bf16.mxu1 %v8562_v23  ;;  %v8632_v22 = vld [vmem:[#allocation7 + $0x620] ss:$16 sps:$4 sm:$0xff]   ;;  %v8635_v23 = vld [vmem:[#allocation7 + $0x428] ss:$16 sps:$4 sm:$0xff]  }
 0x2c3   :  { %5952 = vmatprep.subr.bf16.mxu0 %v8565_v25  ;;  %v8641_v25 = vld [vmem:[#allocation7 + $0x448] ss:$16 sps:$4 sm:$0xff]  }
 0x2c5   :  { %5781 = vmatpush1.bf16.msra.mxu1 %v8560_v26  ;;  %v8646_v26 = vld [vmem:[#allocation7 + $0x664] ss:$16 sps:$4 sm:$0xff]  }
 0x2c6   :  { %5953 = vmatpush1.bf16.msra.mxu0 %v8563_v7  ;;  %5782 = vmatprep.subr.bf16.mxu1 %v8568_v28  ;;  %v8649_v7 = vld [vmem:[#allocation7 + $0x46c] ss:$16 sps:$4 sm:$0xff]   ;;  %v8647_v28 = vld [vmem:[#allocation7 + $0x468] ss:$16 sps:$4 sm:$0xff]  }
 0x2c7   :  { %5954 = vmatprep.subr.bf16.mxu0 %v8571_v11  ;;  %v8652_v11 = vld [vmem:[#allocation7 + $0x684] ss:$16 sps:$4 sm:$0xff]  }
 0x2c9   :  { %5783 = vmatpush1.bf16.msra.mxu1 %v8566_v33  ;;  %v8650_v33 = vld [vmem:[#allocation7 + $0x680] ss:$16 sps:$4 sm:$0xff]  }
 0x2ca   :  { %5955 = vmatpush1.bf16.msra.mxu0 %v8569_v48  ;;  %5784 = vmatprep.subr.bf16.mxu1 %v8574_v30  ;;  %v8653_v48 = vld [vmem:[#allocation7 + $0x488] ss:$16 sps:$4 sm:$0xff]   ;;  %v624_v30 = vsub.s32 6, %v9258_v36 }
 0x2cb   :  { %5956 = vmatprep.subr.bf16.mxu0 %v8577_v32  ;;  %v8658_v32 = vld [vmem:[#allocation7 + $0x6a4] ss:$16 sps:$4 sm:$0xff]  }
 0x2cd   :  { %5785 = vmatpush1.bf16.msra.mxu1 %v8572_v35  ;;  %v628_v35 = vsub.s32 7, %v9258_v36  ;;  %v8899_v36 = vld [vmem:[#allocation10 + $0x8] sm:$0xff]  }
 0x2ce   :  { %5957 = vmatpush1.bf16.msra.mxu0 %v8575_v37  ;;  %5786 = vmatprep.subr.bf16.mxu1 %v8580_v2  ;;  %v8661_v37 = vld [vmem:[#allocation7 + $0x4ac] ss:$16 sps:$4 sm:$0xff]   ;;  %v8656_v2 = vld [vmem:[#allocation7 + $0x6a0] ss:$16 sps:$4 sm:$0xff]  }
 0x2cf   :  { %5958 = vmatprep.subr.bf16.mxu0 %v8583_v41  ;;  %v625_v41 = vrot.slane %v9305_v49, %v624_v30  ;;  %v8665_v49 = vld [vmem:[#allocation7 + $0x4c8] ss:$16 sps:$4 sm:$0xff]   ;;  %v8721_v30 = vld [vmem:[#allocation7 + $0x5ec] ss:$16 sps:$4 sm:$0xff]  }
 0x2d1   :  { %5787 = vmatpush1.bf16.msra.mxu1 %v8578_v45  ;;  %v8659_v45 = vld [vmem:[#allocation7 + $0x4a8] ss:$16 sps:$4 sm:$0xff]  }
 0x2d2   :  { %5959 = vmatpush1.bf16.msra.mxu0 %v8581_v38  ;;  %5788 = vmatprep.subr.bf16.mxu1 %v8586_v43  ;;  %v8664_v38 = vld [vmem:[#allocation7 + $0x6c4] ss:$16 sps:$4 sm:$0xff]  }
 0x2d3   :  { %5960 = vmatprep.subr.bf16.mxu0 %v8589_v24  ;;  %v8917_v24 = vld [vmem:[#allocation11] sm:$0xff] }
 0x2d5   :  { %5789 = vmatpush1.bf16.msra.mxu1 %v8584_v14  ;;  %v629_v14 = vrot.slane %v8917_v24, %v628_v35  ;;  %v8719_v35 = vld [vmem:[#allocation7 + $0x5e8] ss:$16 sps:$4 sm:$0xff]   ;;  %v8733_v24 = vld [vmem:[#allocation7 + $0x62c] ss:$16 sps:$4 sm:$0xff]  }
 0x2d6   :  { %5961 = vmatpush1.bf16.msra.mxu0 %v8587_v27  ;;  %5790 = vmatprep.subr.bf16.mxu1 %v8592_v47  ;;  %v8667_v27 = vld [vmem:[#allocation7 + $0x4cc] ss:$16 sps:$4 sm:$0xff]  }
 0x2d7   :  { %5962 = vmatprep.subr.bf16.mxu0 %v8595_v51 }
 0x2d9   :  { %5791 = vmatpush1.bf16.msra.mxu1 %v8590_v52  ;;  %v8662_v52 = vld [vmem:[#allocation7 + $0x6c0] ss:$16 sps:$4 sm:$0xff]  }
 0x2da   :  { %5963 = vmatpush1.bf16.msra.mxu0 %v8593_v16  ;;  %5792 = vmatprep.subr.bf16.mxu1 %v8598_v53 }
 0x2db   :  { %5964 = vmatprep.subr.bf16.mxu0 %v8601_v55 }
 0x2dd   :  { %5793 = vmatpush1.bf16.msra.mxu1 %v8596_v56  ;;  %v8670_v56 = vld [vmem:[#allocation7 + $0x6e4] ss:$16 sps:$4 sm:$0xff]  }
 0x2de   :  { %5965 = vmatpush1.bf16.msra.mxu0 %v8599_v57  ;;  %5794 = vmatprep.subr.bf16.mxu1 %v8604_v59 }
 0x2df   :  { %5966 = vmatprep.subr.bf16.mxu0 %v8607_v60  ;;  %v8673_v60 = vld [vmem:[#allocation7 + $0x4ec] ss:$16 sps:$4 sm:$0xff]  }
 0x2e1   :  { %5795 = vmatpush1.bf16.msra.mxu1 %v8602_v61 }
 0x2e2   :  { %5967 = vmatpush1.bf16.msra.mxu0 %v8605_v62  ;;  %5796 = vmatprep.subr.bf16.mxu1 %v8610_v63  ;;  %v8668_v63 = vld [vmem:[#allocation7 + $0x6e0] ss:$16 sps:$4 sm:$0xff]  }
 0x2e3   :  { %5968 = vmatprep.subr.bf16.mxu0 %v8613_v0  ;;  %v8671_v0 = vld [vmem:[#allocation7 + $0x4e8] ss:$16 sps:$4 sm:$0xff]  }
 0x2e5   :  { %5797 = vmatpush1.bf16.msra.mxu1 %v8608_v3  ;;  %v8676_v3 = vld [vmem:[#allocation7 + $0x704] ss:$16 sps:$4 sm:$0xff]  }
 0x2e6   :  { %5969 = vmatpush1.bf16.msra.mxu0 %v8611_v4  ;;  %5798 = vmatprep.subr.bf16.mxu1 %v8616_v5  ;;  %v8679_v5 = vld [vmem:[#allocation7 + $0x50c] ss:$16 sps:$4 sm:$0xff]  }
 0x2e7   :  { %5970 = vmatprep.subr.bf16.mxu0 %v8619_v10  ;;  %v8674_v10 = vld [vmem:[#allocation7 + $0x700] ss:$16 sps:$4 sm:$0xff]  }
 0x2e9   :  { %5799 = vmatpush1.bf16.msra.mxu1 %v8614_v39  ;;  %v8677_v39 = vld [vmem:[#allocation7 + $0x508] ss:$16 sps:$4 sm:$0xff]  }
 0x2ea   :  { %5971 = vmatpush1.bf16.msra.mxu0 %v8617_v40  ;;  %5800 = vmatprep.subr.bf16.mxu1 %v8622_v54  ;;  %v8682_v40 = vld [vmem:[#allocation7 + $0x724] ss:$16 sps:$4 sm:$0xff]   ;;  %v8685_v54 = vld [vmem:[#allocation7 + $0x52c] ss:$16 sps:$4 sm:$0xff]  }
 0x2eb   :  { %5972 = vmatprep.subr.bf16.mxu0 %v8625_v17  ;;  %v8680_v17 = vld [vmem:[#allocation7 + $0x720] ss:$16 sps:$4 sm:$0xff]  }
 0x2ed   :  { %5801 = vmatpush1.bf16.msra.mxu1 %v8620_v18  ;;  %v8683_v18 = vld [vmem:[#allocation7 + $0x528] ss:$16 sps:$4 sm:$0xff]  }
 0x2ee   :  { %5973 = vmatpush1.bf16.msra.mxu0 %v8623_v19  ;;  %5813 = vmatprep.subr.bf16.mxu1 %v8628_v20  ;;  %v8688_v19 = vld [vmem:[#allocation7 + $0x744] ss:$16 sps:$4 sm:$0xff]   ;;  %v8691_v20 = vld [vmem:[#allocation7 + $0x54c] ss:$16 sps:$4 sm:$0xff]  }
 0x2ef   :  { %5985 = vmatprep.subr.bf16.mxu0 %v8631_v31  ;;  %v8686_v31 = vld [vmem:[#allocation7 + $0x740] ss:$16 sps:$4 sm:$0xff]  }
 0x2f0   :  { %5803 = vmatmul.mubr.bf16.vlgmr.msra.gmra.mrb[12].mxu1 %v9377_v12 }
 0x2f1   :  { %5975 = vmatmul.mubr.bf16.vlgmr.msra.gmra.mrb[12].mxu0 %v9361_v29  ;;  %5814 = vmatpush1.bf16.msra.mxu1 %v8626_v9  ;;  %v8644_v29 = vld [vmem:[#allocation7 + $0x660] ss:$16 sps:$4 sm:$0xff]   ;;  %v8689_v9 = vld [vmem:[#allocation7 + $0x548] ss:$16 sps:$4 sm:$0xff]  }
 0x2f2   :  { %5986 = vmatpush1.bf16.msra.mxu0 %v8629_v58  ;;  %6017 = vmatprep.mubr.bf16.mxu0 %v9368_v8  ;;  %v8655_v8 = vld [vmem:[#allocation7 + $0x48c] ss:$16 sps:$4 sm:$0xff]   ;;  %v8694_v58 = vld [vmem:[#allocation7 + $0x764] ss:$16 sps:$4 sm:$0xff]  }
 0x2f3   :  { %5815 = vmatprep.subr.bf16.mxu1 %v8634_v21  ;;  %5987 = vmatprep.subr.bf16.mxu0 %v8637_v34  ;;  %v8697_v21 = vld [vmem:[#allocation7 + $0x56c] ss:$16 sps:$4 sm:$0xff]   ;;  %v8692_v34 = vld [vmem:[#allocation7 + $0x760] ss:$16 sps:$4 sm:$0xff]  }
 0x2f5   :  { %5816 = vmatpush1.bf16.msra.mxu1 %v8632_v22  ;;  %v8695_v22 = vld [vmem:[#allocation7 + $0x568] ss:$16 sps:$4 sm:$0xff]  }
 0x2f6   :  { %5988 = vmatpush1.bf16.msra.mxu0 %v8635_v23  ;;  %5817 = vmatprep.subr.bf16.mxu1 %v8640_v42  ;;  %v8700_v23 = vld [vmem:[#allocation7 + $0x784] ss:$16 sps:$4 sm:$0xff]   ;;  %v8703_v42 = vld [vmem:[#allocation7 + $0x58c] ss:$16 sps:$4 sm:$0xff]  }
 0x2f7   :  { %5989 = vmatprep.subr.bf16.mxu0 %v8643_v13  ;;  %v8698_v13 = vld [vmem:[#allocation7 + $0x780] ss:$16 sps:$4 sm:$0xff]  }
 0x2f9   :  { %5818 = vmatpush1.bf16.msra.mxu1 %v8638_v50  ;;  %v8701_v50 = vld [vmem:[#allocation7 + $0x588] ss:$16 sps:$4 sm:$0xff]  }
 0x2fa   :  { %5990 = vmatpush1.bf16.msra.mxu0 %v8641_v25  ;;  %5819 = vmatprep.subr.bf16.mxu1 %v8646_v26  ;;  %v8706_v25 = vld [vmem:[#allocation7 + $0x7a4] ss:$16 sps:$4 sm:$0xff]   ;;  %v8709_v26 = vld [vmem:[#allocation7 + $0x5ac] ss:$16 sps:$4 sm:$0xff]  }
 0x2fb   :  { %5991 = vmatprep.subr.bf16.mxu0 %v8649_v7  ;;  %v8704_v7 = vld [vmem:[#allocation7 + $0x7a0] ss:$16 sps:$4 sm:$0xff]  }
 0x2fd   :  { %5820 = vmatpush1.bf16.msra.mxu1 %v8644_v29  ;;  %v8707_v29 = vld [vmem:[#allocation7 + $0x5a8] ss:$16 sps:$4 sm:$0xff]  }
 0x2fe   :  { %5992 = vmatpush1.bf16.msra.mxu0 %v8647_v28  ;;  %5821 = vmatprep.subr.bf16.mxu1 %v8652_v11  ;;  %v8712_v28 = vld [vmem:[#allocation7 + $0x7c4] ss:$16 sps:$4 sm:$0xff]   ;;  %v8715_v11 = vld [vmem:[#allocation7 + $0x5cc] ss:$16 sps:$4 sm:$0xff]  }
 0x2ff   :  { %5993 = vmatprep.subr.bf16.mxu0 %v8655_v8  ;;  %v8710_v8 = vld [vmem:[#allocation7 + $0x7c0] ss:$16 sps:$4 sm:$0xff]  }
 0x301   :  { %5822 = vmatpush1.bf16.msra.mxu1 %v8650_v33  ;;  %v8713_v33 = vld [vmem:[#allocation7 + $0x5c8] ss:$16 sps:$4 sm:$0xff]  }
 0x302   :  { %5994 = vmatpush1.bf16.msra.mxu0 %v8653_v48  ;;  %5823 = vmatprep.subr.bf16.mxu1 %v8658_v32  ;;  %v8718_v48 = vld [vmem:[#allocation7 + $0x7e4] ss:$16 sps:$4 sm:$0xff]   ;;  %v8716_v32 = vld [vmem:[#allocation7 + $0x7e0] ss:$16 sps:$4 sm:$0xff]  }
 0x303   :  { %v3585_v43 = vpop.f32.mrb[8].mxu1  ;;  %5995 = vmatprep.subr.bf16.mxu0 %v8661_v37  ;;  %v8724_v37 = vld [vmem:[#allocation7 + $0x804] ss:$16 sps:$4 sm:$0xff]  }
 0x304   :  { %v3587_v47 = vpop.f32.mrb[9].mxu1  ;;  %v9385_v16 = vadd.f32 %v3585_v43, %v625_v41  ;;  %v8730_v43 = vld [vmem:[#allocation7 + $0x824] ss:$16 sps:$4 sm:$0xff]  }
 0x305   :  { %v3589_v51 = vpop.f32.mrb[10].mxu1  ;;  %5824 = vmatpush1.bf16.msra.mxu1 %v8656_v2  ;;  %v7556_v57 = vadd.f32 %v3587_v47, %v629_v14  ;;  %v8727_v2 = vld [vmem:[#allocation7 + $0x60c] ss:$16 sps:$4 sm:$0xff]   ;;  %v8736_v47 = vld [vmem:[#allocation7 + $0x844] ss:$16 sps:$4 sm:$0xff]  }
 0x306   :  { %v9387_v53 = vadd.f32 %v3589_v51, %v625_v41  ;;  %5996 = vmatpush1.bf16.msra.mxu0 %v8659_v45  ;;  %v3591_v55 = vpop.f32.mrb[11].mxu1  ;;  %5825 = vmatprep.subr.bf16.mxu1 %v8664_v38  ;;  %v8722_v41 = vld [vmem:[#allocation7 + $0x800] ss:$16 sps:$4 sm:$0xff]   ;;  %v8725_v38 = vld [vmem:[#allocation7 + $0x608] ss:$16 sps:$4 sm:$0xff]  }
 0x307   :  { %v7558_v59 = vadd.f32 %v3591_v55, %v629_v14  ;;  %5997 = vmatprep.subr.bf16.mxu0 %v8667_v27  ;;  %v8728_v14 = vld [vmem:[#allocation7 + $0x820] ss:$16 sps:$4 sm:$0xff]   ;;  %v8731_v27 = vld [vmem:[#allocation7 + $0x628] ss:$16 sps:$4 sm:$0xff]   ;;  %v8739_v51 = vld [vmem:[#allocation7 + $0x64c] ss:$16 sps:$4 sm:$0xff]  }
 0x308   :  { %v3729_v61 = vpack.c.bf16 %v9387_v53, %v9385_v16  ;;  %v8737_v16 = vld [vmem:[#allocation7 + $0x648] ss:$16 sps:$4 sm:$0xff]   ;;  %v8742_v53 = vld [vmem:[#allocation7 + $0x864] ss:$16 sps:$4 sm:$0xff]   ;;  %v8745_v55 = vld [vmem:[#allocation7 + $0x66c] ss:$16 sps:$4 sm:$0xff]  }
 0x309   :  { %v3730_v62 = vpack.c.bf16 %v7558_v59, %v7556_v57  ;;  %5826 = vmatpush1.bf16.msra.mxu1 %v8662_v52  ;;  %v8734_v52 = vld [vmem:[#allocation7 + $0x840] ss:$16 sps:$4 sm:$0xff]   ;;  %v8751_v57 = vld [vmem:[#allocation7 + $0x68c] ss:$16 sps:$4 sm:$0xff]  }
 0x30a   :  { %5998 = vmatpush1.bf16.msra.mxu0 %v8665_v49  ;;  %5827 = vmatprep.subr.bf16.mxu1 %v8670_v56  ;;  %v9399_v45 = vmax.bf16 %v9096_v15, %v3729_v61  ;;  %v8743_v49 = vld [vmem:[#allocation7 + $0x668] ss:$16 sps:$4 sm:$0xff]   ;;  %v8748_v56 = vld [vmem:[#allocation7 + $0x884] ss:$16 sps:$4 sm:$0xff]   ;;  %v8746_v59 = vld [vmem:[#allocation7 + $0x880] ss:$16 sps:$4 sm:$0xff]  }
 0x30b   :  { %5999 = vmatprep.subr.bf16.mxu0 %v8673_v60  ;;  %v9392_v4 = vmax.bf16 %v9096_v15, %v3730_v62  ;;  %v8749_v60 = vld [vmem:[#allocation7 + $0x688] ss:$16 sps:$4 sm:$0xff]   ;;  %v8754_v61 = vld [vmem:[#allocation7 + $0x8a4] ss:$16 sps:$4 sm:$0xff]  }
 0x30c   :  { %v106_v62 = vld [vmem:[#allocation11 + $0x8] sm:$0x3] }
 0x30d   :  { %5828 = vmatpush1.bf16.msra.mxu1 %v8668_v63  ;;  %5845 = vmatprep.mubr.bf16.mxu1 %v9392_v4  ;;  %v8757_v63 = vld [vmem:[#allocation7 + $0x6ac] ss:$16 sps:$4 sm:$0xff]  }
 0x30e   :  { %6000 = vmatpush1.bf16.msra.mxu0 %v8671_v0  ;;  %5829 = vmatprep.subr.bf16.mxu1 %v8676_v3  ;;  %v8752_v0 = vld [vmem:[#allocation7 + $0x8a0] ss:$16 sps:$4 sm:$0xff]   ;;  %v633_v3 = vrot.slane %v106_v62, %v9261_v44 }
 0x30f   :  { %6001 = vmatprep.subr.bf16.mxu0 %v8679_v5  ;;  %v8760_v5 = vld [vmem:[#allocation7 + $0x8c4] ss:$16 sps:$4 sm:$0xff]  }
 0x311   :  { %5830 = vmatpush1.bf16.msra.mxu1 %v8674_v10 }
 0x312   :  { %6002 = vmatpush1.bf16.msra.mxu0 %v8677_v39  ;;  %5831 = vmatprep.subr.bf16.mxu1 %v8682_v40  ;;  %v637_v39 = vrot.slane %v106_v62, %v9264_v46  ;;  %v8763_v40 = vld [vmem:[#allocation7 + $0x6cc] ss:$16 sps:$4 sm:$0xff]   ;;  %v8866_v62 = vld [vmem:[#allocation8 + $0x40] sm:$0xff]  }
 0x313   :  { %6003 = vmatprep.subr.bf16.mxu0 %v8685_v54 }
 0x315   :  { %5832 = vmatpush1.bf16.msra.mxu1 %v8680_v17 }
 0x316   :  { %6004 = vmatpush1.bf16.msra.mxu0 %v8683_v18  ;;  %5833 = vmatprep.subr.bf16.mxu1 %v8688_v19  ;;  %v8758_v18 = vld [vmem:[#allocation7 + $0x8c0] ss:$16 sps:$4 sm:$0xff]  }
 0x317   :  { %6005 = vmatprep.subr.bf16.mxu0 %v8691_v20 }
 0x319   :  { %5834 = vmatpush1.bf16.msra.mxu1 %v8686_v31 }
 0x31a   :  { %6006 = vmatpush1.bf16.msra.mxu0 %v8689_v9  ;;  %5835 = vmatprep.subr.bf16.mxu1 %v8694_v58  ;;  %v8761_v9 = vld [vmem:[#allocation7 + $0x6c8] ss:$16 sps:$4 sm:$0xff]   ;;  %v8766_v58 = vld [vmem:[#allocation7 + $0x8e4] ss:$16 sps:$4 sm:$0xff]  }
 0x31b   :  { %6007 = vmatprep.subr.bf16.mxu0 %v8697_v21 }
 0x31d   :  { %5836 = vmatpush1.bf16.msra.mxu1 %v8692_v34 }
 0x31e   :  { %6008 = vmatpush1.bf16.msra.mxu0 %v8695_v22  ;;  %5837 = vmatprep.subr.bf16.mxu1 %v8700_v23  ;;  %v8769_v22 = vld [vmem:[#allocation7 + $0x6ec] ss:$16 sps:$4 sm:$0xff]  }
 0x31f   :  { %6009 = vmatprep.subr.bf16.mxu0 %v8703_v42 }
 0x321   :  { %5838 = vmatpush1.bf16.msra.mxu1 %v8698_v13  ;;  %v8764_v13 = vld [vmem:[#allocation7 + $0x8e0] ss:$16 sps:$4 sm:$0xff]  }
 0x322   :  { %6010 = vmatpush1.bf16.msra.mxu0 %v8701_v50  ;;  %5839 = vmatprep.subr.bf16.mxu1 %v8706_v25  ;;  %v8767_v50 = vld [vmem:[#allocation7 + $0x6e8] ss:$16 sps:$4 sm:$0xff]   ;;  %v8772_v25 = vld [vmem:[#allocation7 + $0x904] ss:$16 sps:$4 sm:$0xff]  }
 0x323   :  { %6011 = vmatprep.subr.bf16.mxu0 %v8709_v26 }
 0x325   :  { %5840 = vmatpush1.bf16.msra.mxu1 %v8704_v7  ;;  %v8775_v7 = vld [vmem:[#allocation7 + $0x70c] ss:$16 sps:$4 sm:$0xff]  }
 0x326   :  { %6012 = vmatpush1.bf16.msra.mxu0 %v8707_v29  ;;  %5841 = vmatprep.subr.bf16.mxu1 %v8712_v28  ;;  %v8770_v29 = vld [vmem:[#allocation7 + $0x900] ss:$16 sps:$4 sm:$0xff]   ;;  %v8773_v28 = vld [vmem:[#allocation7 + $0x708] ss:$16 sps:$4 sm:$0xff]  }
 0x327   :  { %6013 = vmatprep.subr.bf16.mxu0 %v8715_v11  ;;  %v8778_v11 = vld [vmem:[#allocation7 + $0x924] ss:$16 sps:$4 sm:$0xff]  }
 0x329   :  { %5842 = vmatpush1.bf16.msra.mxu1 %v8710_v8  ;;  %v8781_v8 = vld [vmem:[#allocation7 + $0x72c] ss:$16 sps:$4 sm:$0xff]  }
 0x32a   :  { %6014 = vmatpush1.bf16.msra.mxu0 %v8713_v33  ;;  %5843 = vmatprep.subr.bf16.mxu1 %v8718_v48  ;;  %v8776_v33 = vld [vmem:[#allocation7 + $0x920] ss:$16 sps:$4 sm:$0xff]   ;;  %v8779_v48 = vld [vmem:[#allocation7 + $0x728] ss:$16 sps:$4 sm:$0xff]  }
 0x32b   :  { %6015 = vmatprep.subr.bf16.mxu0 %v8721_v30  ;;  %v8784_v30 = vld [vmem:[#allocation7 + $0x944] ss:$16 sps:$4 sm:$0xff]  }
 0x32d   :  { %5844 = vmatpush1.bf16.msra.mxu1 %v8716_v32  ;;  %v8787_v32 = vld [vmem:[#allocation7 + $0x74c] ss:$16 sps:$4 sm:$0xff]  }
 0x32e   :  { %6016 = vmatpush1.bf16.msra.mxu0 %v8719_v35  ;;  %5856 = vmatprep.subr.bf16.mxu1 %v8724_v37  ;;  %v8782_v35 = vld [vmem:[#allocation7 + $0x940] ss:$16 sps:$4 sm:$0xff]   ;;  %v8785_v37 = vld [vmem:[#allocation7 + $0x748] ss:$16 sps:$4 sm:$0xff]  }
 0x32f   :  { %6028 = vmatprep.subr.bf16.mxu0 %v8727_v2  ;;  %v8790_v2 = vld [vmem:[#allocation7 + $0x964] ss:$16 sps:$4 sm:$0xff]  }
 0x330   :  { %5846 = vmatmul.mubr.bf16.vlgmr.msra.gmra.mrb[12].mxu1 %v9399_v45 }
 0x331   :  { %6018 = vmatmul.mubr.bf16.vlgmr.msra.gmra.mrb[12].mxu0 %v9377_v12  ;;  %5857 = vmatpush1.bf16.msra.mxu1 %v8722_v41  ;;  %v8740_v12 = vld [vmem:[#allocation7 + $0x860] ss:$16 sps:$4 sm:$0xff]   ;;  %v8793_v41 = vld [vmem:[#allocation7 + $0x76c] ss:$16 sps:$4 sm:$0xff]  }
 0x332   :  { %6029 = vmatpush1.bf16.msra.mxu0 %v8725_v38  ;;  %6060 = vmatprep.mubr.bf16.mxu0 %v9392_v4  ;;  %v8755_v4 = vld [vmem:[#allocation7 + $0x6a8] ss:$16 sps:$4 sm:$0xff]   ;;  %v8788_v38 = vld [vmem:[#allocation7 + $0x960] ss:$16 sps:$4 sm:$0xff]  }
 0x333   :  { %5858 = vmatprep.subr.bf16.mxu1 %v8730_v43  ;;  %6030 = vmatprep.subr.bf16.mxu0 %v8733_v24  ;;  %v8791_v43 = vld [vmem:[#allocation7 + $0x768] ss:$16 sps:$4 sm:$0xff]   ;;  %v8796_v24 = vld [vmem:[#allocation7 + $0x984] ss:$16 sps:$4 sm:$0xff]  }
 0x335   :  { %5859 = vmatpush1.bf16.msra.mxu1 %v8728_v14  ;;  %v8799_v14 = vld [vmem:[#allocation7 + $0x78c] ss:$16 sps:$4 sm:$0xff]  }
 0x336   :  { %6031 = vmatpush1.bf16.msra.mxu0 %v8731_v27  ;;  %5860 = vmatprep.subr.bf16.mxu1 %v8736_v47  ;;  %v8794_v27 = vld [vmem:[#allocation7 + $0x980] ss:$16 sps:$4 sm:$0xff]   ;;  %v8797_v47 = vld [vmem:[#allocation7 + $0x788] ss:$16 sps:$4 sm:$0xff]  }
 0x337   :  { %6032 = vmatprep.subr.bf16.mxu0 %v8739_v51  ;;  %v8802_v51 = vld [vmem:[#allocation7 + $0x9a4] ss:$16 sps:$4 sm:$0xff]  }
 0x339   :  { %5861 = vmatpush1.bf16.msra.mxu1 %v8734_v52  ;;  %v8805_v52 = vld [vmem:[#allocation7 + $0x7ac] ss:$16 sps:$4 sm:$0xff]  }
 0x33a   :  { %6033 = vmatpush1.bf16.msra.mxu0 %v8737_v16  ;;  %5862 = vmatprep.subr.bf16.mxu1 %v8742_v53  ;;  %v8800_v16 = vld [vmem:[#allocation7 + $0x9a0] ss:$16 sps:$4 sm:$0xff]   ;;  %v8803_v53 = vld [vmem:[#allocation7 + $0x7a8] ss:$16 sps:$4 sm:$0xff]  }
 0x33b   :  { %6034 = vmatprep.subr.bf16.mxu0 %v8745_v55  ;;  %v8808_v55 = vld [vmem:[#allocation7 + $0x9c4] ss:$16 sps:$4 sm:$0xff]  }
 0x33d   :  { %5863 = vmatpush1.bf16.msra.mxu1 %v8740_v12  ;;  %v8811_v12 = vld [vmem:[#allocation7 + $0x7cc] ss:$16 sps:$4 sm:$0xff]  }
 0x33e   :  { %6035 = vmatpush1.bf16.msra.mxu0 %v8743_v49  ;;  %5864 = vmatprep.subr.bf16.mxu1 %v8748_v56  ;;  %v8806_v49 = vld [vmem:[#allocation7 + $0x9c0] ss:$16 sps:$4 sm:$0xff]   ;;  %v8809_v56 = vld [vmem:[#allocation7 + $0x7c8] ss:$16 sps:$4 sm:$0xff]  }
 0x33f   :  { %6036 = vmatprep.subr.bf16.mxu0 %v8751_v57  ;;  %v8814_v57 = vld [vmem:[#allocation7 + $0x9e4] ss:$16 sps:$4 sm:$0xff]  }
 0x341   :  { %5865 = vmatpush1.bf16.msra.mxu1 %v8746_v59  ;;  %v8817_v59 = vld [vmem:[#allocation7 + $0x7ec] ss:$16 sps:$4 sm:$0xff]  }
 0x342   :  { %6037 = vmatpush1.bf16.msra.mxu0 %v8749_v60  ;;  %5866 = vmatprep.subr.bf16.mxu1 %v8754_v61  ;;  %v8812_v60 = vld [vmem:[#allocation7 + $0x9e0] ss:$16 sps:$4 sm:$0xff]   ;;  %v8815_v61 = vld [vmem:[#allocation7 + $0x7e8] ss:$16 sps:$4 sm:$0xff]  }
 0x343   :  { %6038 = vmatprep.subr.bf16.mxu0 %v8757_v63  ;;  %v8820_v63 = vld [vmem:[#allocation7 + $0x80c] ss:$16 sps:$4 sm:$0xff]  }
 0x344   :  { %v3714_v10 = vpop.f32.mrb[8].mxu0 }
 0x345   :  { %v3716_v54 = vpop.f32.mrb[9].mxu0  ;;  %5867 = vmatpush1.bf16.msra.mxu1 %v8752_v0  ;;  %v9406_v19 = vadd.f32 %v3714_v10, %v633_v3  ;;  %v8867_v0 = vld [vmem:[#allocation8] sm:$0xff]   ;;  %v8868_v10 = vld [vmem:[#allocation8 + $0x48] sm:$0xff]  }
 0x346   :  { %v3718_v17 = vpop.f32.mrb[10].mxu0  ;;  %6039 = vmatpush1.bf16.msra.mxu0 %v8755_v4  ;;  %5868 = vmatprep.subr.bf16.mxu1 %v8760_v5  ;;  %v7560_v21 = vadd.f32 %v3716_v54, %v637_v39  ;;  %v8818_v4 = vld [vmem:[#allocation7 + $0x808] ss:$16 sps:$4 sm:$0xff]   ;;  %v8823_v5 = vld [vmem:[#allocation7 + $0x82c] ss:$16 sps:$4 sm:$0xff]   ;;  %v8870_v54 = vld [vmem:[#allocation8 + $0x50] sm:$0xff]  }
 0x347   :  { %v9408_v20 = vadd.f32 %v3718_v17, %v633_v3  ;;  %v3720_v31 = vpop.f32.mrb[11].mxu0  ;;  %6040 = vmatprep.subr.bf16.mxu0 %v8763_v40  ;;  %v8821_v40 = vld [vmem:[#allocation7 + $0x828] ss:$16 sps:$4 sm:$0xff]   ;;  %v8826_v17 = vld [vmem:[#allocation7 + $0x84c] ss:$16 sps:$4 sm:$0xff]  }
 0x348   :  { %v7562_v34 = vadd.f32 %v3720_v31, %v637_v39  ;;  %v8869_v39 = vld [vmem:[#allocation8 + $0x8] sm:$0xff]  }
 0x349   :  { %v3731_v23 = vpack.c.bf16 %v9408_v20, %v9406_v19  ;;  %5869 = vmatpush1.bf16.msra.mxu1 %v8758_v18  ;;  %v8871_v18 = vld [vmem:[#allocation8 + $0x10] sm:$0xff]   ;;  %v8824_v19 = vld [vmem:[#allocation7 + $0x848] ss:$16 sps:$4 sm:$0xff]   ;;  %v8829_v31 = vld [vmem:[#allocation7 + $0x86c] ss:$16 sps:$4 sm:$0xff]  }
 0x34a   :  { %v3732_v42 = vpack.c.bf16 %v7562_v34, %v7560_v21  ;;  %6041 = vmatpush1.bf16.msra.mxu0 %v8761_v9  ;;  %5870 = vmatprep.subr.bf16.mxu1 %v8766_v58  ;;  %v8872_v20 = vld [vmem:[#allocation8 + $0x58] sm:$0xff]   ;;  %v8874_v58 = vld [vmem:[#allocation8 + $0x60] sm:$0xff]  }
 0x34b   :  { %6042 = vmatprep.subr.bf16.mxu0 %v8769_v22  ;;  %v9420_v3 = vmax.bf16 %v9096_v15, %v3731_v23  ;;  %v8827_v9 = vld [vmem:[#allocation7 + $0x868] ss:$16 sps:$4 sm:$0xff]   ;;  %v8832_v21 = vld [vmem:[#allocation7 + $0x88c] ss:$16 sps:$4 sm:$0xff]   ;;  %v8875_v34 = vld [vmem:[#allocation8 + $0x20] sm:$0xff]  }
 0x34c   :  { %v9413_v26 = vmax.bf16 %v9096_v15, %v3732_v42  ;;  %v8830_v22 = vld [vmem:[#allocation7 + $0x888] ss:$16 sps:$4 sm:$0xff]   ;;  %v8835_v42 = vld [vmem:[#allocation7 + $0x8ac] ss:$16 sps:$4 sm:$0xff]  }
 0x34d   :  { %5871 = vmatpush1.bf16.msra.mxu1 %v8764_v13  ;;  %v8876_v23 = vld [vmem:[#allocation8 + $0x68] sm:$0xff]  }
 0x34e   :  { %5888 = vmatprep.mubr.bf16.mxu1 %v9413_v26  ;;  %6043 = vmatpush1.bf16.msra.mxu0 %v8767_v50  ;;  %v8833_v13 = vld [vmem:[#allocation7 + $0x8a8] ss:$16 sps:$4 sm:$0xff]   ;;  %v8838_v50 = vld [vmem:[#allocation7 + $0x8cc] ss:$16 sps:$4 sm:$0xff]  }
 0x34f   :  { %5872 = vmatprep.subr.bf16.mxu1 %v8772_v25  ;;  %6044 = vmatprep.subr.bf16.mxu0 %v8775_v7  ;;  %v8836_v25 = vld [vmem:[#allocation7 + $0x8c8] ss:$16 sps:$4 sm:$0xff]  }
 0x350   :  { %v8839_v7 = vld [vmem:[#allocation7 + $0x8e8] ss:$16 sps:$4 sm:$0xff]  }
 0x351   :  { %5873 = vmatpush1.bf16.msra.mxu1 %v8770_v29  ;;  %v8844_v29 = vld [vmem:[#allocation7 + $0x90c] ss:$16 sps:$4 sm:$0xff]  }
 0x352   :  { %6045 = vmatpush1.bf16.msra.mxu0 %v8773_v28  ;;  %5874 = vmatprep.subr.bf16.mxu1 %v8778_v11  ;;  %v8842_v28 = vld [vmem:[#allocation7 + $0x908] ss:$16 sps:$4 sm:$0xff]   ;;  %v8847_v11 = vld [vmem:[#allocation7 + $0x92c] ss:$16 sps:$4 sm:$0xff]  }
 0x353   :  { %6046 = vmatprep.subr.bf16.mxu0 %v8781_v8  ;;  %v8845_v8 = vld [vmem:[#allocation7 + $0x928] ss:$16 sps:$4 sm:$0xff]  }
 0x355   :  { %5875 = vmatpush1.bf16.msra.mxu1 %v8776_v33  ;;  %v8850_v33 = vld [vmem:[#allocation7 + $0x94c] ss:$16 sps:$4 sm:$0xff]  }
 0x356   :  { %6047 = vmatpush1.bf16.msra.mxu0 %v8779_v48  ;;  %5876 = vmatprep.subr.bf16.mxu1 %v8784_v30  ;;  %v8848_v48 = vld [vmem:[#allocation7 + $0x948] ss:$16 sps:$4 sm:$0xff]   ;;  %v8853_v30 = vld [vmem:[#allocation7 + $0x96c] ss:$16 sps:$4 sm:$0xff]  }
 0x357   :  { %6048 = vmatprep.subr.bf16.mxu0 %v8787_v32  ;;  %v8851_v32 = vld [vmem:[#allocation7 + $0x968] ss:$16 sps:$4 sm:$0xff]  }
 0x359   :  { %5877 = vmatpush1.bf16.msra.mxu1 %v8782_v35  ;;  %v8856_v35 = vld [vmem:[#allocation7 + $0x98c] ss:$16 sps:$4 sm:$0xff]  }
 0x35a   :  { %6049 = vmatpush1.bf16.msra.mxu0 %v8785_v37  ;;  %5878 = vmatprep.subr.bf16.mxu1 %v8790_v2  ;;  %v8854_v37 = vld [vmem:[#allocation7 + $0x988] ss:$16 sps:$4 sm:$0xff]   ;;  %v8859_v2 = vld [vmem:[#allocation7 + $0x9ac] ss:$16 sps:$4 sm:$0xff]  }
 0x35b   :  { %6050 = vmatprep.subr.bf16.mxu0 %v8793_v41  ;;  %v8857_v41 = vld [vmem:[#allocation7 + $0x9a8] ss:$16 sps:$4 sm:$0xff]  }
 0x35d   :  { %5879 = vmatpush1.bf16.msra.mxu1 %v8788_v38  ;;  %v8862_v38 = vld [vmem:[#allocation7 + $0x9cc] ss:$16 sps:$4 sm:$0xff]  }
 0x35e   :  { %6051 = vmatpush1.bf16.msra.mxu0 %v8791_v43  ;;  %5880 = vmatprep.subr.bf16.mxu1 %v8796_v24  ;;  %v8860_v43 = vld [vmem:[#allocation7 + $0x9c8] ss:$16 sps:$4 sm:$0xff]   ;;  %v8865_v24 = vld [vmem:[#allocation7 + $0x9ec] ss:$16 sps:$4 sm:$0xff]  }
 0x35f   :  { %6052 = vmatprep.subr.bf16.mxu0 %v8799_v14  ;;  %v8863_v14 = vld [vmem:[#allocation7 + $0x9e8] ss:$16 sps:$4 sm:$0xff]  }
 0x361   :  { %5881 = vmatpush1.bf16.msra.mxu1 %v8794_v27  ;;  %v8877_v27 = vld [vmem:[#allocation8 + $0x28] sm:$0xff]  }
 0x362   :  { %6053 = vmatpush1.bf16.msra.mxu0 %v8797_v47  ;;  %5882 = vmatprep.subr.bf16.mxu1 %v8802_v51  ;;  %v8878_v47 = vld [vmem:[#allocation8 + $0x70] sm:$0xff]  }
 0x363   :  { %6054 = vmatprep.subr.bf16.mxu0 %v8805_v52  ;;  %v8879_v51 = vld [vmem:[#allocation8 + $0x30] sm:$0xff]   ;;  %v8880_v52 = vld [vmem:[#allocation8 + $0x78] sm:$0xff]  }
 0x365   :  { %5883 = vmatpush1.bf16.msra.mxu1 %v8800_v16  ;;  %v8881_v16 = vld [vmem:[#allocation8 + $0x38] sm:$0xff]  }
 0x366   :  { %6055 = vmatpush1.bf16.msra.mxu0 %v8803_v53  ;;  %5884 = vmatprep.subr.bf16.mxu1 %v8808_v55  ;;  %v8882_v53 = vld [vmem:[#allocation8 + $0xc0] sm:$0xff]   ;;  %v107_v55 = vld [vmem:[#allocation11 + $0xa] sm:$0xf] }
 0x367   :  { %6056 = vmatprep.subr.bf16.mxu0 %v8811_v12  ;;  %v4067_v12 = vrot.slane %v107_v55, %v9261_v44  ;;  %v8885_v44 = vld [vmem:[#allocation8 + $0x88] sm:$0xff]  }
 0x369   :  { %5885 = vmatpush1.bf16.msra.mxu1 %v8806_v49 }
 0x36a   :  { %6057 = vmatpush1.bf16.msra.mxu0 %v8809_v56  ;;  %5886 = vmatprep.subr.bf16.mxu1 %v8814_v57  ;;  %v4071_v56 = vrot.slane %v107_v55, %v9264_v46  ;;  %v8886_v46 = vld [vmem:[#allocation8 + $0xd0] sm:$0xff]  }
 0x36b   :  { %6058 = vmatprep.subr.bf16.mxu0 %v8817_v59 }
 0x36d   :  { %5887 = vmatpush1.bf16.msra.mxu1 %v8812_v60 }
 0x36e   :  { %6059 = vmatpush1.bf16.msra.mxu0 %v8815_v61  ;;  %7466 = vmatprep.subr.bf16.mxu1 %v8866_v62 }
 0x36f   :  { %6071 = vmatprep.subr.bf16.mxu0 %v8820_v63 }
 0x370   :  { %5889 = vmatmul.mubr.bf16.vlgmr.msra.gmra.mrb[12].mxu1 %v9420_v3 }
 0x371   :  { %6061 = vmatmul.mubr.bf16.vlgmr.msra.gmra.mrb[12].mxu0 %v9399_v45  ;;  %7467 = vmatpush3.bf16.msra.mxu1 %v8867_v0  ;;  %v8873_v45 = vld [vmem:[#allocation8 + $0x18] sm:$0xff]  }
 0x372   :  { %6072 = vmatpush1.bf16.msra.mxu0 %v8818_v4  ;;  %6103 = vmatprep.mubr.bf16.mxu0 %v9413_v26  ;;  %v8841_v26 = vld [vmem:[#allocation7 + $0x8ec] ss:$16 sps:$4 sm:$0xff]  }
 0x373   :  { %6073 = vmatprep.subr.bf16.mxu0 %v8823_v5  ;;  %7468 = vmatprep.subr.bf16.mxu1 %v8868_v10  ;;  %v8883_v10 = vld [vmem:[#allocation8 + $0x80] sm:$0xff]  }
 0x375   :  { %7469 = vmatpush3.bf16.msra.mxu1 %v8869_v39 }
 0x376   :  { %6074 = vmatpush1.bf16.msra.mxu0 %v8821_v40  ;;  %7470 = vmatprep.subr.bf16.mxu1 %v8870_v54  ;;  %v8884_v40 = vld [vmem:[#allocation8 + $0xc8] sm:$0xff]   ;;  %v8887_v54 = vld [vmem:[#allocation8 + $0x90] sm:$0xff]  }
 0x377   :  { %6075 = vmatprep.subr.bf16.mxu0 %v8826_v17  ;;  %v8888_v17 = vld [vmem:[#allocation8 + $0xd8] sm:$0xff]  }
 0x379   :  { %7471 = vmatpush3.bf16.msra.mxu1 %v8871_v18  ;;  %v8889_v18 = vld [vmem:[#allocation8 + $0x98] sm:$0xff]  }
 0x37a   :  { %6076 = vmatpush1.bf16.msra.mxu0 %v8824_v19  ;;  %7472 = vmatprep.subr.bf16.mxu1 %v8872_v20  ;;  %v8890_v19 = vld [vmem:[#allocation8 + $0xe0] sm:$0xff]  }
 0x37b   :  { %6077 = vmatprep.subr.bf16.mxu0 %v8829_v31  ;;  %v8891_v20 = vld [vmem:[#allocation8 + $0xa0] sm:$0xff]   ;;  %v8892_v31 = vld [vmem:[#allocation8 + $0xe8] sm:$0xff]  }
 0x37d   :  { %7473 = vmatpush3.bf16.msra.mxu1 %v8873_v45  ;;  %v8893_v45 = vld [vmem:[#allocation8 + $0xa8] sm:$0xff]  }
 0x37e   :  { %6078 = vmatpush1.bf16.msra.mxu0 %v8827_v9  ;;  %7474 = vmatprep.subr.bf16.mxu1 %v8874_v58  ;;  %v8894_v9 = vld [vmem:[#allocation8 + $0xf0] sm:$0xff]  }
 0x37f   :  { %6079 = vmatprep.subr.bf16.mxu0 %v8832_v21  ;;  %v8895_v58 = vld [vmem:[#allocation8 + $0xb0] sm:$0xff]   ;;  %v8896_v21 = vld [vmem:[#allocation8 + $0xf8] sm:$0xff]  }
 0x381   :  { %7475 = vmatpush3.bf16.msra.mxu1 %v8875_v34  ;;  %v8897_v34 = vld [vmem:[#allocation8 + $0xb8] sm:$0xff]  }
 0x382   :  { %6080 = vmatpush1.bf16.msra.mxu0 %v8830_v22  ;;  %7476 = vmatprep.subr.bf16.mxu1 %v8876_v23  ;;  %v4075_v22 = vrot.slane %v107_v55, %v608_v1  ;;  %v8898_v1 = vld [vmem:[#allocation10] sm:$0xff]  }
 0x383   :  { %6081 = vmatprep.subr.bf16.mxu0 %v8835_v42  ;;  %v4079_v42 = vrot.slane %v107_v55, %v612_v6  ;;  %v8900_v6 = vld [vmem:[#allocation10 + $0x10] sm:$0xff]  }
 0x385   :  { %7477 = vmatpush3.bf16.msra.mxu1 %v8877_v27 }
 0x386   :  { %6082 = vmatpush1.bf16.msra.mxu0 %v8833_v13  ;;  %7478 = vmatprep.subr.bf16.mxu1 %v8878_v47 }
 0x387   :  { %6083 = vmatprep.subr.bf16.mxu0 %v8838_v50 }
 0x389   :  { %7479 = vmatpush3.bf16.msra.mxu1 %v8879_v51  ;;  %v7415_v51 = vld [vmem:[#allocation11 + $0xe] ss:$0 sm:$0xff] }
 0x38a   :  { %6084 = vmatpush1.bf16.msra.mxu0 %v8836_v25  ;;  %7480 = vmatprep.subr.bf16.mxu1 %v8880_v52 }
 0x38b   :  { %6085 = vmatprep.subr.bf16.mxu0 %v8841_v26 }
 0x38d   :  { %7481 = vmatpush3.bf16.msra.mxu1 %v8881_v16 }
 0x38e   :  { %6086 = vmatpush1.bf16.msra.mxu0 %v8839_v7  ;;  %7488 = vmatprep.subr.bf16.mxu1 %v8882_v53 }
 0x38f   :  { %6087 = vmatprep.subr.bf16.mxu0 %v8844_v29 }
 0x392   :  { %6088 = vmatpush1.bf16.msra.mxu0 %v8842_v28 }
 0x393   :  { %6089 = vmatprep.subr.bf16.mxu0 %v8847_v11 }
 0x396   :  { %6090 = vmatpush1.bf16.msra.mxu0 %v8845_v8 }
 0x397   :  { %6091 = vmatprep.subr.bf16.mxu0 %v8850_v33 }
 0x39a   :  { %6092 = vmatpush1.bf16.msra.mxu0 %v8848_v48 }
 0x39b   :  { %6093 = vmatprep.subr.bf16.mxu0 %v8853_v30  ;;  %v9097_v30 = vmov 0.0  }
 0x39e   :  { %6094 = vmatpush1.bf16.msra.mxu0 %v8851_v32  ;;  %v8901_v32 = vld [vmem:[#allocation10 + $0x18] sm:$0xff]  }
 0x39f   :  { %6095 = vmatprep.subr.bf16.mxu0 %v8856_v35  ;;  %v8902_v35 = vld [vmem:[#allocation10 + $0x20] sm:$0xff]  }
 0x3a2   :  { %6096 = vmatpush1.bf16.msra.mxu0 %v8854_v37  ;;  %v8903_v37 = vld [vmem:[#allocation10 + $0x28] sm:$0xff]  }
 0x3a3   :  { %6097 = vmatprep.subr.bf16.mxu0 %v8859_v2  ;;  %v8904_v2 = vld [vmem:[#allocation10 + $0x30] sm:$0xff]  }
 0x3a6   :  { %6098 = vmatpush1.bf16.msra.mxu0 %v8857_v41  ;;  %v8905_v41 = vld [vmem:[#allocation10 + $0x38] sm:$0xff]  }
 0x3a7   :  { %6099 = vmatprep.subr.bf16.mxu0 %v8862_v38 }
 0x3aa   :  { %6100 = vmatpush1.bf16.msra.mxu0 %v8860_v43 }
 0x3ab   :  { %6101 = vmatprep.subr.bf16.mxu0 %v8865_v24 }
 0x3ae   :  { %6102 = vmatpush1.bf16.msra.mxu0 %v8863_v14 }
 0x3b1   :  { %6104 = vmatmul.mubr.bf16.vlgmr.msra.gmra.mrb[12].mxu0 %v9420_v3 }
 0x443   :  { %v5890_v49 = vpop.f32.mrb[12].mxu1 }
 0x444   :  { %v5892_v57 = vpop.f32.mrb[13].mxu1  ;;  %v7563_v60 = vadd.f32 %v5890_v49, %v4067_v12 }
 0x445   :  { %v5894_v59 = vpop.f32.mrb[14].mxu1  ;;  %v7564_v63 = vadd.f32 %v5892_v57, %v4071_v56 }
 0x446   :  { %v7565_v61 = vadd.f32 %v5894_v59, %v4067_v12  ;;  %v5896_v62 = vpop.f32.mrb[15].mxu1 }
 0x447   :  { %v7566_v0 = vadd.f32 %v5896_v62, %v4071_v56 }
 0x448   :  { %v6114_v3 = vpack.c.bf16 %v7565_v61, %v7563_v60 }
 0x449   :  { %v6115_v4 = vpack.c.bf16 %v7566_v0, %v7564_v63  ;;  %v7448_v63 = vld [vmem:[#allocation11 + $0xf] ss:$0 sm:$0xff] }
 0x44a   :  { %v6118_v39 = vmax.bf16 %v9096_v15, %v6114_v3 }
 0x44b   :  { %v6119_v5 = vmax.bf16 %v9096_v15, %v6115_v4 }
 0x44d   :  { %6416 = vmatprep.mubr.bf16.mxu1 %v6119_v5 }
 0x44e   :  { %6417 = vmatmul.mubr.bf16.vlgmr.msra.gmra.mrb[16].mxu1 %v6118_v39 }
 0x44f   :  { %7489 = vmatpush3.bf16.msra.mxu1 %v8883_v10 }
 0x450   :  { %7490 = vmatprep.subr.bf16.mxu1 %v8884_v40 }
 0x453   :  { %7491 = vmatpush3.bf16.msra.mxu1 %v8885_v44 }
 0x454   :  { %7492 = vmatprep.subr.bf16.mxu1 %v8886_v46 }
 0x457   :  { %7493 = vmatpush3.bf16.msra.mxu1 %v8887_v54 }
 0x458   :  { %7494 = vmatprep.subr.bf16.mxu1 %v8888_v17 }
 0x45b   :  { %7495 = vmatpush3.bf16.msra.mxu1 %v8889_v18 }
 0x45c   :  { %7496 = vmatprep.subr.bf16.mxu1 %v8890_v19 }
 0x45f   :  { %7497 = vmatpush3.bf16.msra.mxu1 %v8891_v20 }
 0x460   :  { %7498 = vmatprep.subr.bf16.mxu1 %v8892_v31 }
 0x463   :  { %7499 = vmatpush3.bf16.msra.mxu1 %v8893_v45 }
 0x464   :  { %7500 = vmatprep.subr.bf16.mxu1 %v8894_v9 }
 0x467   :  { %7501 = vmatpush3.bf16.msra.mxu1 %v8895_v58 }
 0x468   :  { %7502 = vmatprep.subr.bf16.mxu1 %v8896_v21 }
 0x46b   :  { %7503 = vmatpush3.bf16.msra.mxu1 %v8897_v34 }
 0x46c   :  { %7519 = vmatprep.subr.bf16.mxu1 %v9097_v30 }
 0x484   :  { %v6105_v23 = vpop.f32.mrb[12].mxu0 }
 0x485   :  { %v6107_v13 = vpop.f32.mrb[13].mxu0  ;;  %v7567_v25 = vadd.f32 %v6105_v23, %v4075_v22 }
 0x486   :  { %v6109_v50 = vpop.f32.mrb[14].mxu0  ;;  %v7568_v29 = vadd.f32 %v6107_v13, %v4079_v42 }
 0x487   :  { %v7569_v26 = vadd.f32 %v6109_v50, %v4075_v22  ;;  %v6111_v7 = vpop.f32.mrb[15].mxu0 }
 0x488   :  { %v7570_v28 = vadd.f32 %v6111_v7, %v4079_v42 }
 0x489   :  { %v6116_v11 = vpack.c.bf16 %v7569_v26, %v7567_v25 }
 0x48a   :  { %v6117_v8 = vpack.c.bf16 %v7570_v28, %v7568_v29 }
 0x48b   :  { %v6120_v48 = vmax.bf16 %v9096_v15, %v6116_v11 }
 0x48c   :  { %v6121_v33 = vmax.bf16 %v9096_v15, %v6117_v8 }
 0x48e   :  { %6457 = vmatprep.mubr.bf16.mxu1 %v6121_v33 }
 0x48f   :  { %6458 = vmatmul.mubr.bf16.vlgmr.msra.gmra.mrb[20].mxu1 %v6120_v48 }
 0x490   :  { %7520 = vmatpush3.bf16.msra.mxu1 %v8898_v1  ;;  %7535 = vmatprep.mubr.msk.bf16.mxu1 %vm9098_vm0, %v9097_v30 }
 0x491   :  { %7521 = vmatprep.subr.bf16.mxu1 %v9097_v30 }
 0x494   :  { %7522 = vmatpush3.bf16.msra.mxu1 %v8899_v36 }
 0x495   :  { %7523 = vmatprep.subr.bf16.mxu1 %v9097_v30 }
 0x498   :  { %7524 = vmatpush3.bf16.msra.mxu1 %v8900_v6 }
 0x499   :  { %7525 = vmatprep.subr.bf16.mxu1 %v9097_v30 }
 0x49c   :  { %7526 = vmatpush3.bf16.msra.mxu1 %v8901_v32 }
 0x49d   :  { %7527 = vmatprep.subr.bf16.mxu1 %v9097_v30 }
 0x4a0   :  { %7528 = vmatpush3.bf16.msra.mxu1 %v8902_v35 }
 0x4a1   :  { %7529 = vmatprep.subr.bf16.mxu1 %v9097_v30 }
 0x4a4   :  { %7530 = vmatpush3.bf16.msra.mxu1 %v8903_v37 }
 0x4a5   :  { %7531 = vmatprep.subr.bf16.mxu1 %v9097_v30 }
 0x4a8   :  { %7532 = vmatpush3.bf16.msra.mxu1 %v8904_v2 }
 0x4a9   :  { %7533 = vmatprep.subr.bf16.mxu1 %v9097_v30 }
 0x4ac   :  { %7534 = vmatpush3.bf16.msra.mxu1 %v8905_v41 }
 0x521   :  { %v7482_v38 = vpop.f32.mrb[16].mxu1 }
 0x522   :  { %v7483_v43 = vpop.f32.mrb[17].mxu1 }
 0x523   :  { %v7484_v24 = vadd.f32 %v7483_v43, %v7482_v38  ;;  %v7485_v14 = vpop.f32.mrb[18].mxu1 }
 0x524   :  { %v7486_v27 = vpop.f32.mrb[19].mxu1 }
 0x525   :  { %v7487_v47 = vadd.f32 %v7486_v27, %v7485_v14  ;;  %v6419_v53 = vadd.f32 %v7484_v24, %v7415_v51 }
 0x527   :  { %v6422_v56 = vadd.f32 %v7487_v47, %v7415_v51 }
 0x562   :  { %v7504_v52 = vpop.f32.mrb[20].mxu1 }
 0x563   :  { %v7505_v16 = vpop.f32.mrb[21].mxu1 }
 0x564   :  { %v7506_v55 = vadd.f32 %v7505_v16, %v7504_v52  ;;  %v7507_v12 = vpop.f32.mrb[22].mxu1 }
 0x565   :  { %v7508_v49 = vpop.f32.mrb[23].mxu1 }
 0x566   :  { %v6460_v57 = vadd.f32 %v7506_v55, %v6419_v53  ;;  %v7509_v59 = vadd.f32 %v7508_v49, %v7507_v12 }
 0x568   :  { %v6463_v60 = vadd.f32 %v7509_v59, %v6422_v56 }
 0x56a   :  { %v6466_v61 = vpack.c.bf16 %v6463_v60, %v6460_v57 }
 0x56c   :  { %v6467_v62 = vmax.bf16 %v9096_v15, %v6466_v61 }
 0x56e   :  { %7536 = vmatmul.mubr.bf16.vlgmr.msra.gmra.mrb[24].mxu1 %v6467_v62 }
 0x641   :  { %v6572_v0 = vpop.f32.mrb[24].mxu1 }
 0x642   :  { %v7537_v3 = vpop.f32.mrb[25].mxu1  ;;  %v6573_v5 = vadd.f32 %v7448_v63, %v6572_v0 }
 0x643   :  { %v6575_v4 = vpop.f32.mrb[26].mxu1 }
 0x644   :  { %v6576_v10 = vadd.f32 %v7448_v63, %v6575_v4  ;;  %v7538_v39 = vpop.f32.mrb[27].mxu1 }
 0x646   :  { %v7464_v40 = vpack.c.bf16 %v6576_v10, %v6573_v5 }
 0x648   :  { %7465 = vst [vmem:[#allocation13] sm:$0xff] %v7464_v40  }
 0x649   :  { %9061 = shalt.err (!%p9058_p10)
}
 0x64a   :  { %s9062_s28 = scalar_lea.hbm %s9458_s6, 128 }
 0x64b   :  { %p9063_p11 = scmp.ne.s32.totalorder %s9458_s6, %s9062_s28  ;;  %p9066_p12 = scmp.lt.u32.totalorder %s9062_s28, %s9458_s6 }
 0x64d   :  { %p9068_p13 = pnand %p9066_p12, %p9063_p11 }
 0x64f   :  { %9071 = shalt.err (!%p9068_p13)
}
 0x650   :  { %6600 = dma.vmem_to_hbm [thread:$0]  %s6595_s24, 128, %s9458_s6, [#allocation4], %s9086_s1, %s9086_s1, %s9087_s21  }
 0x651   :  { %9080 = dma.done.wait [#allocation4], 128  }
 0x652   :  { %9081 = vsyncadd [#allocation4], 4294967168 }
 0x653   :  { %6604 = vsyncpa [#allocation3], 1 }
 0x654   :  { %6605 = vsyncpa [#allocation6], 1 }
 0x655   :  { %6606 = vsyncpa [#allocation9], 1 }
 0x656   :  { %6607 = vsyncpa [#allocation12], 1 }
 0x657   :  { %6608 = vsyncpa [#allocation4], 1 }

</bundles_post_ra>
